<compile_context>
chip_gen: v7x
topology: tpu7x:2x2x1
jax: 0.10.0
libtpu: 0.0.40
codegen_flags: <defaults>
</compile_context>

<pallas_src>
import numpy as np
import jax
import jax.numpy as jnp
from jax.experimental import pallas as pl
from jax.experimental.pallas import tpu as pltpu


# --------------------------- interpolation helpers -------------------------- #
def _interp_taps(in_size, in_scope, out_scope):
    """Static bilinear taps (<=2 per output coordinate), matching
    F.grid_sample(mode='bilinear', align_corners=False, padding_mode='zeros').

    Returns (i0, w0, i1, w1) numpy arrays; out-of-range taps get weight 0 and a
    clamped (in-bounds) index so static slicing stays legal."""
    imin, imax, _ = in_scope
    omin, omax, ostep = out_scope
    v = np.arange(omin + ostep / 2.0, omax, ostep, dtype=np.float64)
    norm = (v - imin) / (imax - imin) * 2.0 - 1.0
    pix = ((norm + 1.0) * in_size - 1.0) / 2.0       # align_corners=False unnormalize
    i0 = np.floor(pix).astype(np.int64)
    i1 = i0 + 1
    w1 = pix - i0
    w0 = 1.0 - w1
    valid0 = (i0 >= 0) & (i0 < in_size)
    valid1 = (i1 >= 0) & (i1 < in_size)
    w0 = np.where(valid0, w0, 0.0).astype(np.float32)
    w1 = np.where(valid1, w1, 0.0).astype(np.float32)
    i0 = np.clip(i0, 0, in_size - 1)
    i1 = np.clip(i1, 0, in_size - 1)
    return i0, w0, i1, w1


def make_interp_matrix(in_size, in_scope, out_scope):
    """Dense (out_size, in_size) bilinear matrix built from the same taps
    (used for the in-kernel W-axis matmul and for the pure-JAX reference)."""
    i0, w0, i1, w1 = _interp_taps(in_size, in_scope, out_scope)
    out_size = i0.shape[0]
    M = np.zeros((out_size, in_size), np.float32)
    M[np.arange(out_size), i0] += w0
    M[np.arange(out_size), i1] += w1
    return jnp.asarray(M)


def _make_border_masks(H, W, B):
    """(9, B*H*W) f32: mask[k, b*H*W + y*W + x] = 1 iff 3x3 tap k = ky*3+kx
    (dy=ky-1, dx=kx-1) reads an in-bounds pixel at output (y, x) under padding=1.
    With the batch folded into the lane axis these masks also zero every roll
    that would wrap across a batch (or frame) boundary."""
    yy, xx = np.meshgrid(np.arange(H), np.arange(W), indexing="ij")
    yy, xx = yy.reshape(-1), xx.reshape(-1)
    m = np.zeros((9, H * W), np.float32)
    for ky in range(3):
        for kx in range(3):
            dy, dx = ky - 1, kx - 1
            valid = (yy + dy >= 0) & (yy + dy < H) & (xx + dx >= 0) & (xx + dx < W)
            m[ky * 3 + kx] = valid.astype(np.float32)
    return jnp.asarray(np.tile(m, (1, B)))            # (9, B*H*W)


# --------------------------- Wrapper + kernel ------------------------------ #
def bev_segmentation_head_forward(x_nchw, input_scope, output_scope, params,
                                  compute_dtype=jnp.float32):
    """BEVGridTransform -> (conv3x3+BN+ReLU)x2 -> conv1x1 -> sigmoid.

    Returns masks_bev with shape (B, num_class, H_out, W_out) (NCHW, like torch).

    Layout: activations live as (C, N) with N = B*H_out*W_out in the lane axis
    (batch folded into lanes); all stores inside the kernel are lane-dense.

    compute_dtype: dtype of the conv matmul operands (accumulation is always
    f32).  Use jnp.bfloat16 on v5e/v6e/v7x production sizes; the resample path
    and all elementwise math stay f32.
    """
    B, C, H_in, W_in = x_nchw.shape
    y_i0, y_w0, y_i1, y_w1 = _interp_taps(H_in, input_scope[0], output_scope[0])
    wx = make_interp_matrix(W_in, input_scope[1], output_scope[1])   # (W_out, W_in)
    H_out = int(y_i0.shape[0])
    W_out = int(wx.shape[0])
    N = B * H_out * W_out
    K = params["w3"].shape[0]

    wxt = jnp.asarray(wx).T.astype(jnp.float32)          # (W_in, W_out), f32 always
    mask9 = _make_border_masks(H_out, W_out, B)          # (9, N) f32

    # Input rows ordered (b, yi, c): the C channels of a fixed (b, yi) input row
    # are contiguous sublanes, so the 2-tap H-resample reads contiguous blocks.
    x2 = jnp.transpose(x_nchw, (0, 2, 1, 3)).reshape(B * H_in * C, W_in)
    x2 = x2.astype(jnp.float32)

    w1m = params["w1"].astype(compute_dtype)             # (C, 9C), BN folded
    w2m = params["w2"].astype(compute_dtype)             # (C, 9C), BN folded
    w3m = params["w3"].astype(compute_dtype)             # (K, C)
    b1 = params["b1"].astype(jnp.float32)                # (C, 1)
    b2 = params["b2"].astype(jnp.float32)                # (C, 1)
    b3 = params["b3"].astype(jnp.float32)                # (K, 1)

    def kernel(x_ref, wxt_ref, m_ref, w1_ref, b1_ref, w2_ref, b2_ref,
               w3_ref, b3_ref, out_ref, t_ref, feat_ref):
        # ---- BEVGridTransform, separable (no Kronecker matrix) ---------------
        # (1) W-axis resample: ONE lane-dense 2D matmul, f32 accumulate.
        t_ref[...] = jnp.dot(x_ref[...], wxt_ref[...],
                             preferred_element_type=jnp.float32)   # (B*H_in*C, W_out)

        # (2) H-axis resample: bilinear => <= 2 static taps per output row, so
        # each (C, W_out) output-row block is a 2-scalar-weighted combination of
        # two contiguous sublane blocks of t (weights/indices folded at trace
        # time).  Written straight into the lane-dense (C, N) feature scratch.
        for b in range(B):
            for yo in range(H_out):
                r0 = (b * H_in + int(y_i0[yo])) * C
                r1 = (b * H_in + int(y_i1[yo])) * C
                a0 = float(y_w0[yo])
                a1 = float(y_w1[yo])
                piece = a0 * t_ref[r0:r0 + C, :] + a1 * t_ref[r1:r1 + C, :]
                col = (b * H_out + yo) * W_out
                feat_ref[:, col:col + W_out] = piece

        feat = feat_ref[...]                                         # (C, N) f32
        masks = m_ref[...]                                           # (9, N) f32

        # ---- conv3x3(pad=1,no bias)+BN+ReLU: 9 per-tap matmuls, no im2col ----
        # Taps are lane-rolls (XLU slot); rolls that wrap across a frame/batch
        # boundary are exactly the positions zeroed by the border masks.  The
        # center tap (k==4) has an all-ones mask, so its multiply is skipped.
        def conv3x3_bn_relu(f, w_ref, b_ref):
            acc = jnp.zeros((C, N), jnp.float32)
            for k in range(9):
                dy, dx = k // 3 - 1, k % 3 - 1
                s = dy * W_out + dx                    # flat shift of tap (dy,dx)
                tap = pltpu.roll(f, shift=(-s) % N, axis=1) if s != 0 else f
                if k != 4:
                    tap = tap * masks[k:k + 1, :]
                acc = acc + jnp.dot(w_ref[:, k * C:(k + 1) * C],
                                    tap.astype(compute_dtype),
                                    preferred_element_type=jnp.float32)
            return jnp.maximum(acc + b_ref[...], 0.0)              # folded BN + ReLU

        f1 = conv3x3_bn_relu(feat, w1_ref, b1_ref)
        f2 = conv3x3_bn_relu(f1, w2_ref, b2_ref)

        # ---- conv1x1 (+bias) + sigmoid ---------------------------------------
        logits = jnp.dot(w3_ref[...], f2.astype(compute_dtype),
                         preferred_element_type=jnp.float32) + b3_ref[...]
        # sigmoid(x) = 0.5*tanh(x/2)+0.5: transcendental on the EUP slot.
        out_ref[...] = (0.5 * jnp.tanh(0.5 * logits) + 0.5).astype(out_ref.dtype)

    out = pl.pallas_call(
        kernel,
        out_shape=jax.ShapeDtypeStruct((K, N), jnp.float32),
        # Batch folded into lanes => a single grid step at this problem size
        # (no per-step overhead, widest possible matmuls).  Constant-operand
        # multi-buffering is therefore moot here; a strip-tiled production
        # variant should single-buffer the weight/mask operands (see TODO).
        grid=(1,),
        in_specs=[
            pl.BlockSpec((B * H_in * C, W_in), lambda i: (0, 0)),  # x, rows (b,yi,c)
            pl.BlockSpec((W_in, W_out), lambda i: (0, 0)),         # Wx^T (f32)
            pl.BlockSpec((9, N), lambda i: (0, 0)),                # border masks
            pl.BlockSpec((C, 9 * C), lambda i: (0, 0)),            # conv1 (BN folded)
            pl.BlockSpec((C, 1), lambda i: (0, 0)),                # bias1
            pl.BlockSpec((C, 9 * C), lambda i: (0, 0)),            # conv2 (BN folded)
            pl.BlockSpec((C, 1), lambda i: (0, 0)),                # bias2
            pl.BlockSpec((K, C), lambda i: (0, 0)),                # conv3 1x1
            pl.BlockSpec((K, 1), lambda i: (0, 0)),                # bias3
        ],
        out_specs=pl.BlockSpec((K, N), lambda i: (0, 0)),
        scratch_shapes=[
            pltpu.VMEM((B * H_in * C, W_out), jnp.float32),        # W-resampled rows
            pltpu.VMEM((C, N), jnp.float32),                       # resampled features
        ],
        compiler_params=pltpu.CompilerParams(
            dimension_semantics=("arbitrary",),
            # Explicit scoped-VMEM budget; safe on every generation (v7x has
            # 64 MiB physical, v5e/v6e 128 MiB).
            vmem_limit_bytes=32 * 1024 * 1024,
        ),
    )(x2, wxt, mask9, w1m, b1, w2m, b2, w3m, b3)

    # (K, N) with N ordered (b, yo, xo) -> NCHW; only the tiny output tensor is
    # transposed outside the kernel (layout plumbing, not compute).
    return out.reshape(K, B, H_out, W_out).transpose(1, 0, 2, 3)


# --------------------- Parameter setup / BN folding (glue) ------------------ #
def init_params(key, C, K):
    """Deterministic synthetic parameters in PyTorch layouts (OIHW, BN per-channel)."""
    ks = jax.random.split(key, 12)
    p = {}
    p["conv1_w"] = 0.1 * jax.random.normal(ks[0], (C, C, 3, 3), jnp.float32)
    p["bn1_gamma"] = 1.0 + 0.1 * jax.random.normal(ks[1], (C,), jnp.float32)
    p["bn1_beta"] = 0.1 * jax.random.normal(ks[2], (C,), jnp.float32)
    p["bn1_mean"] = 0.1 * jax.random.normal(ks[3], (C,), jnp.float32)
    p["bn1_var"] = 0.5 + 0.1 * jnp.abs(jax.random.normal(ks[4], (C,), jnp.float32))
    p["conv2_w"] = 0.1 * jax.random.normal(ks[5], (C, C, 3, 3), jnp.float32)
    p["bn2_gamma"] = 1.0 + 0.1 * jax.random.normal(ks[6], (C,), jnp.float32)
    p["bn2_beta"] = 0.1 * jax.random.normal(ks[7], (C,), jnp.float32)
    p["bn2_mean"] = 0.1 * jax.random.normal(ks[8], (C,), jnp.float32)
    p["bn2_var"] = 0.5 + 0.1 * jnp.abs(jax.random.normal(ks[9], (C,), jnp.float32))
    p["conv3_w"] = 0.1 * jax.random.normal(ks[10], (K, C, 1, 1), jnp.float32)
    p["conv3_b"] = 0.1 * jax.random.normal(ks[11], (K,), jnp.float32)
    return p


def _fold_conv_bn(w_oihw, gamma, beta, mean, var, eps=1e-5):
    """Fold eval-mode BatchNorm into conv weights.

    Returns (Cout, 9*Cin) with column index (ky*3+kx)*Cin + ci — matching the
    per-tap column slices used in the kernel — plus a (Cout, 1) bias."""
    O, I = w_oihw.shape[0], w_oihw.shape[1]
    scale = gamma / jnp.sqrt(var + eps)                              # (Cout,)
    w = w_oihw * scale[:, None, None, None]                          # (O, I, 3, 3)
    wmat = jnp.transpose(w, (0, 2, 3, 1)).reshape(O, 9 * I)          # (O, 9*I)
    bias = (beta - mean * scale).reshape(O, 1)
    return wmat.astype(jnp.float32), bias.astype(jnp.float32)


def fold_params(p):
    w1, b1 = _fold_conv_bn(p["conv1_w"], p["bn1_gamma"], p["bn1_beta"],
                           p["bn1_mean"], p["bn1_var"])
    w2, b2 = _fold_conv_bn(p["conv2_w"], p["bn2_gamma"], p["bn2_beta"],
                           p["bn2_mean"], p["bn2_var"])
    w3 = p["conv3_w"][:, :, 0, 0].astype(jnp.float32)                # (K, Cin)
    b3 = p["conv3_b"].reshape(-1, 1).astype(jnp.float32)             # (K, 1)
    return {"w1": w1, "b1": b1, "w2": w2, "b2": b2, "w3": w3, "b3": b3}


# ------------------------- Pure-JAX reference (check) ----------------------- #
def ref_forward(x_nchw, wy, wx, p, eps=1e-5):
    hi = jax.lax.Precision.HIGHEST
    y = jnp.einsum('oh,nchw,pw->ncop', wy, x_nchw, wx, precision=hi)  # grid transform

    def conv_bn_relu(z, w, g, b, m, v):
        z = jax.lax.conv_general_dilated(z, w, (1, 1), ((1, 1), (1, 1)),
                                         dimension_numbers=('NCHW', 'OIHW', 'NCHW'),
                                         precision=hi)
        z = (z - m[None, :, None, None]) / jnp.sqrt(v[None, :, None, None] + eps)
        z = z * g[None, :, None, None] + b[None, :, None, None]
        return jnp.maximum(z, 0.0)

    y = conv_bn_relu(y, p["conv1_w"], p["bn1_gamma"], p["bn1_beta"],
                     p["bn1_mean"], p["bn1_var"])
    y = conv_bn_relu(y, p["conv2_w"], p["bn2_gamma"], p["bn2_beta"],
                     p["bn2_mean"], p["bn2_var"])
    y = jax.lax.conv_general_dilated(y, p["conv3_w"], (1, 1), ((0, 0), (0, 0)),
                                     dimension_numbers=('NCHW', 'OIHW', 'NCHW'),
                                     precision=hi)
    y = y + p["conv3_b"][None, :, None, None]
    return jax.nn.sigmoid(y)


# ---------------------------------- Main ------------------------------------ #
if __name__ == "__main__":
    # Full-precision f32 matmul paths for the f32-operand check (affects both
    # the XLA reference ops and the in-kernel MXU dots via the precision attr).
    jax.config.update("jax_default_matmul_precision", "highest")

    B, C, H_in, W_in = 2, 4, 16, 16
    class_names = ["drivable_area", "walkway", "divider"]
    K = len(class_names)

    # model_cfg.GRID_TRANSFORM scopes (chosen so H_out = W_out = 16, with some
    # out-of-range samples to exercise grid_sample's zero padding).
    input_scope = [[-8.0, 8.0, 1.0], [-8.0, 8.0, 1.0]]
    output_scope = [[-9.0, 9.0, 1.125], [-9.0, 9.0, 1.125]]

    key = jax.random.PRNGKey(0)
    kx, kp = jax.random.split(key)
    # batch_dict['spatial_features_2d'] (NCHW); gt_masks_bev only feeds the
    # (unimplemented) training branch, so it is not needed here.
    x = jax.random.normal(kx, (B, C, H_in, W_in), jnp.float32)

    raw_params = init_params(kp, C, K)
    folded = fold_params(raw_params)

    # Reference (pure JAX/XLA) built from the same interpolation matrices.
    wy = make_interp_matrix(H_in, input_scope[0], output_scope[0])   # (H_out, H_in)
    wx = make_interp_matrix(W_in, input_scope[1], output_scope[1])   # (W_out, W_in)
    H_out, W_out = wy.shape[0], wx.shape[0]
    ref = ref_forward(x, wy, wx, raw_params)

    # ---- f32 MXU operands: tight check ------------------------------------
    masks_bev = bev_segmentation_head_forward(x, input_scope, output_scope, folded,
                                              compute_dtype=jnp.float32)
    masks_bev = jax.block_until_ready(masks_bev)
    assert masks_bev.shape == (B, K, H_out, W_out), masks_bev.shape
    err_f32 = float(jnp.max(jnp.abs(masks_bev - ref)))
    assert err_f32 < 1e-3, f"f32 mismatch vs reference, max abs err = {err_f32}"

    # ---- bf16 MXU operands (production dtype on v5e/v6e/v7x) ---------------
    # Dtype-dependent tolerance: bf16 operands with f32 accumulation; the
    # resample path and all elementwise math stay f32.
    masks_bf16 = bev_segmentation_head_forward(x, input_scope, output_scope, folded,
                                               compute_dtype=jnp.bfloat16)
    masks_bf16 = jax.block_until_ready(masks_bf16)
    err_bf16 = float(jnp.max(jnp.abs(masks_bf16 - ref)))
    assert err_bf16 < 2e-2, f"bf16 mismatch vs reference, max abs err = {err_bf16}"

    print("KERNEL_OK")
</pallas_src>

<mosaic_0001>
module attributes {stable_mosaic.version = 11 : i64} {
  func.func @kernel(%arg0: i32, %arg1: memref<128x16xf32, #tpu.memory_space<vmem>>, %arg2: memref<16x16xf32, #tpu.memory_space<vmem>>, %arg3: memref<9x512xf32, #tpu.memory_space<vmem>>, %arg4: memref<4x36xf32, #tpu.memory_space<vmem>>, %arg5: memref<4x1xf32, #tpu.memory_space<vmem>>, %arg6: memref<4x36xf32, #tpu.memory_space<vmem>>, %arg7: memref<4x1xf32, #tpu.memory_space<vmem>>, %arg8: memref<3x4xf32, #tpu.memory_space<vmem>>, %arg9: memref<3x1xf32, #tpu.memory_space<vmem>>, %arg10: memref<3x512xf32, #tpu.memory_space<vmem>>, %arg11: memref<128x16xf32, #tpu.memory_space<vmem>>, %arg12: memref<4x512xf32, #tpu.memory_space<vmem>>) attributes {dimension_semantics = [#tpu.dimension_semantics<arbitrary>], iteration_bounds = array<i64: 1>, scalar_prefetch = 0 : i64, scratch_operands = 2 : i64, tpu.core_type = #tpu.core_type<tc>, window_params = [{pipeline_mode = #tpu.pipeline_mode<synchronous>, transform_indices = @transform_0, window_bounds = array<i64: 128, 16>}, {pipeline_mode = #tpu.pipeline_mode<synchronous>, transform_indices = @transform_1, window_bounds = array<i64: 16, 16>}, {pipeline_mode = #tpu.pipeline_mode<synchronous>, transform_indices = @transform_2, window_bounds = array<i64: 9, 512>}, {pipeline_mode = #tpu.pipeline_mode<synchronous>, transform_indices = @transform_3, window_bounds = array<i64: 4, 36>}, {pipeline_mode = #tpu.pipeline_mode<synchronous>, transform_indices = @transform_4, window_bounds = array<i64: 4, 1>}, {pipeline_mode = #tpu.pipeline_mode<synchronous>, transform_indices = @transform_5, window_bounds = array<i64: 4, 36>}, {pipeline_mode = #tpu.pipeline_mode<synchronous>, transform_indices = @transform_6, window_bounds = array<i64: 4, 1>}, {pipeline_mode = #tpu.pipeline_mode<synchronous>, transform_indices = @transform_7, window_bounds = array<i64: 3, 4>}, {pipeline_mode = #tpu.pipeline_mode<synchronous>, transform_indices = @transform_8, window_bounds = array<i64: 3, 1>}, {pipeline_mode = #tpu.pipeline_mode<synchronous>, transform_indices = @transform_9, window_bounds = array<i64: 3, 512>}]} {
    %c0 = arith.constant 0 : index
    %c0_0 = arith.constant 0 : index
    %0 = vector.load %arg1[%c0, %c0_0] : memref<128x16xf32, #tpu.memory_space<vmem>>, vector<128x16xf32>
    %c0_1 = arith.constant 0 : index
    %c0_2 = arith.constant 0 : index
    %1 = vector.load %arg2[%c0_1, %c0_2] : memref<16x16xf32, #tpu.memory_space<vmem>>, vector<16x16xf32>
    %cst = arith.constant dense<0.000000e+00> : vector<128x16xf32>
    %2 = tpu.matmul %0, %1, %cst {dimension_numbers = #tpu.dot_dimension_numbers<[1], [0], [0], [1], [0, 0, 1, 1], [], []>, precision = #tpu.contract_precision<fp32>} : vector<128x16xf32>, vector<16x16xf32>, vector<128x16xf32> -> vector<128x16xf32>
    %c0_3 = arith.constant 0 : index
    %c0_4 = arith.constant 0 : index
    %3 = vector.load %arg11[%c0_3, %c0_4] : memref<128x16xf32, #tpu.memory_space<vmem>>, vector<128x16xf32>
    tpu.vector_store %arg11[%c0_3, %c0_4], %2 {strides = array<i32>} : memref<128x16xf32, #tpu.memory_space<vmem>>, vector<128x16xf32>,
    %c0_5 = arith.constant 0 : index
    %c0_6 = arith.constant 0 : index
    %4 = vector.load %arg11[%c0_5, %c0_6] : memref<128x16xf32, #tpu.memory_space<vmem>>, vector<4x16xf32>
    %cst_7 = arith.constant 0.000000e+00 : f32
    %5 = vector.broadcast %cst_7 : f32 to vector<4x16xf32>
    %6 = arith.mulf %5, %4 : vector<4x16xf32>
    %c0_8 = arith.constant 0 : index
    %c0_9 = arith.constant 0 : index
    %7 = vector.load %arg11[%c0_8, %c0_9] : memref<128x16xf32, #tpu.memory_space<vmem>>, vector<4x16xf32>
    %cst_10 = arith.constant 6.250000e-02 : f32
    %8 = vector.broadcast %cst_10 : f32 to vector<4x16xf32>
    %9 = arith.mulf %8, %7 : vector<4x16xf32>
    %10 = arith.addf %6, %9 : vector<4x16xf32>
    %c0_11 = arith.constant 0 : index
    %c0_12 = arith.constant 0 : index
    %11 = vector.load %arg12[%c0_11, %c0_12] : memref<4x512xf32, #tpu.memory_space<vmem>>, vector<4x16xf32>
    tpu.vector_store %arg12[%c0_11, %c0_12], %10 {strides = array<i32>} : memref<4x512xf32, #tpu.memory_space<vmem>>, vector<4x16xf32>,
    %c0_13 = arith.constant 0 : index
    %c0_14 = arith.constant 0 : index
    %12 = vector.load %arg11[%c0_13, %c0_14] : memref<128x16xf32, #tpu.memory_space<vmem>>, vector<4x16xf32>
    %cst_15 = arith.constant 8.125000e-01 : f32
    %13 = vector.broadcast %cst_15 : f32 to vector<4x16xf32>
    %14 = arith.mulf %13, %12 : vector<4x16xf32>
    %c4 = arith.constant 4 : index
    %c0_16 = arith.constant 0 : index
    %15 = vector.load %arg11[%c4, %c0_16] : memref<128x16xf32, #tpu.memory_space<vmem>>, vector<4x16xf32>
    %cst_17 = arith.constant 1.875000e-01 : f32
    %16 = vector.broadcast %cst_17 : f32 to vector<4x16xf32>
    %17 = arith.mulf %16, %15 : vector<4x16xf32>
    %18 = arith.addf %14, %17 : vector<4x16xf32>
    %c0_18 = arith.constant 0 : index
    %c16 = arith.constant 16 : index
    %19 = vector.load %arg12[%c0_18, %c16] : memref<4x512xf32, #tpu.memory_space<vmem>>, vector<4x16xf32>
    tpu.vector_store %arg12[%c0_18, %c16], %18 {strides = array<i32>} : memref<4x512xf32, #tpu.memory_space<vmem>>, vector<4x16xf32>,
    %c4_19 = arith.constant 4 : index
    %c0_20 = arith.constant 0 : index
    %20 = vector.load %arg11[%c4_19, %c0_20] : memref<128x16xf32, #tpu.memory_space<vmem>>, vector<4x16xf32>
    %cst_21 = arith.constant 6.875000e-01 : f32
    %21 = vector.broadcast %cst_21 : f32 to vector<4x16xf32>
    %22 = arith.mulf %21, %20 : vector<4x16xf32>
    %c8 = arith.constant 8 : index
    %c0_22 = arith.constant 0 : index
    %23 = vector.load %arg11[%c8, %c0_22] : memref<128x16xf32, #tpu.memory_space<vmem>>, vector<4x16xf32>
    %cst_23 = arith.constant 3.125000e-01 : f32
    %24 = vector.broadcast %cst_23 : f32 to vector<4x16xf32>
    %25 = arith.mulf %24, %23 : vector<4x16xf32>
    %26 = arith.addf %22, %25 : vector<4x16xf32>
    %c0_24 = arith.constant 0 : index
    %c32 = arith.constant 32 : index
    %27 = vector.load %arg12[%c0_24, %c32] : memref<4x512xf32, #tpu.memory_space<vmem>>, vector<4x16xf32>
    tpu.vector_store %arg12[%c0_24, %c32], %26 {strides = array<i32>} : memref<4x512xf32, #tpu.memory_space<vmem>>, vector<4x16xf32>,
    %c8_25 = arith.constant 8 : index
    %c0_26 = arith.constant 0 : index
    %28 = vector.load %arg11[%c8_25, %c0_26] : memref<128x16xf32, #tpu.memory_space<vmem>>, vector<4x16xf32>
    %cst_27 = arith.constant 5.625000e-01 : f32
    %29 = vector.broadcast %cst_27 : f32 to vector<4x16xf32>
    %30 = arith.mulf %29, %28 : vector<4x16xf32>
    %c12 = arith.constant 12 : index
    %c0_28 = arith.constant 0 : index
    %31 = vector.load %arg11[%c12, %c0_28] : memref<128x16xf32, #tpu.memory_space<vmem>>, vector<4x16xf32>
    %cst_29 = arith.constant 4.375000e-01 : f32
    %32 = vector.broadcast %cst_29 : f32 to vector<4x16xf32>
    %33 = arith.mulf %32, %31 : vector<4x16xf32>
    %34 = arith.addf %30, %33 : vector<4x16xf32>
    %c0_30 = arith.constant 0 : index
    %c48 = arith.constant 48 : index
    %35 = vector.load %arg12[%c0_30, %c48] : memref<4x512xf32, #tpu.memory_space<vmem>>, vector<4x16xf32>
    tpu.vector_store %arg12[%c0_30, %c48], %34 {strides = array<i32>} : memref<4x512xf32, #tpu.memory_space<vmem>>, vector<4x16xf32>,
    %c12_31 = arith.constant 12 : index
    %c0_32 = arith.constant 0 : index
    %36 = vector.load %arg11[%c12_31, %c0_32] : memref<128x16xf32, #tpu.memory_space<vmem>>, vector<4x16xf32>
    %cst_33 = arith.constant 4.375000e-01 : f32
    %37 = vector.broadcast %cst_33 : f32 to vector<4x16xf32>
    %38 = arith.mulf %37, %36 : vector<4x16xf32>
    %c16_34 = arith.constant 16 : index
    %c0_35 = arith.constant 0 : index
    %39 = vector.load %arg11[%c16_34, %c0_35] : memref<128x16xf32, #tpu.memory_space<vmem>>, vector<4x16xf32>
    %cst_36 = arith.constant 5.625000e-01 : f32
    %40 = vector.broadcast %cst_36 : f32 to vector<4x16xf32>
    %41 = arith.mulf %40, %39 : vector<4x16xf32>
    %42 = arith.addf %38, %41 : vector<4x16xf32>
    %c0_37 = arith.constant 0 : index
    %c64 = arith.constant 64 : index
    %43 = vector.load %arg12[%c0_37, %c64] : memref<4x512xf32, #tpu.memory_space<vmem>>, vector<4x16xf32>
    tpu.vector_store %arg12[%c0_37, %c64], %42 {strides = array<i32>} : memref<4x512xf32, #tpu.memory_space<vmem>>, vector<4x16xf32>,
    %c16_38 = arith.constant 16 : index
    %c0_39 = arith.constant 0 : index
    %44 = vector.load %arg11[%c16_38, %c0_39] : memref<128x16xf32, #tpu.memory_space<vmem>>, vector<4x16xf32>
    %cst_40 = arith.constant 3.125000e-01 : f32
    %45 = vector.broadcast %cst_40 : f32 to vector<4x16xf32>
    %46 = arith.mulf %45, %44 : vector<4x16xf32>
    %c20 = arith.constant 20 : index
    %c0_41 = arith.constant 0 : index
    %47 = vector.load %arg11[%c20, %c0_41] : memref<128x16xf32, #tpu.memory_space<vmem>>, vector<4x16xf32>
    %cst_42 = arith.constant 6.875000e-01 : f32
    %48 = vector.broadcast %cst_42 : f32 to vector<4x16xf32>
    %49 = arith.mulf %48, %47 : vector<4x16xf32>
    %50 = arith.addf %46, %49 : vector<4x16xf32>
    %c0_43 = arith.constant 0 : index
    %c80 = arith.constant 80 : index
    %51 = vector.load %arg12[%c0_43, %c80] : memref<4x512xf32, #tpu.memory_space<vmem>>, vector<4x16xf32>
    tpu.vector_store %arg12[%c0_43, %c80], %50 {strides = array<i32>} : memref<4x512xf32, #tpu.memory_space<vmem>>, vector<4x16xf32>,
    %c20_44 = arith.constant 20 : index
    %c0_45 = arith.constant 0 : index
    %52 = vector.load %arg11[%c20_44, %c0_45] : memref<128x16xf32, #tpu.memory_space<vmem>>, vector<4x16xf32>
    %cst_46 = arith.constant 1.875000e-01 : f32
    %53 = vector.broadcast %cst_46 : f32 to vector<4x16xf32>
    %54 = arith.mulf %53, %52 : vector<4x16xf32>
    %c24 = arith.constant 24 : index
    %c0_47 = arith.constant 0 : index
    %55 = vector.load %arg11[%c24, %c0_47] : memref<128x16xf32, #tpu.memory_space<vmem>>, vector<4x16xf32>
    %cst_48 = arith.constant 8.125000e-01 : f32
    %56 = vector.broadcast %cst_48 : f32 to vector<4x16xf32>
    %57 = arith.mulf %56, %55 : vector<4x16xf32>
    %58 = arith.addf %54, %57 : vector<4x16xf32>
    %c0_49 = arith.constant 0 : index
    %c96 = arith.constant 96 : index
    %59 = vector.load %arg12[%c0_49, %c96] : memref<4x512xf32, #tpu.memory_space<vmem>>, vector<4x16xf32>
    tpu.vector_store %arg12[%c0_49, %c96], %58 {strides = array<i32>} : memref<4x512xf32, #tpu.memory_space<vmem>>, vector<4x16xf32>,
    %c24_50 = arith.constant 24 : index
    %c0_51 = arith.constant 0 : index
    %60 = vector.load %arg11[%c24_50, %c0_51] : memref<128x16xf32, #tpu.memory_space<vmem>>, vector<4x16xf32>
    %cst_52 = arith.constant 6.250000e-02 : f32
    %61 = vector.broadcast %cst_52 : f32 to vector<4x16xf32>
    %62 = arith.mulf %61, %60 : vector<4x16xf32>
    %c28 = arith.constant 28 : index
    %c0_53 = arith.constant 0 : index
    %63 = vector.load %arg11[%c28, %c0_53] : memref<128x16xf32, #tpu.memory_space<vmem>>, vector<4x16xf32>
    %cst_54 = arith.constant 9.375000e-01 : f32
    %64 = vector.broadcast %cst_54 : f32 to vector<4x16xf32>
    %65 = arith.mulf %64, %63 : vector<4x16xf32>
    %66 = arith.addf %62, %65 : vector<4x16xf32>
    %c0_55 = arith.constant 0 : index
    %c112 = arith.constant 112 : index
    %67 = vector.load %arg12[%c0_55, %c112] : memref<4x512xf32, #tpu.memory_space<vmem>>, vector<4x16xf32>
    tpu.vector_store %arg12[%c0_55, %c112], %66 {strides = array<i32>} : memref<4x512xf32, #tpu.memory_space<vmem>>, vector<4x16xf32>,
    %c32_56 = arith.constant 32 : index
    %c0_57 = arith.constant 0 : index
    %68 = vector.load %arg11[%c32_56, %c0_57] : memref<128x16xf32, #tpu.memory_space<vmem>>, vector<4x16xf32>
    %cst_58 = arith.constant 9.375000e-01 : f32
    %69 = vector.broadcast %cst_58 : f32 to vector<4x16xf32>
    %70 = arith.mulf %69, %68 : vector<4x16xf32>
    %c36 = arith.constant 36 : index
    %c0_59 = arith.constant 0 : index
    %71 = vector.load %arg11[%c36, %c0_59] : memref<128x16xf32, #tpu.memory_space<vmem>>, vector<4x16xf32>
    %cst_60 = arith.constant 6.250000e-02 : f32
    %72 = vector.broadcast %cst_60 : f32 to vector<4x16xf32>
    %73 = arith.mulf %72, %71 : vector<4x16xf32>
    %74 = arith.addf %70, %73 : vector<4x16xf32>
    %c0_61 = arith.constant 0 : index
    %c128 = arith.constant 128 : index
    %75 = vector.load %arg12[%c0_61, %c128] : memref<4x512xf32, #tpu.memory_space<vmem>>, vector<4x16xf32>
    tpu.vector_store %arg12[%c0_61, %c128], %74 {strides = array<i32>} : memref<4x512xf32, #tpu.memory_space<vmem>>, vector<4x16xf32>,
    %c36_62 = arith.constant 36 : index
    %c0_63 = arith.constant 0 : index
    %76 = vector.load %arg11[%c36_62, %c0_63] : memref<128x16xf32, #tpu.memory_space<vmem>>, vector<4x16xf32>
    %cst_64 = arith.constant 8.125000e-01 : f32
    %77 = vector.broadcast %cst_64 : f32 to vector<4x16xf32>
    %78 = arith.mulf %77, %76 : vector<4x16xf32>
    %c40 = arith.constant 40 : index
    %c0_65 = arith.constant 0 : index
    %79 = vector.load %arg11[%c40, %c0_65] : memref<128x16xf32, #tpu.memory_space<vmem>>, vector<4x16xf32>
    %cst_66 = arith.constant 1.875000e-01 : f32
    %80 = vector.broadcast %cst_66 : f32 to vector<4x16xf32>
    %81 = arith.mulf %80, %79 : vector<4x16xf32>
    %82 = arith.addf %78, %81 : vector<4x16xf32>
    %c0_67 = arith.constant 0 : index
    %c144 = arith.constant 144 : index
    %83 = vector.load %arg12[%c0_67, %c144] : memref<4x512xf32, #tpu.memory_space<vmem>>, vector<4x16xf32>
    tpu.vector_store %arg12[%c0_67, %c144], %82 {strides = array<i32>} : memref<4x512xf32, #tpu.memory_space<vmem>>, vector<4x16xf32>,
    %c40_68 = arith.constant 40 : index
    %c0_69 = arith.constant 0 : index
    %84 = vector.load %arg11[%c40_68, %c0_69] : memref<128x16xf32, #tpu.memory_space<vmem>>, vector<4x16xf32>
    %cst_70 = arith.constant 6.875000e-01 : f32
    %85 = vector.broadcast %cst_70 : f32 to vector<4x16xf32>
    %86 = arith.mulf %85, %84 : vector<4x16xf32>
    %c44 = arith.constant 44 : index
    %c0_71 = arith.constant 0 : index
    %87 = vector.load %arg11[%c44, %c0_71] : memref<128x16xf32, #tpu.memory_space<vmem>>, vector<4x16xf32>
    %cst_72 = arith.constant 3.125000e-01 : f32
    %88 = vector.broadcast %cst_72 : f32 to vector<4x16xf32>
    %89 = arith.mulf %88, %87 : vector<4x16xf32>
    %90 = arith.addf %86, %89 : vector<4x16xf32>
    %c0_73 = arith.constant 0 : index
    %c160 = arith.constant 160 : index
    %91 = vector.load %arg12[%c0_73, %c160] : memref<4x512xf32, #tpu.memory_space<vmem>>, vector<4x16xf32>
    tpu.vector_store %arg12[%c0_73, %c160], %90 {strides = array<i32>} : memref<4x512xf32, #tpu.memory_space<vmem>>, vector<4x16xf32>,
    %c44_74 = arith.constant 44 : index
    %c0_75 = arith.constant 0 : index
    %92 = vector.load %arg11[%c44_74, %c0_75] : memref<128x16xf32, #tpu.memory_space<vmem>>, vector<4x16xf32>
    %cst_76 = arith.constant 5.625000e-01 : f32
    %93 = vector.broadcast %cst_76 : f32 to vector<4x16xf32>
    %94 = arith.mulf %93, %92 : vector<4x16xf32>
    %c48_77 = arith.constant 48 : index
    %c0_78 = arith.constant 0 : index
    %95 = vector.load %arg11[%c48_77, %c0_78] : memref<128x16xf32, #tpu.memory_space<vmem>>, vector<4x16xf32>
    %cst_79 = arith.constant 4.375000e-01 : f32
    %96 = vector.broadcast %cst_79 : f32 to vector<4x16xf32>
    %97 = arith.mulf %96, %95 : vector<4x16xf32>
    %98 = arith.addf %94, %97 : vector<4x16xf32>
    %c0_80 = arith.constant 0 : index
    %c176 = arith.constant 176 : index
    %99 = vector.load %arg12[%c0_80, %c176] : memref<4x512xf32, #tpu.memory_space<vmem>>, vector<4x16xf32>
    tpu.vector_store %arg12[%c0_80, %c176], %98 {strides = array<i32>} : memref<4x512xf32, #tpu.memory_space<vmem>>, vector<4x16xf32>,
    %c48_81 = arith.constant 48 : index
    %c0_82 = arith.constant 0 : index
    %100 = vector.load %arg11[%c48_81, %c0_82] : memref<128x16xf32, #tpu.memory_space<vmem>>, vector<4x16xf32>
    %cst_83 = arith.constant 4.375000e-01 : f32
    %101 = vector.broadcast %cst_83 : f32 to vector<4x16xf32>
    %102 = arith.mulf %101, %100 : vector<4x16xf32>
    %c52 = arith.constant 52 : index
    %c0_84 = arith.constant 0 : index
    %103 = vector.load %arg11[%c52, %c0_84] : memref<128x16xf32, #tpu.memory_space<vmem>>, vector<4x16xf32>
    %cst_85 = arith.constant 5.625000e-01 : f32
    %104 = vector.broadcast %cst_85 : f32 to vector<4x16xf32>
    %105 = arith.mulf %104, %103 : vector<4x16xf32>
    %106 = arith.addf %102, %105 : vector<4x16xf32>
    %c0_86 = arith.constant 0 : index
    %c192 = arith.constant 192 : index
    %107 = vector.load %arg12[%c0_86, %c192] : memref<4x512xf32, #tpu.memory_space<vmem>>, vector<4x16xf32>
    tpu.vector_store %arg12[%c0_86, %c192], %106 {strides = array<i32>} : memref<4x512xf32, #tpu.memory_space<vmem>>, vector<4x16xf32>,
    %c52_87 = arith.constant 52 : index
    %c0_88 = arith.constant 0 : index
    %108 = vector.load %arg11[%c52_87, %c0_88] : memref<128x16xf32, #tpu.memory_space<vmem>>, vector<4x16xf32>
    %cst_89 = arith.constant 3.125000e-01 : f32
    %109 = vector.broadcast %cst_89 : f32 to vector<4x16xf32>
    %110 = arith.mulf %109, %108 : vector<4x16xf32>
    %c56 = arith.constant 56 : index
    %c0_90 = arith.constant 0 : index
    %111 = vector.load %arg11[%c56, %c0_90] : memref<128x16xf32, #tpu.memory_space<vmem>>, vector<4x16xf32>
    %cst_91 = arith.constant 6.875000e-01 : f32
    %112 = vector.broadcast %cst_91 : f32 to vector<4x16xf32>
    %113 = arith.mulf %112, %111 : vector<4x16xf32>
    %114 = arith.addf %110, %113 : vector<4x16xf32>
    %c0_92 = arith.constant 0 : index
    %c208 = arith.constant 208 : index
    %115 = vector.load %arg12[%c0_92, %c208] : memref<4x512xf32, #tpu.memory_space<vmem>>, vector<4x16xf32>
    tpu.vector_store %arg12[%c0_92, %c208], %114 {strides = array<i32>} : memref<4x512xf32, #tpu.memory_space<vmem>>, vector<4x16xf32>,
    %c56_93 = arith.constant 56 : index
    %c0_94 = arith.constant 0 : index
    %116 = vector.load %arg11[%c56_93, %c0_94] : memref<128x16xf32, #tpu.memory_space<vmem>>, vector<4x16xf32>
    %cst_95 = arith.constant 1.875000e-01 : f32
    %117 = vector.broadcast %cst_95 : f32 to vector<4x16xf32>
    %118 = arith.mulf %117, %116 : vector<4x16xf32>
    %c60 = arith.constant 60 : index
    %c0_96 = arith.constant 0 : index
    %119 = vector.load %arg11[%c60, %c0_96] : memref<128x16xf32, #tpu.memory_space<vmem>>, vector<4x16xf32>
    %cst_97 = arith.constant 8.125000e-01 : f32
    %120 = vector.broadcast %cst_97 : f32 to vector<4x16xf32>
    %121 = arith.mulf %120, %119 : vector<4x16xf32>
    %122 = arith.addf %118, %121 : vector<4x16xf32>
    %c0_98 = arith.constant 0 : index
    %c224 = arith.constant 224 : index
    %123 = vector.load %arg12[%c0_98, %c224] : memref<4x512xf32, #tpu.memory_space<vmem>>, vector<4x16xf32>
    tpu.vector_store %arg12[%c0_98, %c224], %122 {strides = array<i32>} : memref<4x512xf32, #tpu.memory_space<vmem>>, vector<4x16xf32>,
    %c60_99 = arith.constant 60 : index
    %c0_100 = arith.constant 0 : index
    %124 = vector.load %arg11[%c60_99, %c0_100] : memref<128x16xf32, #tpu.memory_space<vmem>>, vector<4x16xf32>
    %cst_101 = arith.constant 6.250000e-02 : f32
    %125 = vector.broadcast %cst_101 : f32 to vector<4x16xf32>
    %126 = arith.mulf %125, %124 : vector<4x16xf32>
    %c60_102 = arith.constant 60 : index
    %c0_103 = arith.constant 0 : index
    %127 = vector.load %arg11[%c60_102, %c0_103] : memref<128x16xf32, #tpu.memory_space<vmem>>, vector<4x16xf32>
    %cst_104 = arith.constant 0.000000e+00 : f32
    %128 = vector.broadcast %cst_104 : f32 to vector<4x16xf32>
    %129 = arith.mulf %128, %127 : vector<4x16xf32>
    %130 = arith.addf %126, %129 : vector<4x16xf32>
    %c0_105 = arith.constant 0 : index
    %c240 = arith.constant 240 : index
    %131 = vector.load %arg12[%c0_105, %c240] : memref<4x512xf32, #tpu.memory_space<vmem>>, vector<4x16xf32>
    tpu.vector_store %arg12[%c0_105, %c240], %130 {strides = array<i32>} : memref<4x512xf32, #tpu.memory_space<vmem>>, vector<4x16xf32>,
    %c64_106 = arith.constant 64 : index
    %c0_107 = arith.constant 0 : index
    %132 = vector.load %arg11[%c64_106, %c0_107] : memref<128x16xf32, #tpu.memory_space<vmem>>, vector<4x16xf32>
    %cst_108 = arith.constant 0.000000e+00 : f32
    %133 = vector.broadcast %cst_108 : f32 to vector<4x16xf32>
    %134 = arith.mulf %133, %132 : vector<4x16xf32>
    %c64_109 = arith.constant 64 : index
    %c0_110 = arith.constant 0 : index
    %135 = vector.load %arg11[%c64_109, %c0_110] : memref<128x16xf32, #tpu.memory_space<vmem>>, vector<4x16xf32>
    %cst_111 = arith.constant 6.250000e-02 : f32
    %136 = vector.broadcast %cst_111 : f32 to vector<4x16xf32>
    %137 = arith.mulf %136, %135 : vector<4x16xf32>
    %138 = arith.addf %134, %137 : vector<4x16xf32>
    %c0_112 = arith.constant 0 : index
    %c256 = arith.constant 256 : index
    %139 = vector.load %arg12[%c0_112, %c256] : memref<4x512xf32, #tpu.memory_space<vmem>>, vector<4x16xf32>
    tpu.vector_store %arg12[%c0_112, %c256], %138 {strides = array<i32>} : memref<4x512xf32, #tpu.memory_space<vmem>>, vector<4x16xf32>,
    %c64_113 = arith.constant 64 : index
    %c0_114 = arith.constant 0 : index
    %140 = vector.load %arg11[%c64_113, %c0_114] : memref<128x16xf32, #tpu.memory_space<vmem>>, vector<4x16xf32>
    %cst_115 = arith.constant 8.125000e-01 : f32
    %141 = vector.broadcast %cst_115 : f32 to vector<4x16xf32>
    %142 = arith.mulf %141, %140 : vector<4x16xf32>
    %c68 = arith.constant 68 : index
    %c0_116 = arith.constant 0 : index
    %143 = vector.load %arg11[%c68, %c0_116] : memref<128x16xf32, #tpu.memory_space<vmem>>, vector<4x16xf32>
    %cst_117 = arith.constant 1.875000e-01 : f32
    %144 = vector.broadcast %cst_117 : f32 to vector<4x16xf32>
    %145 = arith.mulf %144, %143 : vector<4x16xf32>
    %146 = arith.addf %142, %145 : vector<4x16xf32>
    %c0_118 = arith.constant 0 : index
    %c272 = arith.constant 272 : index
    %147 = vector.load %arg12[%c0_118, %c272] : memref<4x512xf32, #tpu.memory_space<vmem>>, vector<4x16xf32>
    tpu.vector_store %arg12[%c0_118, %c272], %146 {strides = array<i32>} : memref<4x512xf32, #tpu.memory_space<vmem>>, vector<4x16xf32>,
    %c68_119 = arith.constant 68 : index
    %c0_120 = arith.constant 0 : index
    %148 = vector.load %arg11[%c68_119, %c0_120] : memref<128x16xf32, #tpu.memory_space<vmem>>, vector<4x16xf32>
    %cst_121 = arith.constant 6.875000e-01 : f32
    %149 = vector.broadcast %cst_121 : f32 to vector<4x16xf32>
    %150 = arith.mulf %149, %148 : vector<4x16xf32>
    %c72 = arith.constant 72 : index
    %c0_122 = arith.constant 0 : index
    %151 = vector.load %arg11[%c72, %c0_122] : memref<128x16xf32, #tpu.memory_space<vmem>>, vector<4x16xf32>
    %cst_123 = arith.constant 3.125000e-01 : f32
    %152 = vector.broadcast %cst_123 : f32 to vector<4x16xf32>
    %153 = arith.mulf %152, %151 : vector<4x16xf32>
    %154 = arith.addf %150, %153 : vector<4x16xf32>
    %c0_124 = arith.constant 0 : index
    %c288 = arith.constant 288 : index
    %155 = vector.load %arg12[%c0_124, %c288] : memref<4x512xf32, #tpu.memory_space<vmem>>, vector<4x16xf32>
    tpu.vector_store %arg12[%c0_124, %c288], %154 {strides = array<i32>} : memref<4x512xf32, #tpu.memory_space<vmem>>, vector<4x16xf32>,
    %c72_125 = arith.constant 72 : index
    %c0_126 = arith.constant 0 : index
    %156 = vector.load %arg11[%c72_125, %c0_126] : memref<128x16xf32, #tpu.memory_space<vmem>>, vector<4x16xf32>
    %cst_127 = arith.constant 5.625000e-01 : f32
    %157 = vector.broadcast %cst_127 : f32 to vector<4x16xf32>
    %158 = arith.mulf %157, %156 : vector<4x16xf32>
    %c76 = arith.constant 76 : index
    %c0_128 = arith.constant 0 : index
    %159 = vector.load %arg11[%c76, %c0_128] : memref<128x16xf32, #tpu.memory_space<vmem>>, vector<4x16xf32>
    %cst_129 = arith.constant 4.375000e-01 : f32
    %160 = vector.broadcast %cst_129 : f32 to vector<4x16xf32>
    %161 = arith.mulf %160, %159 : vector<4x16xf32>
    %162 = arith.addf %158, %161 : vector<4x16xf32>
    %c0_130 = arith.constant 0 : index
    %c304 = arith.constant 304 : index
    %163 = vector.load %arg12[%c0_130, %c304] : memref<4x512xf32, #tpu.memory_space<vmem>>, vector<4x16xf32>
    tpu.vector_store %arg12[%c0_130, %c304], %162 {strides = array<i32>} : memref<4x512xf32, #tpu.memory_space<vmem>>, vector<4x16xf32>,
    %c76_131 = arith.constant 76 : index
    %c0_132 = arith.constant 0 : index
    %164 = vector.load %arg11[%c76_131, %c0_132] : memref<128x16xf32, #tpu.memory_space<vmem>>, vector<4x16xf32>
    %cst_133 = arith.constant 4.375000e-01 : f32
    %165 = vector.broadcast %cst_133 : f32 to vector<4x16xf32>
    %166 = arith.mulf %165, %164 : vector<4x16xf32>
    %c80_134 = arith.constant 80 : index
    %c0_135 = arith.constant 0 : index
    %167 = vector.load %arg11[%c80_134, %c0_135] : memref<128x16xf32, #tpu.memory_space<vmem>>, vector<4x16xf32>
    %cst_136 = arith.constant 5.625000e-01 : f32
    %168 = vector.broadcast %cst_136 : f32 to vector<4x16xf32>
    %169 = arith.mulf %168, %167 : vector<4x16xf32>
    %170 = arith.addf %166, %169 : vector<4x16xf32>
    %c0_137 = arith.constant 0 : index
    %c320 = arith.constant 320 : index
    %171 = vector.load %arg12[%c0_137, %c320] : memref<4x512xf32, #tpu.memory_space<vmem>>, vector<4x16xf32>
    tpu.vector_store %arg12[%c0_137, %c320], %170 {strides = array<i32>} : memref<4x512xf32, #tpu.memory_space<vmem>>, vector<4x16xf32>,
    %c80_138 = arith.constant 80 : index
    %c0_139 = arith.constant 0 : index
    %172 = vector.load %arg11[%c80_138, %c0_139] : memref<128x16xf32, #tpu.memory_space<vmem>>, vector<4x16xf32>
    %cst_140 = arith.constant 3.125000e-01 : f32
    %173 = vector.broadcast %cst_140 : f32 to vector<4x16xf32>
    %174 = arith.mulf %173, %172 : vector<4x16xf32>
    %c84 = arith.constant 84 : index
    %c0_141 = arith.constant 0 : index
    %175 = vector.load %arg11[%c84, %c0_141] : memref<128x16xf32, #tpu.memory_space<vmem>>, vector<4x16xf32>
    %cst_142 = arith.constant 6.875000e-01 : f32
    %176 = vector.broadcast %cst_142 : f32 to vector<4x16xf32>
    %177 = arith.mulf %176, %175 : vector<4x16xf32>
    %178 = arith.addf %174, %177 : vector<4x16xf32>
    %c0_143 = arith.constant 0 : index
    %c336 = arith.constant 336 : index
    %179 = vector.load %arg12[%c0_143, %c336] : memref<4x512xf32, #tpu.memory_space<vmem>>, vector<4x16xf32>
    tpu.vector_store %arg12[%c0_143, %c336], %178 {strides = array<i32>} : memref<4x512xf32, #tpu.memory_space<vmem>>, vector<4x16xf32>,
    %c84_144 = arith.constant 84 : index
    %c0_145 = arith.constant 0 : index
    %180 = vector.load %arg11[%c84_144, %c0_145] : memref<128x16xf32, #tpu.memory_space<vmem>>, vector<4x16xf32>
    %cst_146 = arith.constant 1.875000e-01 : f32
    %181 = vector.broadcast %cst_146 : f32 to vector<4x16xf32>
    %182 = arith.mulf %181, %180 : vector<4x16xf32>
    %c88 = arith.constant 88 : index
    %c0_147 = arith.constant 0 : index
    %183 = vector.load %arg11[%c88, %c0_147] : memref<128x16xf32, #tpu.memory_space<vmem>>, vector<4x16xf32>
    %cst_148 = arith.constant 8.125000e-01 : f32
    %184 = vector.broadcast %cst_148 : f32 to vector<4x16xf32>
    %185 = arith.mulf %184, %183 : vector<4x16xf32>
    %186 = arith.addf %182, %185 : vector<4x16xf32>
    %c0_149 = arith.constant 0 : index
    %c352 = arith.constant 352 : index
    %187 = vector.load %arg12[%c0_149, %c352] : memref<4x512xf32, #tpu.memory_space<vmem>>, vector<4x16xf32>
    tpu.vector_store %arg12[%c0_149, %c352], %186 {strides = array<i32>} : memref<4x512xf32, #tpu.memory_space<vmem>>, vector<4x16xf32>,
    %c88_150 = arith.constant 88 : index
    %c0_151 = arith.constant 0 : index
    %188 = vector.load %arg11[%c88_150, %c0_151] : memref<128x16xf32, #tpu.memory_space<vmem>>, vector<4x16xf32>
    %cst_152 = arith.constant 6.250000e-02 : f32
    %189 = vector.broadcast %cst_152 : f32 to vector<4x16xf32>
    %190 = arith.mulf %189, %188 : vector<4x16xf32>
    %c92 = arith.constant 92 : index
    %c0_153 = arith.constant 0 : index
    %191 = vector.load %arg11[%c92, %c0_153] : memref<128x16xf32, #tpu.memory_space<vmem>>, vector<4x16xf32>
    %cst_154 = arith.constant 9.375000e-01 : f32
    %192 = vector.broadcast %cst_154 : f32 to vector<4x16xf32>
    %193 = arith.mulf %192, %191 : vector<4x16xf32>
    %194 = arith.addf %190, %193 : vector<4x16xf32>
    %c0_155 = arith.constant 0 : index
    %c368 = arith.constant 368 : index
    %195 = vector.load %arg12[%c0_155, %c368] : memref<4x512xf32, #tpu.memory_space<vmem>>, vector<4x16xf32>
    tpu.vector_store %arg12[%c0_155, %c368], %194 {strides = array<i32>} : memref<4x512xf32, #tpu.memory_space<vmem>>, vector<4x16xf32>,
    %c96_156 = arith.constant 96 : index
    %c0_157 = arith.constant 0 : index
    %196 = vector.load %arg11[%c96_156, %c0_157] : memref<128x16xf32, #tpu.memory_space<vmem>>, vector<4x16xf32>
    %cst_158 = arith.constant 9.375000e-01 : f32
    %197 = vector.broadcast %cst_158 : f32 to vector<4x16xf32>
    %198 = arith.mulf %197, %196 : vector<4x16xf32>
    %c100 = arith.constant 100 : index
    %c0_159 = arith.constant 0 : index
    %199 = vector.load %arg11[%c100, %c0_159] : memref<128x16xf32, #tpu.memory_space<vmem>>, vector<4x16xf32>
    %cst_160 = arith.constant 6.250000e-02 : f32
    %200 = vector.broadcast %cst_160 : f32 to vector<4x16xf32>
    %201 = arith.mulf %200, %199 : vector<4x16xf32>
    %202 = arith.addf %198, %201 : vector<4x16xf32>
    %c0_161 = arith.constant 0 : index
    %c384 = arith.constant 384 : index
    %203 = vector.load %arg12[%c0_161, %c384] : memref<4x512xf32, #tpu.memory_space<vmem>>, vector<4x16xf32>
    tpu.vector_store %arg12[%c0_161, %c384], %202 {strides = array<i32>} : memref<4x512xf32, #tpu.memory_space<vmem>>, vector<4x16xf32>,
    %c100_162 = arith.constant 100 : index
    %c0_163 = arith.constant 0 : index
    %204 = vector.load %arg11[%c100_162, %c0_163] : memref<128x16xf32, #tpu.memory_space<vmem>>, vector<4x16xf32>
    %cst_164 = arith.constant 8.125000e-01 : f32
    %205 = vector.broadcast %cst_164 : f32 to vector<4x16xf32>
    %206 = arith.mulf %205, %204 : vector<4x16xf32>
    %c104 = arith.constant 104 : index
    %c0_165 = arith.constant 0 : index
    %207 = vector.load %arg11[%c104, %c0_165] : memref<128x16xf32, #tpu.memory_space<vmem>>, vector<4x16xf32>
    %cst_166 = arith.constant 1.875000e-01 : f32
    %208 = vector.broadcast %cst_166 : f32 to vector<4x16xf32>
    %209 = arith.mulf %208, %207 : vector<4x16xf32>
    %210 = arith.addf %206, %209 : vector<4x16xf32>
    %c0_167 = arith.constant 0 : index
    %c400 = arith.constant 400 : index
    %211 = vector.load %arg12[%c0_167, %c400] : memref<4x512xf32, #tpu.memory_space<vmem>>, vector<4x16xf32>
    tpu.vector_store %arg12[%c0_167, %c400], %210 {strides = array<i32>} : memref<4x512xf32, #tpu.memory_space<vmem>>, vector<4x16xf32>,
    %c104_168 = arith.constant 104 : index
    %c0_169 = arith.constant 0 : index
    %212 = vector.load %arg11[%c104_168, %c0_169] : memref<128x16xf32, #tpu.memory_space<vmem>>, vector<4x16xf32>
    %cst_170 = arith.constant 6.875000e-01 : f32
    %213 = vector.broadcast %cst_170 : f32 to vector<4x16xf32>
    %214 = arith.mulf %213, %212 : vector<4x16xf32>
    %c108 = arith.constant 108 : index
    %c0_171 = arith.constant 0 : index
    %215 = vector.load %arg11[%c108, %c0_171] : memref<128x16xf32, #tpu.memory_space<vmem>>, vector<4x16xf32>
    %cst_172 = arith.constant 3.125000e-01 : f32
    %216 = vector.broadcast %cst_172 : f32 to vector<4x16xf32>
    %217 = arith.mulf %216, %215 : vector<4x16xf32>
    %218 = arith.addf %214, %217 : vector<4x16xf32>
    %c0_173 = arith.constant 0 : index
    %c416 = arith.constant 416 : index
    %219 = vector.load %arg12[%c0_173, %c416] : memref<4x512xf32, #tpu.memory_space<vmem>>, vector<4x16xf32>
    tpu.vector_store %arg12[%c0_173, %c416], %218 {strides = array<i32>} : memref<4x512xf32, #tpu.memory_space<vmem>>, vector<4x16xf32>,
    %c108_174 = arith.constant 108 : index
    %c0_175 = arith.constant 0 : index
    %220 = vector.load %arg11[%c108_174, %c0_175] : memref<128x16xf32, #tpu.memory_space<vmem>>, vector<4x16xf32>
    %cst_176 = arith.constant 5.625000e-01 : f32
    %221 = vector.broadcast %cst_176 : f32 to vector<4x16xf32>
    %222 = arith.mulf %221, %220 : vector<4x16xf32>
    %c112_177 = arith.constant 112 : index
    %c0_178 = arith.constant 0 : index
    %223 = vector.load %arg11[%c112_177, %c0_178] : memref<128x16xf32, #tpu.memory_space<vmem>>, vector<4x16xf32>
    %cst_179 = arith.constant 4.375000e-01 : f32
    %224 = vector.broadcast %cst_179 : f32 to vector<4x16xf32>
    %225 = arith.mulf %224, %223 : vector<4x16xf32>
    %226 = arith.addf %222, %225 : vector<4x16xf32>
    %c0_180 = arith.constant 0 : index
    %c432 = arith.constant 432 : index
    %227 = vector.load %arg12[%c0_180, %c432] : memref<4x512xf32, #tpu.memory_space<vmem>>, vector<4x16xf32>
    tpu.vector_store %arg12[%c0_180, %c432], %226 {strides = array<i32>} : memref<4x512xf32, #tpu.memory_space<vmem>>, vector<4x16xf32>,
    %c112_181 = arith.constant 112 : index
    %c0_182 = arith.constant 0 : index
    %228 = vector.load %arg11[%c112_181, %c0_182] : memref<128x16xf32, #tpu.memory_space<vmem>>, vector<4x16xf32>
    %cst_183 = arith.constant 4.375000e-01 : f32
    %229 = vector.broadcast %cst_183 : f32 to vector<4x16xf32>
    %230 = arith.mulf %229, %228 : vector<4x16xf32>
    %c116 = arith.constant 116 : index
    %c0_184 = arith.constant 0 : index
    %231 = vector.load %arg11[%c116, %c0_184] : memref<128x16xf32, #tpu.memory_space<vmem>>, vector<4x16xf32>
    %cst_185 = arith.constant 5.625000e-01 : f32
    %232 = vector.broadcast %cst_185 : f32 to vector<4x16xf32>
    %233 = arith.mulf %232, %231 : vector<4x16xf32>
    %234 = arith.addf %230, %233 : vector<4x16xf32>
    %c0_186 = arith.constant 0 : index
    %c448 = arith.constant 448 : index
    %235 = vector.load %arg12[%c0_186, %c448] : memref<4x512xf32, #tpu.memory_space<vmem>>, vector<4x16xf32>
    tpu.vector_store %arg12[%c0_186, %c448], %234 {strides = array<i32>} : memref<4x512xf32, #tpu.memory_space<vmem>>, vector<4x16xf32>,
    %c116_187 = arith.constant 116 : index
    %c0_188 = arith.constant 0 : index
    %236 = vector.load %arg11[%c116_187, %c0_188] : memref<128x16xf32, #tpu.memory_space<vmem>>, vector<4x16xf32>
    %cst_189 = arith.constant 3.125000e-01 : f32
    %237 = vector.broadcast %cst_189 : f32 to vector<4x16xf32>
    %238 = arith.mulf %237, %236 : vector<4x16xf32>
    %c120 = arith.constant 120 : index
    %c0_190 = arith.constant 0 : index
    %239 = vector.load %arg11[%c120, %c0_190] : memref<128x16xf32, #tpu.memory_space<vmem>>, vector<4x16xf32>
    %cst_191 = arith.constant 6.875000e-01 : f32
    %240 = vector.broadcast %cst_191 : f32 to vector<4x16xf32>
    %241 = arith.mulf %240, %239 : vector<4x16xf32>
    %242 = arith.addf %238, %241 : vector<4x16xf32>
    %c0_192 = arith.constant 0 : index
    %c464 = arith.constant 464 : index
    %243 = vector.load %arg12[%c0_192, %c464] : memref<4x512xf32, #tpu.memory_space<vmem>>, vector<4x16xf32>
    tpu.vector_store %arg12[%c0_192, %c464], %242 {strides = array<i32>} : memref<4x512xf32, #tpu.memory_space<vmem>>, vector<4x16xf32>,
    %c120_193 = arith.constant 120 : index
    %c0_194 = arith.constant 0 : index
    %244 = vector.load %arg11[%c120_193, %c0_194] : memref<128x16xf32, #tpu.memory_space<vmem>>, vector<4x16xf32>
    %cst_195 = arith.constant 1.875000e-01 : f32
    %245 = vector.broadcast %cst_195 : f32 to vector<4x16xf32>
    %246 = arith.mulf %245, %244 : vector<4x16xf32>
    %c124 = arith.constant 124 : index
    %c0_196 = arith.constant 0 : index
    %247 = vector.load %arg11[%c124, %c0_196] : memref<128x16xf32, #tpu.memory_space<vmem>>, vector<4x16xf32>
    %cst_197 = arith.constant 8.125000e-01 : f32
    %248 = vector.broadcast %cst_197 : f32 to vector<4x16xf32>
    %249 = arith.mulf %248, %247 : vector<4x16xf32>
    %250 = arith.addf %246, %249 : vector<4x16xf32>
    %c0_198 = arith.constant 0 : index
    %c480 = arith.constant 480 : index
    %251 = vector.load %arg12[%c0_198, %c480] : memref<4x512xf32, #tpu.memory_space<vmem>>, vector<4x16xf32>
    tpu.vector_store %arg12[%c0_198, %c480], %250 {strides = array<i32>} : memref<4x512xf32, #tpu.memory_space<vmem>>, vector<4x16xf32>,
    %c124_199 = arith.constant 124 : index
    %c0_200 = arith.constant 0 : index
    %252 = vector.load %arg11[%c124_199, %c0_200] : memref<128x16xf32, #tpu.memory_space<vmem>>, vector<4x16xf32>
    %cst_201 = arith.constant 6.250000e-02 : f32
    %253 = vector.broadcast %cst_201 : f32 to vector<4x16xf32>
    %254 = arith.mulf %253, %252 : vector<4x16xf32>
    %c124_202 = arith.constant 124 : index
    %c0_203 = arith.constant 0 : index
    %255 = vector.load %arg11[%c124_202, %c0_203] : memref<128x16xf32, #tpu.memory_space<vmem>>, vector<4x16xf32>
    %cst_204 = arith.constant 0.000000e+00 : f32
    %256 = vector.broadcast %cst_204 : f32 to vector<4x16xf32>
    %257 = arith.mulf %256, %255 : vector<4x16xf32>
    %258 = arith.addf %254, %257 : vector<4x16xf32>
    %c0_205 = arith.constant 0 : index
    %c496 = arith.constant 496 : index
    %259 = vector.load %arg12[%c0_205, %c496] : memref<4x512xf32, #tpu.memory_space<vmem>>, vector<4x16xf32>
    tpu.vector_store %arg12[%c0_205, %c496], %258 {strides = array<i32>} : memref<4x512xf32, #tpu.memory_space<vmem>>, vector<4x16xf32>,
    %c0_206 = arith.constant 0 : index
    %c0_207 = arith.constant 0 : index
    %260 = vector.load %arg12[%c0_206, %c0_207] : memref<4x512xf32, #tpu.memory_space<vmem>>, vector<4x512xf32>
    %c0_208 = arith.constant 0 : index
    %c0_209 = arith.constant 0 : index
    %261 = vector.load %arg3[%c0_208, %c0_209] : memref<9x512xf32, #tpu.memory_space<vmem>>, vector<9x512xf32>
    %cst_210 = arith.constant 0.000000e+00 : f32
    %262 = vector.broadcast %cst_210 : f32 to vector<4x512xf32>
    %c17_i32 = arith.constant 17 : i32
    %263 = tpu.dynamic_rotate %260 by %c17_i32 dim 1 : vector<4x512xf32>, i32 -> vector<4x512xf32>
    %264 = vector.extract_strided_slice %261 {offsets = [0, 0], sizes = [1, 512], strides = [1, 1]} : vector<9x512xf32> to vector<1x512xf32>
    %265 = vector.broadcast %264 : vector<1x512xf32> to vector<4x512xf32>
    %266 = arith.mulf %263, %265 : vector<4x512xf32>
    %c0_211 = arith.constant 0 : index
    %c0_212 = arith.constant 0 : index
    %267 = vector.load %arg4[%c0_211, %c0_212] : memref<4x36xf32, #tpu.memory_space<vmem>>, vector<4x4xf32>
    %cst_213 = arith.constant dense<0.000000e+00> : vector<4x512xf32>
    %268 = tpu.matmul %267, %266, %cst_213 {dimension_numbers = #tpu.dot_dimension_numbers<[1], [0], [0], [1], [0, 0, 1, 1], [], []>, precision = #tpu.contract_precision<fp32>} : vector<4x4xf32>, vector<4x512xf32>, vector<4x512xf32> -> vector<4x512xf32>
    %269 = arith.addf %262, %268 : vector<4x512xf32>
    %c16_i32 = arith.constant 16 : i32
    %270 = tpu.dynamic_rotate %260 by %c16_i32 dim 1 : vector<4x512xf32>, i32 -> vector<4x512xf32>
    %271 = vector.extract_strided_slice %261 {offsets = [1, 0], sizes = [1, 512], strides = [1, 1]} : vector<9x512xf32> to vector<1x512xf32>
    %272 = vector.broadcast %271 : vector<1x512xf32> to vector<4x512xf32>
    %273 = arith.mulf %270, %272 : vector<4x512xf32>
    %c0_214 = arith.constant 0 : index
    %c4_215 = arith.constant 4 : index
    %274 = vector.load %arg4[%c0_214, %c4_215] : memref<4x36xf32, #tpu.memory_space<vmem>>, vector<4x4xf32>
    %cst_216 = arith.constant dense<0.000000e+00> : vector<4x512xf32>
    %275 = tpu.matmul %274, %273, %cst_216 {dimension_numbers = #tpu.dot_dimension_numbers<[1], [0], [0], [1], [0, 0, 1, 1], [], []>, precision = #tpu.contract_precision<fp32>} : vector<4x4xf32>, vector<4x512xf32>, vector<4x512xf32> -> vector<4x512xf32>
    %276 = arith.addf %269, %275 : vector<4x512xf32>
    %c15_i32 = arith.constant 15 : i32
    %277 = tpu.dynamic_rotate %260 by %c15_i32 dim 1 : vector<4x512xf32>, i32 -> vector<4x512xf32>
    %278 = vector.extract_strided_slice %261 {offsets = [2, 0], sizes = [1, 512], strides = [1, 1]} : vector<9x512xf32> to vector<1x512xf32>
    %279 = vector.broadcast %278 : vector<1x512xf32> to vector<4x512xf32>
    %280 = arith.mulf %277, %279 : vector<4x512xf32>
    %c0_217 = arith.constant 0 : index
    %c8_218 = arith.constant 8 : index
    %281 = vector.load %arg4[%c0_217, %c8_218] : memref<4x36xf32, #tpu.memory_space<vmem>>, vector<4x4xf32>
    %cst_219 = arith.constant dense<0.000000e+00> : vector<4x512xf32>
    %282 = tpu.matmul %281, %280, %cst_219 {dimension_numbers = #tpu.dot_dimension_numbers<[1], [0], [0], [1], [0, 0, 1, 1], [], []>, precision = #tpu.contract_precision<fp32>} : vector<4x4xf32>, vector<4x512xf32>, vector<4x512xf32> -> vector<4x512xf32>
    %283 = arith.addf %276, %282 : vector<4x512xf32>
    %c1_i32 = arith.constant 1 : i32
    %284 = tpu.dynamic_rotate %260 by %c1_i32 dim 1 : vector<4x512xf32>, i32 -> vector<4x512xf32>
    %285 = vector.extract_strided_slice %261 {offsets = [3, 0], sizes = [1, 512], strides = [1, 1]} : vector<9x512xf32> to vector<1x512xf32>
    %286 = vector.broadcast %285 : vector<1x512xf32> to vector<4x512xf32>
    %287 = arith.mulf %284, %286 : vector<4x512xf32>
    %c0_220 = arith.constant 0 : index
    %c12_221 = arith.constant 12 : index
    %288 = vector.load %arg4[%c0_220, %c12_221] : memref<4x36xf32, #tpu.memory_space<vmem>>, vector<4x4xf32>
    %cst_222 = arith.constant dense<0.000000e+00> : vector<4x512xf32>
    %289 = tpu.matmul %288, %287, %cst_222 {dimension_numbers = #tpu.dot_dimension_numbers<[1], [0], [0], [1], [0, 0, 1, 1], [], []>, precision = #tpu.contract_precision<fp32>} : vector<4x4xf32>, vector<4x512xf32>, vector<4x512xf32> -> vector<4x512xf32>
    %290 = arith.addf %283, %289 : vector<4x512xf32>
    %c0_223 = arith.constant 0 : index
    %c16_224 = arith.constant 16 : index
    %291 = vector.load %arg4[%c0_223, %c16_224] : memref<4x36xf32, #tpu.memory_space<vmem>>, vector<4x4xf32>
    %cst_225 = arith.constant dense<0.000000e+00> : vector<4x512xf32>
    %292 = tpu.matmul %291, %260, %cst_225 {dimension_numbers = #tpu.dot_dimension_numbers<[1], [0], [0], [1], [0, 0, 1, 1], [], []>, precision = #tpu.contract_precision<fp32>} : vector<4x4xf32>, vector<4x512xf32>, vector<4x512xf32> -> vector<4x512xf32>
    %293 = arith.addf %290, %292 : vector<4x512xf32>
    %c511_i32 = arith.constant 511 : i32
    %294 = tpu.dynamic_rotate %260 by %c511_i32 dim 1 : vector<4x512xf32>, i32 -> vector<4x512xf32>
    %295 = vector.extract_strided_slice %261 {offsets = [5, 0], sizes = [1, 512], strides = [1, 1]} : vector<9x512xf32> to vector<1x512xf32>
    %296 = vector.broadcast %295 : vector<1x512xf32> to vector<4x512xf32>
    %297 = arith.mulf %294, %296 : vector<4x512xf32>
    %c0_226 = arith.constant 0 : index
    %c20_227 = arith.constant 20 : index
    %298 = vector.load %arg4[%c0_226, %c20_227] : memref<4x36xf32, #tpu.memory_space<vmem>>, vector<4x4xf32>
    %cst_228 = arith.constant dense<0.000000e+00> : vector<4x512xf32>
    %299 = tpu.matmul %298, %297, %cst_228 {dimension_numbers = #tpu.dot_dimension_numbers<[1], [0], [0], [1], [0, 0, 1, 1], [], []>, precision = #tpu.contract_precision<fp32>} : vector<4x4xf32>, vector<4x512xf32>, vector<4x512xf32> -> vector<4x512xf32>
    %300 = arith.addf %293, %299 : vector<4x512xf32>
    %c497_i32 = arith.constant 497 : i32
    %301 = tpu.dynamic_rotate %260 by %c497_i32 dim 1 : vector<4x512xf32>, i32 -> vector<4x512xf32>
    %302 = vector.extract_strided_slice %261 {offsets = [6, 0], sizes = [1, 512], strides = [1, 1]} : vector<9x512xf32> to vector<1x512xf32>
    %303 = vector.broadcast %302 : vector<1x512xf32> to vector<4x512xf32>
    %304 = arith.mulf %301, %303 : vector<4x512xf32>
    %c0_229 = arith.constant 0 : index
    %c24_230 = arith.constant 24 : index
    %305 = vector.load %arg4[%c0_229, %c24_230] : memref<4x36xf32, #tpu.memory_space<vmem>>, vector<4x4xf32>
    %cst_231 = arith.constant dense<0.000000e+00> : vector<4x512xf32>
    %306 = tpu.matmul %305, %304, %cst_231 {dimension_numbers = #tpu.dot_dimension_numbers<[1], [0], [0], [1], [0, 0, 1, 1], [], []>, precision = #tpu.contract_precision<fp32>} : vector<4x4xf32>, vector<4x512xf32>, vector<4x512xf32> -> vector<4x512xf32>
    %307 = arith.addf %300, %306 : vector<4x512xf32>
    %c496_i32 = arith.constant 496 : i32
    %308 = tpu.dynamic_rotate %260 by %c496_i32 dim 1 : vector<4x512xf32>, i32 -> vector<4x512xf32>
    %309 = vector.extract_strided_slice %261 {offsets = [7, 0], sizes = [1, 512], strides = [1, 1]} : vector<9x512xf32> to vector<1x512xf32>
    %310 = vector.broadcast %309 : vector<1x512xf32> to vector<4x512xf32>
    %311 = arith.mulf %308, %310 : vector<4x512xf32>
    %c0_232 = arith.constant 0 : index
    %c28_233 = arith.constant 28 : index
    %312 = vector.load %arg4[%c0_232, %c28_233] : memref<4x36xf32, #tpu.memory_space<vmem>>, vector<4x4xf32>
    %cst_234 = arith.constant dense<0.000000e+00> : vector<4x512xf32>
    %313 = tpu.matmul %312, %311, %cst_234 {dimension_numbers = #tpu.dot_dimension_numbers<[1], [0], [0], [1], [0, 0, 1, 1], [], []>, precision = #tpu.contract_precision<fp32>} : vector<4x4xf32>, vector<4x512xf32>, vector<4x512xf32> -> vector<4x512xf32>
    %314 = arith.addf %307, %313 : vector<4x512xf32>
    %c495_i32 = arith.constant 495 : i32
    %315 = tpu.dynamic_rotate %260 by %c495_i32 dim 1 : vector<4x512xf32>, i32 -> vector<4x512xf32>
    %316 = vector.extract_strided_slice %261 {offsets = [8, 0], sizes = [1, 512], strides = [1, 1]} : vector<9x512xf32> to vector<1x512xf32>
    %317 = vector.broadcast %316 : vector<1x512xf32> to vector<4x512xf32>
    %318 = arith.mulf %315, %317 : vector<4x512xf32>
    %c0_235 = arith.constant 0 : index
    %c32_236 = arith.constant 32 : index
    %319 = vector.load %arg4[%c0_235, %c32_236] : memref<4x36xf32, #tpu.memory_space<vmem>>, vector<4x4xf32>
    %cst_237 = arith.constant dense<0.000000e+00> : vector<4x512xf32>
    %320 = tpu.matmul %319, %318, %cst_237 {dimension_numbers = #tpu.dot_dimension_numbers<[1], [0], [0], [1], [0, 0, 1, 1], [], []>, precision = #tpu.contract_precision<fp32>} : vector<4x4xf32>, vector<4x512xf32>, vector<4x512xf32> -> vector<4x512xf32>
    %321 = arith.addf %314, %320 : vector<4x512xf32>
    %c0_238 = arith.constant 0 : index
    %c0_239 = arith.constant 0 : index
    %322 = vector.load %arg5[%c0_238, %c0_239] : memref<4x1xf32, #tpu.memory_space<vmem>>, vector<4x1xf32>
    %323 = vector.broadcast %322 : vector<4x1xf32> to vector<4x512xf32>
    %324 = arith.addf %321, %323 : vector<4x512xf32>
    %cst_240 = arith.constant 0.000000e+00 : f32
    %325 = vector.broadcast %cst_240 : f32 to vector<4x512xf32>
    %326 = arith.maximumf %324, %325 : vector<4x512xf32>
    %cst_241 = arith.constant 0.000000e+00 : f32
    %327 = vector.broadcast %cst_241 : f32 to vector<4x512xf32>
    %c17_i32_242 = arith.constant 17 : i32
    %328 = tpu.dynamic_rotate %326 by %c17_i32_242 dim 1 : vector<4x512xf32>, i32 -> vector<4x512xf32>
    %329 = vector.extract_strided_slice %261 {offsets = [0, 0], sizes = [1, 512], strides = [1, 1]} : vector<9x512xf32> to vector<1x512xf32>
    %330 = vector.broadcast %329 : vector<1x512xf32> to vector<4x512xf32>
    %331 = arith.mulf %328, %330 : vector<4x512xf32>
    %c0_243 = arith.constant 0 : index
    %c0_244 = arith.constant 0 : index
    %332 = vector.load %arg6[%c0_243, %c0_244] : memref<4x36xf32, #tpu.memory_space<vmem>>, vector<4x4xf32>
    %cst_245 = arith.constant dense<0.000000e+00> : vector<4x512xf32>
    %333 = tpu.matmul %332, %331, %cst_245 {dimension_numbers = #tpu.dot_dimension_numbers<[1], [0], [0], [1], [0, 0, 1, 1], [], []>, precision = #tpu.contract_precision<fp32>} : vector<4x4xf32>, vector<4x512xf32>, vector<4x512xf32> -> vector<4x512xf32>
    %334 = arith.addf %327, %333 : vector<4x512xf32>
    %c16_i32_246 = arith.constant 16 : i32
    %335 = tpu.dynamic_rotate %326 by %c16_i32_246 dim 1 : vector<4x512xf32>, i32 -> vector<4x512xf32>
    %336 = vector.extract_strided_slice %261 {offsets = [1, 0], sizes = [1, 512], strides = [1, 1]} : vector<9x512xf32> to vector<1x512xf32>
    %337 = vector.broadcast %336 : vector<1x512xf32> to vector<4x512xf32>
    %338 = arith.mulf %335, %337 : vector<4x512xf32>
    %c0_247 = arith.constant 0 : index
    %c4_248 = arith.constant 4 : index
    %339 = vector.load %arg6[%c0_247, %c4_248] : memref<4x36xf32, #tpu.memory_space<vmem>>, vector<4x4xf32>
    %cst_249 = arith.constant dense<0.000000e+00> : vector<4x512xf32>
    %340 = tpu.matmul %339, %338, %cst_249 {dimension_numbers = #tpu.dot_dimension_numbers<[1], [0], [0], [1], [0, 0, 1, 1], [], []>, precision = #tpu.contract_precision<fp32>} : vector<4x4xf32>, vector<4x512xf32>, vector<4x512xf32> -> vector<4x512xf32>
    %341 = arith.addf %334, %340 : vector<4x512xf32>
    %c15_i32_250 = arith.constant 15 : i32
    %342 = tpu.dynamic_rotate %326 by %c15_i32_250 dim 1 : vector<4x512xf32>, i32 -> vector<4x512xf32>
    %343 = vector.extract_strided_slice %261 {offsets = [2, 0], sizes = [1, 512], strides = [1, 1]} : vector<9x512xf32> to vector<1x512xf32>
    %344 = vector.broadcast %343 : vector<1x512xf32> to vector<4x512xf32>
    %345 = arith.mulf %342, %344 : vector<4x512xf32>
    %c0_251 = arith.constant 0 : index
    %c8_252 = arith.constant 8 : index
    %346 = vector.load %arg6[%c0_251, %c8_252] : memref<4x36xf32, #tpu.memory_space<vmem>>, vector<4x4xf32>
    %cst_253 = arith.constant dense<0.000000e+00> : vector<4x512xf32>
    %347 = tpu.matmul %346, %345, %cst_253 {dimension_numbers = #tpu.dot_dimension_numbers<[1], [0], [0], [1], [0, 0, 1, 1], [], []>, precision = #tpu.contract_precision<fp32>} : vector<4x4xf32>, vector<4x512xf32>, vector<4x512xf32> -> vector<4x512xf32>
    %348 = arith.addf %341, %347 : vector<4x512xf32>
    %c1_i32_254 = arith.constant 1 : i32
    %349 = tpu.dynamic_rotate %326 by %c1_i32_254 dim 1 : vector<4x512xf32>, i32 -> vector<4x512xf32>
    %350 = vector.extract_strided_slice %261 {offsets = [3, 0], sizes = [1, 512], strides = [1, 1]} : vector<9x512xf32> to vector<1x512xf32>
    %351 = vector.broadcast %350 : vector<1x512xf32> to vector<4x512xf32>
    %352 = arith.mulf %349, %351 : vector<4x512xf32>
    %c0_255 = arith.constant 0 : index
    %c12_256 = arith.constant 12 : index
    %353 = vector.load %arg6[%c0_255, %c12_256] : memref<4x36xf32, #tpu.memory_space<vmem>>, vector<4x4xf32>
    %cst_257 = arith.constant dense<0.000000e+00> : vector<4x512xf32>
    %354 = tpu.matmul %353, %352, %cst_257 {dimension_numbers = #tpu.dot_dimension_numbers<[1], [0], [0], [1], [0, 0, 1, 1], [], []>, precision = #tpu.contract_precision<fp32>} : vector<4x4xf32>, vector<4x512xf32>, vector<4x512xf32> -> vector<4x512xf32>
    %355 = arith.addf %348, %354 : vector<4x512xf32>
    %c0_258 = arith.constant 0 : index
    %c16_259 = arith.constant 16 : index
    %356 = vector.load %arg6[%c0_258, %c16_259] : memref<4x36xf32, #tpu.memory_space<vmem>>, vector<4x4xf32>
    %cst_260 = arith.constant dense<0.000000e+00> : vector<4x512xf32>
    %357 = tpu.matmul %356, %326, %cst_260 {dimension_numbers = #tpu.dot_dimension_numbers<[1], [0], [0], [1], [0, 0, 1, 1], [], []>, precision = #tpu.contract_precision<fp32>} : vector<4x4xf32>, vector<4x512xf32>, vector<4x512xf32> -> vector<4x512xf32>
    %358 = arith.addf %355, %357 : vector<4x512xf32>
    %c511_i32_261 = arith.constant 511 : i32
    %359 = tpu.dynamic_rotate %326 by %c511_i32_261 dim 1 : vector<4x512xf32>, i32 -> vector<4x512xf32>
    %360 = vector.extract_strided_slice %261 {offsets = [5, 0], sizes = [1, 512], strides = [1, 1]} : vector<9x512xf32> to vector<1x512xf32>
    %361 = vector.broadcast %360 : vector<1x512xf32> to vector<4x512xf32>
    %362 = arith.mulf %359, %361 : vector<4x512xf32>
    %c0_262 = arith.constant 0 : index
    %c20_263 = arith.constant 20 : index
    %363 = vector.load %arg6[%c0_262, %c20_263] : memref<4x36xf32, #tpu.memory_space<vmem>>, vector<4x4xf32>
    %cst_264 = arith.constant dense<0.000000e+00> : vector<4x512xf32>
    %364 = tpu.matmul %363, %362, %cst_264 {dimension_numbers = #tpu.dot_dimension_numbers<[1], [0], [0], [1], [0, 0, 1, 1], [], []>, precision = #tpu.contract_precision<fp32>} : vector<4x4xf32>, vector<4x512xf32>, vector<4x512xf32> -> vector<4x512xf32>
    %365 = arith.addf %358, %364 : vector<4x512xf32>
    %c497_i32_265 = arith.constant 497 : i32
    %366 = tpu.dynamic_rotate %326 by %c497_i32_265 dim 1 : vector<4x512xf32>, i32 -> vector<4x512xf32>
    %367 = vector.extract_strided_slice %261 {offsets = [6, 0], sizes = [1, 512], strides = [1, 1]} : vector<9x512xf32> to vector<1x512xf32>
    %368 = vector.broadcast %367 : vector<1x512xf32> to vector<4x512xf32>
    %369 = arith.mulf %366, %368 : vector<4x512xf32>
    %c0_266 = arith.constant 0 : index
    %c24_267 = arith.constant 24 : index
    %370 = vector.load %arg6[%c0_266, %c24_267] : memref<4x36xf32, #tpu.memory_space<vmem>>, vector<4x4xf32>
    %cst_268 = arith.constant dense<0.000000e+00> : vector<4x512xf32>
    %371 = tpu.matmul %370, %369, %cst_268 {dimension_numbers = #tpu.dot_dimension_numbers<[1], [0], [0], [1], [0, 0, 1, 1], [], []>, precision = #tpu.contract_precision<fp32>} : vector<4x4xf32>, vector<4x512xf32>, vector<4x512xf32> -> vector<4x512xf32>
    %372 = arith.addf %365, %371 : vector<4x512xf32>
    %c496_i32_269 = arith.constant 496 : i32
    %373 = tpu.dynamic_rotate %326 by %c496_i32_269 dim 1 : vector<4x512xf32>, i32 -> vector<4x512xf32>
    %374 = vector.extract_strided_slice %261 {offsets = [7, 0], sizes = [1, 512], strides = [1, 1]} : vector<9x512xf32> to vector<1x512xf32>
    %375 = vector.broadcast %374 : vector<1x512xf32> to vector<4x512xf32>
    %376 = arith.mulf %373, %375 : vector<4x512xf32>
    %c0_270 = arith.constant 0 : index
    %c28_271 = arith.constant 28 : index
    %377 = vector.load %arg6[%c0_270, %c28_271] : memref<4x36xf32, #tpu.memory_space<vmem>>, vector<4x4xf32>
    %cst_272 = arith.constant dense<0.000000e+00> : vector<4x512xf32>
    %378 = tpu.matmul %377, %376, %cst_272 {dimension_numbers = #tpu.dot_dimension_numbers<[1], [0], [0], [1], [0, 0, 1, 1], [], []>, precision = #tpu.contract_precision<fp32>} : vector<4x4xf32>, vector<4x512xf32>, vector<4x512xf32> -> vector<4x512xf32>
    %379 = arith.addf %372, %378 : vector<4x512xf32>
    %c495_i32_273 = arith.constant 495 : i32
    %380 = tpu.dynamic_rotate %326 by %c495_i32_273 dim 1 : vector<4x512xf32>, i32 -> vector<4x512xf32>
    %381 = vector.extract_strided_slice %261 {offsets = [8, 0], sizes = [1, 512], strides = [1, 1]} : vector<9x512xf32> to vector<1x512xf32>
    %382 = vector.broadcast %381 : vector<1x512xf32> to vector<4x512xf32>
    %383 = arith.mulf %380, %382 : vector<4x512xf32>
    %c0_274 = arith.constant 0 : index
    %c32_275 = arith.constant 32 : index
    %384 = vector.load %arg6[%c0_274, %c32_275] : memref<4x36xf32, #tpu.memory_space<vmem>>, vector<4x4xf32>
    %cst_276 = arith.constant dense<0.000000e+00> : vector<4x512xf32>
    %385 = tpu.matmul %384, %383, %cst_276 {dimension_numbers = #tpu.dot_dimension_numbers<[1], [0], [0], [1], [0, 0, 1, 1], [], []>, precision = #tpu.contract_precision<fp32>} : vector<4x4xf32>, vector<4x512xf32>, vector<4x512xf32> -> vector<4x512xf32>
    %386 = arith.addf %379, %385 : vector<4x512xf32>
    %c0_277 = arith.constant 0 : index
    %c0_278 = arith.constant 0 : index
    %387 = vector.load %arg7[%c0_277, %c0_278] : memref<4x1xf32, #tpu.memory_space<vmem>>, vector<4x1xf32>
    %388 = vector.broadcast %387 : vector<4x1xf32> to vector<4x512xf32>
    %389 = arith.addf %386, %388 : vector<4x512xf32>
    %cst_279 = arith.constant 0.000000e+00 : f32
    %390 = vector.broadcast %cst_279 : f32 to vector<4x512xf32>
    %391 = arith.maximumf %389, %390 : vector<4x512xf32>
    %c0_280 = arith.constant 0 : index
    %c0_281 = arith.constant 0 : index
    %392 = vector.load %arg8[%c0_280, %c0_281] : memref<3x4xf32, #tpu.memory_space<vmem>>, vector<3x4xf32>
    %cst_282 = arith.constant dense<0.000000e+00> : vector<3x512xf32>
    %393 = tpu.matmul %392, %391, %cst_282 {dimension_numbers = #tpu.dot_dimension_numbers<[1], [0], [0], [1], [0, 0, 1, 1], [], []>, precision = #tpu.contract_precision<fp32>} : vector<3x4xf32>, vector<4x512xf32>, vector<3x512xf32> -> vector<3x512xf32>
    %c0_283 = arith.constant 0 : index
    %c0_284 = arith.constant 0 : index
    %394 = vector.load %arg9[%c0_283, %c0_284] : memref<3x1xf32, #tpu.memory_space<vmem>>, vector<3x1xf32>
    %395 = vector.broadcast %394 : vector<3x1xf32> to vector<3x512xf32>
    %396 = arith.addf %393, %395 : vector<3x512xf32>
    %cst_285 = arith.constant 5.000000e-01 : f32
    %397 = vector.broadcast %cst_285 : f32 to vector<3x512xf32>
    %398 = arith.mulf %397, %396 : vector<3x512xf32>
    %399 = math.tanh %398 : vector<3x512xf32>
    %cst_286 = arith.constant 5.000000e-01 : f32
    %400 = vector.broadcast %cst_286 : f32 to vector<3x512xf32>
    %401 = arith.mulf %400, %399 : vector<3x512xf32>
    %cst_287 = arith.constant 5.000000e-01 : f32
    %402 = vector.broadcast %cst_287 : f32 to vector<3x512xf32>
    %403 = arith.addf %401, %402 : vector<3x512xf32>
    %c0_288 = arith.constant 0 : index
    %c0_289 = arith.constant 0 : index
    %404 = vector.load %arg10[%c0_288, %c0_289] : memref<3x512xf32, #tpu.memory_space<vmem>>, vector<3x512xf32>
    tpu.vector_store %arg10[%c0_288, %c0_289], %403 {strides = array<i32>} : memref<3x512xf32, #tpu.memory_space<vmem>>, vector<3x512xf32>,
    return
  }
  func.func @transform_0(%arg0: i32) -> (i32, i32) {
    %c0_i32 = arith.constant 0 : i32
    %c0_i32_0 = arith.constant 0 : i32
    %c0_i32_1 = arith.constant 0 : i32
    return %c0_i32, %c0_i32_0 : i32, i32
  }
  func.func @transform_1(%arg0: i32) -> (i32, i32) {
    %c0_i32 = arith.constant 0 : i32
    %c0_i32_0 = arith.constant 0 : i32
    %c0_i32_1 = arith.constant 0 : i32
    return %c0_i32, %c0_i32_0 : i32, i32
  }
  func.func @transform_2(%arg0: i32) -> (i32, i32) {
    %c0_i32 = arith.constant 0 : i32
    %c0_i32_0 = arith.constant 0 : i32
    %c0_i32_1 = arith.constant 0 : i32
    return %c0_i32, %c0_i32_0 : i32, i32
  }
  func.func @transform_3(%arg0: i32) -> (i32, i32) {
    %c0_i32 = arith.constant 0 : i32
    %c0_i32_0 = arith.constant 0 : i32
    %c0_i32_1 = arith.constant 0 : i32
    return %c0_i32, %c0_i32_0 : i32, i32
  }
  func.func @transform_4(%arg0: i32) -> (i32, i32) {
    %c0_i32 = arith.constant 0 : i32
    %c0_i32_0 = arith.constant 0 : i32
    %c0_i32_1 = arith.constant 0 : i32
    return %c0_i32, %c0_i32_0 : i32, i32
  }
  func.func @transform_5(%arg0: i32) -> (i32, i32) {
    %c0_i32 = arith.constant 0 : i32
    %c0_i32_0 = arith.constant 0 : i32
    %c0_i32_1 = arith.constant 0 : i32
    return %c0_i32, %c0_i32_0 : i32, i32
  }
  func.func @transform_6(%arg0: i32) -> (i32, i32) {
    %c0_i32 = arith.constant 0 : i32
    %c0_i32_0 = arith.constant 0 : i32
    %c0_i32_1 = arith.constant 0 : i32
    return %c0_i32, %c0_i32_0 : i32, i32
  }
  func.func @transform_7(%arg0: i32) -> (i32, i32) {
    %c0_i32 = arith.constant 0 : i32
    %c0_i32_0 = arith.constant 0 : i32
    %c0_i32_1 = arith.constant 0 : i32
    return %c0_i32, %c0_i32_0 : i32, i32
  }
  func.func @transform_8(%arg0: i32) -> (i32, i32) {
    %c0_i32 = arith.constant 0 : i32
    %c0_i32_0 = arith.constant 0 : i32
    %c0_i32_1 = arith.constant 0 : i32
    return %c0_i32, %c0_i32_0 : i32, i32
  }
  func.func @transform_9(%arg0: i32) -> (i32, i32) {
    %c0_i32 = arith.constant 0 : i32
    %c0_i32_0 = arith.constant 0 : i32
    %c0_i32_1 = arith.constant 0 : i32
    return %c0_i32, %c0_i32_0 : i32, i32
  }
}

</mosaic_0001>

<bundles_post_ra>
// kernel: tpu_custom_call.1
= control target key start
LH: loop header
LB: loop body
LE: loop exit
PB: predicated region body
PF: predicated region fallthrough
CT: control target
= control target key end

     0   :  { %vm51_vm0 = vcmask 130048   ;;  %s22724_s0 = inlined_call_operand.vmem [shape: f32[128,16], index: 0, kind: input, shape index: {}]   ;;  %s22725_s1 = inlined_call_operand.vmem [shape: f32[16,16], index: 1, kind: input, shape index: {}]   ;;  %s22726_s2 = inlined_call_operand.vmem [shape: f32[9,512], index: 2, kind: input, shape index: {}]   ;;  %s22727_s3 = inlined_call_operand.vmem [shape: f32[4,36], index: 3, kind: input, shape index: {}]   ;;  %s22728_s4 = inlined_call_operand.vmem [shape: f32[4,1], index: 4, kind: input, shape index: {}]   ;;  %s22729_s5 = inlined_call_operand.vmem [shape: f32[4,36], index: 5, kind: input, shape index: {}]   ;;  %s22730_s6 = inlined_call_operand.vmem [shape: f32[4,1], index: 6, kind: input, shape index: {}]   ;;  %s22731_s7 = inlined_call_operand.vmem [shape: f32[3,4], index: 7, kind: input, shape index: {}]   ;;  %s22732_s8 = inlined_call_operand.vmem [shape: f32[3,1], index: 8, kind: input, shape index: {}]   ;;  %s22733_s9 = inlined_call_operand.hbm [shape: f32[3,512], index: 9, kind: output, shape index: {}]  }
   0x1   :  { %v49_v0 = vld [vmem:[%s22725_s1] sm:$0xff]  ;;  %v50_v1 = vld [vmem:[%s22725_s1 + $0x8] sm:$0xff]  ;;  %v35_v7 = vld [vmem:[%s22724_s0 + $0x10] sm:$0xff] }
   0x2   :  { %v33_v2 = vld [vmem:[%s22724_s0] sm:$0xff]  ;;  %v101_v3 = vand.u32 4294901760, %v49_v0  ;;  %v104_v4 = vand.u32 4294901760, %v50_v1  ;;  %v34_v6 = vld [vmem:[%s22724_s0 + $0x8] sm:$0xff]  ;;  %v36_v8 = vld [vmem:[%s22724_s0 + $0x18] sm:$0xff]  ;;  %v59_v11 = vsel %vm51_vm0, %v35_v7, 0 }
   0x3   :  { %v53_v5 = vsel %vm51_vm0, %v33_v2, 0  ;;  %v56_v10 = vsel %vm51_vm0, %v34_v6, 0  ;;  %v62_v12 = vsel %vm51_vm0, %v36_v8, 0  ;;  %v37_v13 = vld [vmem:[%s22724_s0 + $0x20] sm:$0xff]  ;;  %v38_v14 = vld [vmem:[%s22724_s0 + $0x28] sm:$0xff]  ;;  %v39_v19 = vld [vmem:[%s22724_s0 + $0x30] sm:$0xff] }
   0x4   :  { %v21042_v9 = vand.u32 4294901760, %v53_v5  ;;  %v21053_v15 = vpack.c.bf16 %v104_v4, %v101_v3  ;;  %v21055_v16 = vsub.f32 %v49_v0, %v101_v3  ;;  %v21057_v17 = vsub.f32 %v50_v1, %v104_v4  ;;  %v40_v24 = vld [vmem:[%s22724_s0 + $0x38] sm:$0xff]  ;;  %v41_v28 = vld [vmem:[%s22724_s0 + $0x40] sm:$0xff]  ;;  %v42_v33 = vld [vmem:[%s22724_s0 + $0x48] sm:$0xff] }
   0x5   :  { %v21059_v18 = vand.u32 4294901760, %v56_v10  ;;  %v21067_v21 = vand.u32 4294901760, %v59_v11  ;;  %v21069_v22 = vand.u32 4294901760, %v62_v12  ;;  %v65_v23 = vsel %vm51_vm0, %v37_v13, 0 }
   0x6   :  { %v21065_v20 = vsub.f32 %v53_v5, %v21042_v9  ;;  %v21077_v25 = vpack.c.bf16 %v21057_v17, %v21055_v16  ;;  %v21079_v26 = vand.u32 4294901760, %v65_v23  ;;  %v68_v27 = vsel %vm51_vm0, %v38_v14, 0  ;;  %20333 = vmatprep.subr.bf16.mxu1 %v21053_v15 }
   0x7   :  { %v21088_v29 = vsub.f32 %v56_v10, %v21059_v18  ;;  %v21091_v30 = vsub.f32 %v59_v11, %v21067_v21  ;;  %v21093_v31 = vand.u32 4294901760, %v68_v27  ;;  %v71_v32 = vsel %vm51_vm0, %v39_v19, 0  ;;  %20335 = vmatpush3.bf16.msra.mxu1 %v21053_v15 }
   0x8   :  { %20224 = vmatprep.mubr.f32.mxu0 %v21065_v20 }
   0x9   :  { %14 = vsyncpa [#allocation5], 0  ;;  %20341 = vmatprep.subr.bf16.mxu0 %v21077_v25  ;;  %v21102_v34 = vsub.f32 %v62_v12, %v21069_v22  ;;  %v21104_v35 = vand.u32 4294901760, %v71_v32  ;;  %v74_v36 = vsel %vm51_vm0, %v40_v24, 0  ;;  %v169_v37 = vand.u32 4294901760, %v21065_v20  ;;  %v43_v42 = vld [vmem:[%s22724_s0 + $0x50] sm:$0xff] }
   0xa   :  { %20343 = vmatpush3.bf16.msra.mxu0 %v21077_v25  ;;  %v21110_v38 = vsub.f32 %v65_v23, %v21079_v26  ;;  %v21112_v39 = vand.u32 4294901760, %v74_v36  ;;  %v179_v40 = vand.u32 4294901760, %v21088_v29  ;;  %v77_v41 = vsel %vm51_vm0, %v41_v28, 0  ;;  %v44_v51 = vld [vmem:[%s22724_s0 + $0x58] sm:$0xff]  ;;  %v45_v13 = vld [vmem:[%s22724_s0 + $0x60] sm:$0xff]  ;;  %v46_v14 = vld [vmem:[%s22724_s0 + $0x68] sm:$0xff] }
   0xb   :  { %v21120_v43 = vsub.f32 %v68_v27, %v21093_v31  ;;  %v170_v44 = vsub.f32 %v21065_v20, %v169_v37  ;;  %v21125_v45 = vand.u32 4294901760, %v77_v41  ;;  %v80_v46 = vsel %vm51_vm0, %v42_v33, 0  ;;  %20345 = vmatprep.subr.bf16.mxu0 %v21053_v15  ;;  %v48_v33 = vld [vmem:[%s22724_s0 + $0x78] sm:$0xff]  ;;  %s20952_s22 = smov 32   ;;  %s20953_s23 = smov 16  }
   0xc   :  { %v21130_v47 = vsub.f32 %v71_v32, %v21104_v35  ;;  %v180_v48 = vsub.f32 %v21088_v29, %v179_v40  ;;  %v21135_v49 = vand.u32 4294901760, %v80_v46  ;;  %v189_v50 = vand.u32 4294901760, %v21091_v30  ;;  %v47_v32 = vld [vmem:[%s22724_s0 + $0x70] sm:$0xff]  ;;  %s20951_s0 = smov 48   ;;  %s20954_s24 = smov 112  }
   0xd   :  { %20225 = vmatmul.mubr.f32.vlgmr.msra.gmra.mrb[0].mxu0 %v21088_v29  ;;  %v21143_v52 = vsub.f32 %v74_v36, %v21112_v39  ;;  %v171_v53 = vand.u32 4294901760, %v170_v44  ;;  %v199_v54 = vand.u32 4294901760, %v21102_v34  ;;  %v83_v55 = vsel %vm51_vm0, %v43_v42, 0  ;;  %s20955_s25 = smov 64   ;;  %s20956_s26 = smov 96  }
   0xe   :  { %20227 = vmatprep.mubr.f32.mxu0 %v21091_v30  ;;  %v181_v56 = vand.u32 4294901760, %v180_v48  ;;  %v21149_v57 = vsub.f32 %v77_v41, %v21125_v45  ;;  %v190_v58 = vsub.f32 %v21091_v30, %v189_v50  ;;  %v21154_v59 = vand.u32 4294901760, %v83_v55  ;;  %20347 = vmatpush3.bf16.msra.mxu0 %v21053_v15  ;;  %s20957_s27 = smov 80   ;;  %s20958_s30 = smov 124  }
   0xf   :  { %20168 = vmatprep.mubr.f32.mxu1 %v171_v53  ;;  %v200_v60 = vsub.f32 %v21102_v34, %v199_v54  ;;  %v86_v61 = vsel %vm51_vm0, %v44_v51, 0  ;;  %v209_v62 = vand.u32 4294901760, %v21110_v38  ;;  %v219_v63 = vand.u32 4294901760, %v21120_v43  ;;  %s20960_s10 = smov 17   ;;  %s20961_s13 = smov 15  }
  0x10   :  { %20169 = vmatmul.mubr.f32.vlgmr.msra.gmra.mrb[0].mxu1 %v181_v56  ;;  %v21164_v0 = vsub.f32 %v80_v46, %v21135_v49  ;;  %v191_v1 = vand.u32 4294901760, %v190_v58  ;;  %v21166_v2 = vand.u32 4294901760, %v86_v61  ;;  %v229_v3 = vand.u32 4294901760, %v21130_v47  ;;  %s20962_s14 = smov 120   ;;  %s20963_s17 = smov 116  }
  0x11   :  { %20228 = vmatmul.mubr.f32.gmra.mrb[2].mxu0 %v21102_v34  ;;  %v201_v4 = vand.u32 4294901760, %v200_v60  ;;  %v210_v5 = vsub.f32 %v21110_v38, %v209_v62  ;;  %v220_v6 = vsub.f32 %v21120_v43, %v219_v63  ;;  %v239_v7 = vand.u32 4294901760, %v21143_v52  ;;  %s20964_s18 = smov 1   ;;  %s20965_s1 = smov 108  }
  0x12   :  { %20230 = vmatprep.mubr.f32.mxu0 %v21110_v38  ;;  %20171 = vmatprep.mubr.f32.mxu1 %v191_v1  ;;  %v21179_v8 = vsub.f32 %v83_v55, %v21154_v59  ;;  %v230_v10 = vsub.f32 %v21130_v47, %v229_v3  ;;  %v249_v11 = vand.u32 4294901760, %v21149_v57  ;;  %v259_v12 = vand.u32 4294901760, %v21164_v0  ;;  %s20966_s21 = smov 127   ;;  %s20969_s11 = smov 100  }
  0x13   :  { %v211_v19 = vand.u32 4294901760, %v210_v5  ;;  %v240_v23 = vsub.f32 %v21143_v52, %v239_v7  ;;  %v21196_v24 = vsub.f32 %v86_v61, %v21166_v2  ;;  %v221_v27 = vand.u32 4294901760, %v220_v6  ;;  %s20970_s16 = smov 111  }
  0x14   :  { %20172 = vmatmul.mubr.f32.gmra.mrb[2].mxu1 %v201_v4  ;;  %v269_v28 = vand.u32 4294901760, %v21179_v8  ;;  %v231_v36 = vand.u32 4294901760, %v230_v10  ;;  %v250_v41 = vsub.f32 %v21149_v57, %v249_v11  ;;  %v89_v42 = vsel %vm51_vm0, %v45_v13, 0 }
  0x15   :  { %20231 = vmatmul.mubr.f32.gmra.mrb[4].mxu0 %v21120_v43  ;;  %20174 = vmatprep.mubr.f32.mxu1 %v211_v19  ;;  %v92_v44 = vsel %vm51_vm0, %v46_v14, 0  ;;  %v260_v46 = vsub.f32 %v21164_v0, %v259_v12  ;;  %v279_v48 = vand.u32 4294901760, %v21196_v24  ;;  %v21216_v51 = vand.u32 4294901760, %v89_v42 }
  0x16   :  { %20233 = vmatprep.mubr.f32.mxu0 %v21130_v47  ;;  %v241_v53 = vand.u32 4294901760, %v240_v23  ;;  %v21218_v55 = vand.u32 4294901760, %v92_v44  ;;  %v95_v56 = vsel %vm51_vm0, %v47_v32, 0  ;;  %v98_v58 = vsel %vm51_vm0, %v48_v33, 0 }
  0x17   :  { %v270_v60 = vsub.f32 %v21179_v8, %v269_v28  ;;  %v21226_v61 = vsub.f32 %v89_v42, %v21216_v51  ;;  %v21228_v1 = vand.u32 4294901760, %v95_v56  ;;  %v21230_v4 = vand.u32 4294901760, %v98_v58 }
  0x18   :  { %20175 = vmatmul.mubr.f32.gmra.mrb[4].mxu1 %v221_v27  ;;  %v251_v5 = vand.u32 4294901760, %v250_v41  ;;  %v21234_v6 = vsub.f32 %v92_v44, %v21218_v55  ;;  %v330_v10 = vand.u32 4294901760, %v21055_v16  ;;  %v337_v13 = vand.u32 4294901760, %v21057_v17 }
  0x19   :  { %20234 = vmatmul.mubr.f32.gmra.mrb[6].mxu0 %v21143_v52  ;;  %20177 = vmatprep.mubr.f32.mxu1 %v231_v36  ;;  %v289_v14 = vand.u32 4294901760, %v21226_v61  ;;  %v21241_v19 = vsub.f32 %v95_v56, %v21228_v1  ;;  %v261_v23 = vand.u32 4294901760, %v260_v46  ;;  %v271_v36 = vand.u32 4294901760, %v270_v60 }
  0x1a   :  { %20236 = vmatprep.mubr.f32.mxu0 %v21149_v57  ;;  %v331_v27 = vsub.f32 %v21055_v16, %v330_v10  ;;  %v338_v32 = vsub.f32 %v21057_v17, %v337_v13  ;;  %v20348_v33 = vpack.c.bf16 %v337_v13, %v330_v10  ;;  %v280_v41 = vsub.f32 %v21196_v24, %v279_v48 }
  0x1b   :  { %v299_v42 = vand.u32 4294901760, %v21234_v6  ;;  %v21250_v44 = vsub.f32 %v98_v58, %v21230_v4  ;;  %v290_v46 = vsub.f32 %v21226_v61, %v289_v14  ;;  %v309_v16 = vand.u32 4294901760, %v21241_v19 }
  0x1c   :  { %20178 = vmatmul.mubr.f32.gmra.mrb[6].mxu1 %v241_v53  ;;  %v332_v17 = vand.u32 4294901760, %v331_v27  ;;  %v339_v56 = vand.u32 4294901760, %v338_v32  ;;  %20349 = vmatprep.subr.bf16.mxu0 %v20348_v33  ;;  %v281_v60 = vand.u32 4294901760, %v280_v41  ;;  %vm1224_vm1 = vcmask 125952  }
  0x1d   :  { %20237 = vmatmul.mubr.f32.gmra.mrb[8].mxu0 %v21164_v0  ;;  %20180 = vmatprep.mubr.f32.mxu1 %v251_v5  ;;  %v300_v10 = vsub.f32 %v21234_v6, %v299_v42  ;;  %v319_v58 = vand.u32 4294901760, %v21250_v44  ;;  %v291_v5 = vand.u32 4294901760, %v290_v46  ;;  %v310_v13 = vsub.f32 %v21241_v19, %v309_v16 }
  0x1e   :  { %20239 = vmatprep.mubr.f32.mxu0 %v21179_v8  ;;  %v20336_v53 = vpack.c.bf16 %v339_v56, %v332_v17  ;;  %vm1235_vm2 = vcmask 257152   ;;  %vm1246_vm3 = vcmask 388352   ;;  %vm1257_vm4 = vcmask 519552  }
  0x1f   :  { %v301_v27 = vand.u32 4294901760, %v300_v10  ;;  %v311_v32 = vand.u32 4294901760, %v310_v13  ;;  %vm1268_vm5 = vcmask 650752   ;;  %vm1279_vm6 = vcmask 781952  }
  0x20   :  { %20181 = vmatmul.mubr.f32.gmra.mrb[8].mxu1 %v261_v23  ;;  %20337 = vmatprep.subr.bf16.mxu1 %v20336_v53  ;;  %v320_v23 = vsub.f32 %v21250_v44, %v319_v58  ;;  %vm1290_vm7 = vcmask 913152   ;;  %vm1301_vm8 = vcmask 1044352   ;;  %vm1619_vm10 = vcmask 1043456  }
  0x21   :  { %20240 = vmatmul.mubr.f32.gmra.mrb[10].mxu0 %v21196_v24  ;;  %20183 = vmatprep.mubr.f32.mxu1 %v271_v36  ;;  %vm1616_vm11 = vcmask 31744  }
  0x22   :  { %20252 = vmatprep.mubr.f32.mxu0 %v169_v37  ;;  %20339 = vmatpush3.bf16.msra.mxu1 %v20336_v53  ;;  %v321_v20 = vand.u32 4294901760, %v320_v23 }
  0x23   :  { %20356 = vmatprep.subr.bf16.mxu1 %v21077_v25 }
  0x24   :  { %20184 = vmatmul.mubr.f32.gmra.mrb[10].mxu1 %v281_v60 }
  0x25   :  { %20253 = vmatmul.mubr.f32.vlgmr.msra.gmra.mrb[0].mxu0 %v179_v40  ;;  %20186 = vmatprep.mubr.f32.mxu1 %v291_v5 }
  0x26   :  { %20255 = vmatprep.mubr.f32.mxu0 %v189_v50  ;;  %20351 = vmatpush3.bf16.msra.mxu0 %v20348_v33 }
  0x27   :  { %20353 = vmatprep.subr.bf16.mxu0 %v21053_v15 }
  0x28   :  { %20187 = vmatmul.mubr.f32.gmra.mrb[12].mxu1 %v301_v27 }
  0x29   :  { %20256 = vmatmul.mubr.f32.gmra.mrb[2].mxu0 %v199_v54  ;;  %20189 = vmatprep.mubr.f32.mxu1 %v311_v32 }
  0x2a   :  { %20258 = vmatprep.mubr.f32.mxu0 %v209_v62 }
  0x2c   :  { %20190 = vmatmul.mubr.f32.gmra.mrb[14].mxu1 %v321_v20 }
  0x2d   :  { %20259 = vmatmul.mubr.f32.gmra.mrb[4].mxu0 %v219_v63  ;;  %20196 = vmatprep.mubr.f32.mxu1 %v21042_v9 }
  0x2e   :  { %20261 = vmatprep.mubr.f32.mxu0 %v229_v3 }
  0x30   :  { %20197 = vmatmul.mubr.f32.vlgmr.msra.gmra.mrb[0].mxu1 %v21059_v18 }
  0x31   :  { %20262 = vmatmul.mubr.f32.gmra.mrb[6].mxu0 %v239_v7  ;;  %20199 = vmatprep.mubr.f32.mxu1 %v21067_v21 }
  0x32   :  { %20264 = vmatprep.mubr.f32.mxu0 %v249_v11  ;;  %20357 = vmatpush3.bf16.msra.mxu1 %v21077_v25 }
  0x34   :  { %20200 = vmatmul.mubr.f32.gmra.mrb[2].mxu1 %v21069_v22 }
  0x35   :  { %20265 = vmatmul.mubr.f32.gmra.mrb[8].mxu0 %v259_v12  ;;  %20202 = vmatprep.mubr.f32.mxu1 %v21079_v26 }
  0x36   :  { %20267 = vmatprep.mubr.f32.mxu0 %v269_v28 }
  0x38   :  { %20203 = vmatmul.mubr.f32.gmra.mrb[4].mxu1 %v21093_v31 }
  0x39   :  { %20268 = vmatmul.mubr.f32.gmra.mrb[10].mxu0 %v279_v48  ;;  %20205 = vmatprep.mubr.f32.mxu1 %v21104_v35 }
  0x3a   :  { %20270 = vmatprep.mubr.f32.mxu0 %v289_v14 }
  0x3c   :  { %20206 = vmatmul.mubr.f32.gmra.mrb[6].mxu1 %v21112_v39 }
  0x3d   :  { %20271 = vmatmul.mubr.f32.gmra.mrb[12].mxu0 %v299_v42  ;;  %20208 = vmatprep.mubr.f32.mxu1 %v21125_v45 }
  0x3e   :  { %20273 = vmatprep.mubr.f32.mxu0 %v309_v16 }
  0x40   :  { %20209 = vmatmul.mubr.f32.gmra.mrb[8].mxu1 %v21135_v49 }
  0x41   :  { %20274 = vmatmul.mubr.f32.gmra.mrb[14].mxu0 %v319_v58  ;;  %20211 = vmatprep.mubr.f32.mxu1 %v21154_v59 }
  0x42   :  { %20280 = vmatprep.mubr.f32.mxu0 %v21042_v9 }
  0x44   :  { %20212 = vmatmul.mubr.f32.gmra.mrb[10].mxu1 %v21166_v2 }
  0x45   :  { %20281 = vmatmul.mubr.f32.vlgmr.msra.gmra.mrb[0].mxu0 %v21059_v18  ;;  %20214 = vmatprep.mubr.f32.mxu1 %v21216_v51 }
  0x46   :  { %20283 = vmatprep.mubr.f32.mxu0 %v21067_v21  ;;  %20355 = vmatpush3.bf16.msra.mxu0 %v21053_v15 }
  0x48   :  { %20215 = vmatmul.mubr.f32.gmra.mrb[12].mxu1 %v21218_v55 }
  0x49   :  { %20284 = vmatmul.mubr.f32.gmra.mrb[2].mxu0 %v21069_v22  ;;  %20217 = vmatprep.mubr.f32.mxu1 %v21228_v1 }
  0x4a   :  { %20286 = vmatprep.mubr.f32.mxu0 %v21079_v26 }
  0x4c   :  { %20218 = vmatmul.mubr.f32.gmra.mrb[14].mxu1 %v21230_v4 }
  0x4d   :  { %20287 = vmatmul.mubr.f32.gmra.mrb[4].mxu0 %v21093_v31  ;;  %20242 = vmatprep.mubr.f32.mxu1 %v21226_v61 }
  0x4e   :  { %20289 = vmatprep.mubr.f32.mxu0 %v21104_v35 }
  0x50   :  { %20243 = vmatmul.mubr.f32.vlgmr.msra.gmra.mrb[12].mxu1 %v21234_v6 }
  0x51   :  { %20290 = vmatmul.mubr.f32.gmra.mrb[6].mxu0 %v21112_v39  ;;  %20245 = vmatprep.mubr.f32.mxu1 %v21241_v19 }
  0x52   :  { %20292 = vmatprep.mubr.f32.mxu0 %v21125_v45 }
  0x54   :  { %20246 = vmatmul.mubr.f32.gmra.mrb[14].mxu1 %v21250_v44 }
  0x55   :  { %20293 = vmatmul.mubr.f32.gmra.mrb[8].mxu0 %v21135_v49 }
  0x56   :  { %20295 = vmatprep.mubr.f32.mxu0 %v21154_v59 }
  0x59   :  { %20296 = vmatmul.mubr.f32.gmra.mrb[10].mxu0 %v21166_v2 }
  0x5a   :  { %20298 = vmatprep.mubr.f32.mxu0 %v21216_v51 }
  0x5d   :  { %20299 = vmatmul.mubr.f32.gmra.mrb[12].mxu0 %v21218_v55 }
  0x5e   :  { %20301 = vmatprep.mubr.f32.mxu0 %v21228_v1 }
  0x61   :  { %20302 = vmatmul.mubr.f32.gmra.mrb[14].mxu0 %v21230_v4 }
  0x62   :  { %20308 = vmatprep.mubr.f32.mxu0 %v21042_v9 }
  0x65   :  { %20309 = vmatmul.mubr.f32.vlgmr.msra.gmra.mrb[0].mxu0 %v21059_v18 }
  0x66   :  { %20311 = vmatprep.mubr.f32.mxu0 %v21067_v21 }
  0x69   :  { %20312 = vmatmul.mubr.f32.gmra.mrb[2].mxu0 %v21069_v22 }
  0x6a   :  { %20314 = vmatprep.mubr.f32.mxu0 %v21079_v26 }
  0x6d   :  { %20315 = vmatmul.mubr.f32.gmra.mrb[4].mxu0 %v21093_v31 }
  0x6e   :  { %20317 = vmatprep.mubr.f32.mxu0 %v21104_v35 }
  0x71   :  { %20318 = vmatmul.mubr.f32.gmra.mrb[6].mxu0 %v21112_v39 }
  0x72   :  { %20320 = vmatprep.mubr.f32.mxu0 %v21125_v45 }
  0x75   :  { %20321 = vmatmul.mubr.f32.gmra.mrb[8].mxu0 %v21135_v49 }
  0x76   :  { %20323 = vmatprep.mubr.f32.mxu0 %v21154_v59 }
  0x79   :  { %20324 = vmatmul.mubr.f32.gmra.mrb[10].mxu0 %v21166_v2 }
  0x7a   :  { %20326 = vmatprep.mubr.f32.mxu0 %v21216_v51 }
  0x7d   :  { %20327 = vmatmul.mubr.f32.gmra.mrb[12].mxu0 %v21218_v55 }
  0x7e   :  { %20329 = vmatprep.mubr.f32.mxu0 %v21228_v1 }
  0x81   :  { %20330 = vmatmul.mubr.f32.gmra.mrb[14].mxu0 %v21230_v4 }
 0x103   :  { %v20198_v9 = vpop.f32.mrb[0].mxu1 }
 0x104   :  { %v404_v15 = vpop.f32.mrb[1].mxu1 }
 0x107   :  { %v20201_v18 = vpop.f32.mrb[2].mxu1 }
 0x108   :  { %v416_v21 = vpop.f32.mrb[3].mxu1 }
 0x10b   :  { %v20204_v22 = vpop.f32.mrb[4].mxu1 }
 0x10c   :  { %v428_v25 = vpop.f32.mrb[5].mxu1 }
 0x10f   :  { %v20207_v26 = vpop.f32.mrb[6].mxu1 }
 0x110   :  { %v440_v29 = vpop.f32.mrb[7].mxu1 }
 0x113   :  { %v20210_v30 = vpop.f32.mrb[8].mxu1 }
 0x114   :  { %v452_v31 = vpop.f32.mrb[9].mxu1 }
 0x117   :  { %v21341_v34 = vpop.f32.mrb[10].mxu1 }
 0x118   :  { %v21343_v35 = vpop.f32.mrb[11].mxu1 }
 0x123   :  { %v21345_v37 = vpop.f32.mrb[12].mxu1 }
 0x124   :  { %v21347_v38 = vpop.f32.mrb[13].mxu1 }
 0x127   :  { %v21349_v39 = vpop.f32.mrb[14].mxu1 }
 0x128   :  { %v21351_v40 = vpop.f32.mrb[15].mxu1 }
 0x138   :  { %v20310_v43 = vpop.f32.mrb[0].mxu0 }
 0x139   :  { %v20358_v45 = vadd.f32 %v20310_v43, %v20198_v9  ;;  %v1110_v47 = vpop.f32.mrb[1].mxu0 }
 0x13a   :  { %v20359_v49 = vadd.f32 %v1110_v47, %v404_v15 }
 0x13b   :  { %1205 = vst.msk [vmem:[#allocation2 + $0x8] sm:$0xff] %vm51_vm0, %v20358_v45 }
 0x13c   :  { %1204 = vst.msk [vmem:[#allocation2] sm:$0xff] %vm51_vm0, %v20359_v49  ;;  %v20313_v50 = vpop.f32.mrb[2].mxu0 }
 0x13d   :  { %v20360_v52 = vadd.f32 %v20313_v50, %v20201_v18  ;;  %v1122_v54 = vpop.f32.mrb[3].mxu0 }
 0x13e   :  { %v20361_v57 = vadd.f32 %v1122_v54, %v416_v21 }
 0x13f   :  { %1207 = vst.msk [vmem:[#allocation2 + $0x18] sm:$0xff] %vm51_vm0, %v20360_v52 }
 0x140   :  { %1206 = vst.msk [vmem:[#allocation2 + $0x10] sm:$0xff] %vm51_vm0, %v20361_v57  ;;  %v20316_v59 = vpop.f32.mrb[4].mxu0 }
 0x141   :  { %v20362_v62 = vadd.f32 %v20316_v59, %v20204_v22  ;;  %v1134_v63 = vpop.f32.mrb[5].mxu0 }
 0x142   :  { %v20363_v0 = vadd.f32 %v1134_v63, %v428_v25  ;;  %v1248_v2 = vld [vmem:[#allocation2 + $0x8] sm:$0xf]  ;;  %v1250_v3 = vld [vmem:[#allocation2 + $0xc] sm:$0xf] }
 0x143   :  { %v1239_v7 = vld [vmem:[#allocation2 + $0x8] sm:$0xf]  ;;  %1209 = vst.msk [vmem:[#allocation2 + $0x28] sm:$0xff] %vm51_vm0, %v20362_v62  ;;  %v1249_v8 = vmul.f32 0.5625, %v1248_v2  ;;  %v1251_v11 = vmul.f32 0.4375, %v1250_v3 }
 0x144   :  { %v1237_v12 = vld [vmem:[#allocation2 + $0x4] sm:$0xf]  ;;  %v1240_v24 = vmul.f32 0.3125, %v1239_v7  ;;  %1208 = vst.msk [vmem:[#allocation2 + $0x20] sm:$0xff] %vm51_vm0, %v20363_v0  ;;  %v20319_v28 = vpop.f32.mrb[6].mxu0 }
 0x145   :  { %v1238_v48 = vmul.f32 0.6875, %v1237_v12  ;;  %v1226_v51 = vld [vmem:[#allocation2] sm:$0xf]  ;;  %v1228_v55 = vld [vmem:[#allocation2 + $0x4] sm:$0xf]  ;;  %v20364_v61 = vadd.f32 %v20319_v28, %v20207_v26  ;;  %v1146_v1 = vpop.f32.mrb[7].mxu0  ;;  %v1252_v4 = vadd.f32 %v1251_v11, %v1249_v8 }
 0x146   :  { %v1227_v6 = vmul.f32 0.8125, %v1226_v51  ;;  %v1229_v14 = vmul.f32 0.1875, %v1228_v55  ;;  %v20365_v19 = vadd.f32 %v1146_v1, %v440_v29  ;;  %v1292_v36 = vld [vmem:[#allocation2 + $0x18] sm:$0xf]  ;;  %v1294_v41 = vld [vmem:[#allocation2 + $0x1c] sm:$0xf] }
 0x147   :  { %v1241_v33 = vadd.f32 %v1240_v24, %v1238_v48  ;;  %1211 = vst.msk [vmem:[#allocation2 + $0x38] sm:$0xff] %vm51_vm0, %v20364_v61  ;;  %1254 = vrot.lane.b32.xlu0 %v1252_v4, %s20951_s0  ;;  %v1293_v17 = vmul.f32 0.0625, %v1292_v36  ;;  %v1295_v56 = vmul.f32 0.9375, %v1294_v41  ;;  %v1261_v53 = vld [vmem:[#allocation2 + $0x10] sm:$0xf] }
 0x148   :  { %1210 = vst.msk [vmem:[#allocation2 + $0x30] sm:$0xff] %vm51_vm0, %v20365_v19  ;;  %v20322_v42 = vpop.f32.mrb[8].mxu0  ;;  %v1230_v16 = vadd.f32 %v1229_v14, %v1227_v6  ;;  %v1259_v5 = vld [vmem:[#allocation2 + $0xc] sm:$0xf]  ;;  %v1262_v32 = vmul.f32 0.5625, %v1261_v53 }
 0x149   :  { %1243 = vrot.lane.b32.xlu1 %v1241_v33, %s20952_s22  ;;  %v20366_v44 = vadd.f32 %v20322_v42, %v20210_v30  ;;  %v1158_v46 = vpop.f32.mrb[9].mxu0  ;;  %v1296_v15 = vadd.f32 %v1295_v56, %v1293_v17  ;;  %v1260_v21 = vmul.f32 0.4375, %v1259_v5  ;;  %v1270_v22 = vld [vmem:[#allocation2 + $0x10] sm:$0xf]  ;;  %v1272_v25 = vld [vmem:[#allocation2 + $0x14] sm:$0xf] }
 0x14a   :  { %v20367_v60 = vadd.f32 %v1158_v46, %v452_v31  ;;  %v1319_v10 = vld [vmem:[#allocation2 + $0x28] sm:$0xf]  ;;  %v1321_v58 = vld [vmem:[#allocation2 + $0x2c] sm:$0xf]  ;;  %v1271_v49 = vmul.f32 0.3125, %v1270_v22  ;;  %v1273_v50 = vmul.f32 0.6875, %v1272_v25 }
 0x14b   :  { %1213 = vst.msk [vmem:[#allocation2 + $0x48] sm:$0xff] %vm51_vm0, %v20366_v44  ;;  %1232 = vrot.lane.b32.xlu0 %v1230_v16, %s20953_s23  ;;  %v1320_v13 = vmul.f32 0.6875, %v1319_v10  ;;  %v1322_v27 = vmul.f32 0.3125, %v1321_v58  ;;  %v1263_v47 = vadd.f32 %v1262_v32, %v1260_v21  ;;  %v1281_v52 = vld [vmem:[#allocation2 + $0x14] sm:$0xf] }
 0x14c   :  { %1212 = vst.msk [vmem:[#allocation2 + $0x40] sm:$0xff] %vm51_vm0, %v20367_v60  ;;  %v20325_v23 = vpop.f32.mrb[10].mxu0  ;;  %v1283_v63 = vld [vmem:[#allocation2 + $0x18] sm:$0xf]  ;;  %v1329_v8 = vld [vmem:[#allocation2 + $0x2c] sm:$0xf]  ;;  %v1274_v24 = vadd.f32 %v1273_v50, %v1271_v49 }
 0x14d   :  { %v20368_v20 = vadd.f32 %v20325_v23, %v21341_v34  ;;  %v1170_v9 = vpop.f32.mrb[11].mxu0  ;;  %v1323_v18 = vadd.f32 %v1322_v27, %v1320_v13  ;;  %v1284_v7 = vmul.f32 0.8125, %v1283_v63  ;;  %v1309_v48 = vld [vmem:[#allocation2 + $0x24] sm:$0xf]  ;;  %v1311_v51 = vld [vmem:[#allocation2 + $0x28] sm:$0xf] }
 0x14e   :  { %v20369_v26 = vadd.f32 %v1170_v9, %v21343_v35  ;;  %v1359_v29 = vld [vmem:[#allocation2 + $0x38] sm:$0xf]  ;;  %v1361_v30 = vld [vmem:[#allocation2 + $0x3c] sm:$0xf]  ;;  %v1330_v4 = vmul.f32 0.5625, %v1329_v8  ;;  %v1312_v14 = vmul.f32 0.1875, %v1311_v51 }
 0x14f   :  { %v1369_v31 = vld [vmem:[#allocation2 + $0x3c] sm:$0xf]  ;;  %1215 = vst.msk [vmem:[#allocation2 + $0x58] sm:$0xff] %vm51_vm0, %v20368_v20  ;;  %1298 = vrot.lane.b32.xlu0 %v1296_v15, %s20954_s24  ;;  %1325 = vrot.lane.b32.xlu1 %v1323_v18, %s20952_s22  ;;  %v1360_v43 = vmul.f32 0.1875, %v1359_v29  ;;  %v1362_v34 = vmul.f32 0.8125, %v1361_v30 }
 0x150   :  { %1214 = vst.msk [vmem:[#allocation2 + $0x50] sm:$0xff] %vm51_vm0, %v20369_v26  ;;  %v20328_v45 = vpop.f32.mrb[12].mxu0  ;;  %v1370_v59 = vmul.f32 0.0625, %v1369_v31  ;;  %v1371_v62 = vmul.f32 0.0, %v1369_v31  ;;  %v1331_v2 = vld [vmem:[#allocation2 + $0x30] sm:$0xf] }
 0x151   :  { %v20370_v35 = vadd.f32 %v20328_v45, %v21345_v37  ;;  %v1182_v54 = vpop.f32.mrb[13].mxu0  ;;  %v1363_v57 = vadd.f32 %v1362_v34, %v1360_v43  ;;  %v1282_v37 = vmul.f32 0.1875, %v1281_v52  ;;  %v1332_v28 = vmul.f32 0.4375, %v1331_v2  ;;  %v1339_v61 = vld [vmem:[#allocation2 + $0x30] sm:$0xf] }
 0x152   :  { %v20371_v0 = vadd.f32 %v1182_v54, %v21347_v38  ;;  %v1372_v38 = vadd.f32 %v1371_v62, %v1370_v59  ;;  %v1341_v1 = vld [vmem:[#allocation2 + $0x34] sm:$0xf]  ;;  %v1220_v6 = vld [vmem:[#allocation2] sm:$0xf]  ;;  %v1340_v36 = vmul.f32 0.4375, %v1339_v61 }
 0x153   :  { %1217 = vst.msk [vmem:[#allocation2 + $0x68] sm:$0xff] %vm51_vm0, %v20370_v35  ;;  %1265 = vrot.lane.b32.xlu0 %v1263_v47, %s20955_s25  ;;  %1365 = vrot.lane.b32.xlu1 %v1363_v57, %s20956_s26  ;;  %v1285_v19 = vadd.f32 %v1284_v7, %v1282_v37  ;;  %v1333_v33 = vadd.f32 %v1332_v28, %v1330_v4  ;;  %v1342_v41 = vmul.f32 0.5625, %v1341_v1  ;;  %v1351_v42 = vld [vmem:[#allocation2 + $0x38] sm:$0xf]  ;;  %v1403_v44 = vld [vmem:[#allocation2 + $0x48] sm:$0xf] }
 0x154   :  { %1216 = vst.msk [vmem:[#allocation2 + $0x60] sm:$0xff] %vm51_vm0, %v20371_v0  ;;  %v20331_v3 = vpop.f32.mrb[14].mxu0  ;;  %v1405_v46 = vld [vmem:[#allocation2 + $0x4c] sm:$0xf]  ;;  %v1221_v16 = vmul.f32 0.0, %v1220_v6  ;;  %v1352_v56 = vmul.f32 0.6875, %v1351_v42 }
 0x155   :  { %v20372_v11 = vadd.f32 %v20331_v3, %v21349_v39  ;;  %v1194_v12 = vpop.f32.mrb[15].mxu0  ;;  %v1310_v39 = vmul.f32 0.8125, %v1309_v48  ;;  %v1222_v53 = vmul.f32 0.0625, %v1220_v6  ;;  %v1343_v10 = vadd.f32 %v1342_v41, %v1340_v36  ;;  %v1383_v13 = vld [vmem:[#allocation2 + $0x40] sm:$0xf] }
 0x156   :  { %v20373_v55 = vadd.f32 %v1194_v12, %v21351_v40  ;;  %v1349_v40 = vld [vmem:[#allocation2 + $0x34] sm:$0xf]  ;;  %v1404_v58 = vmul.f32 0.5625, %v1403_v44  ;;  %v1406_v5 = vmul.f32 0.4375, %v1405_v46  ;;  %v1385_v27 = vld [vmem:[#allocation2 + $0x44] sm:$0xf] }
 0x157   :  { %1219 = vst.msk [vmem:[#allocation2 + $0x78] sm:$0xff] %vm51_vm0, %v20372_v11  ;;  %1276 = vrot.lane.b32.xlu0 %v1274_v24, %s20957_s27  ;;  %1374 = vrot.lane.b32.xlu1 %v1372_v38, %s20954_s24  ;;  %v1350_v17 = vmul.f32 0.3125, %v1349_v40  ;;  %v1313_v60 = vadd.f32 %v1312_v14, %v1310_v39  ;;  %v1393_v20 = vld [vmem:[#allocation2 + $0x44] sm:$0xf]  ;;  %v1223_v9 = vadd.f32 %v1222_v53, %v1221_v16  ;;  %v1395_v15 = vld [vmem:[#allocation2 + $0x48] sm:$0xf] }
 0x158   :  { %1218 = vst.msk [vmem:[#allocation2 + $0x70] sm:$0xff] %vm51_vm0, %v20373_v55  ;;  %v1303_v18 = vld [vmem:[#allocation2 + $0x20] sm:$0xf]  ;;  %v1384_v22 = vmul.f32 0.8125, %v1383_v13  ;;  %v1386_v25 = vmul.f32 0.1875, %v1385_v27  ;;  %v1407_v29 = vadd.f32 %v1406_v5, %v1404_v58  ;;  %v1394_v43 = vmul.f32 0.6875, %v1393_v20 }
 0x159   :  { %v1353_v21 = vadd.f32 %v1352_v56, %v1350_v17  ;;  %1225 = vst.msk [vmem:[#allocation3] sm:$0xf] %vm1224_vm1, %v1223_v9  ;;  %v1305_v26 = vld [vmem:[#allocation2 + $0x24] sm:$0xf]  ;;  %v1396_v45 = vmul.f32 0.3125, %v1395_v15  ;;  %v1304_v49 = vmul.f32 0.9375, %v1303_v18 }
 0x15a   :  { %v1469_v23 = vld [vmem:[#allocation2 + $0x68] sm:$0xf]  ;;  %v1471_v32 = vld [vmem:[#allocation2 + $0x6c] sm:$0xf]  ;;  %v1378_v50 = vld [vmem:[#allocation2 + $0x40] sm:$0xf]  ;;  %v1387_v59 = vadd.f32 %v1386_v25, %v1384_v22 }
 0x15b   :  { %1287 = vrot.lane.b32.xlu0 %v1285_v19, %s20956_s26  ;;  %1335 = vrot.lane.b32.xlu1 %v1333_v33, %s20951_s0  ;;  %v1470_v30 = vmul.f32 0.6875, %v1469_v23  ;;  %v1472_v31 = vmul.f32 0.3125, %v1471_v32  ;;  %v1461_v34 = vld [vmem:[#allocation2 + $0x68] sm:$0xf]  ;;  %v1459_v47 = vld [vmem:[#allocation2 + $0x64] sm:$0xf]  ;;  %v1397_v28 = vadd.f32 %v1396_v45, %v1394_v43 }
 0x15c   :  { %v1306_v52 = vmul.f32 0.0625, %v1305_v26  ;;  %v1379_v35 = vmul.f32 0.0, %v1378_v50  ;;  %v1453_v54 = vld [vmem:[#allocation2 + $0x60] sm:$0xf]  ;;  %v1455_v57 = vld [vmem:[#allocation2 + $0x64] sm:$0xf] }
 0x15d   :  { %v1380_v62 = vmul.f32 0.0625, %v1378_v50  ;;  %v1454_v63 = vmul.f32 0.9375, %v1453_v54  ;;  %v1456_v0 = vmul.f32 0.0625, %v1455_v57  ;;  %v1473_v2 = vadd.f32 %v1472_v31, %v1470_v30  ;;  %v1415_v8 = vld [vmem:[#allocation2 + $0x50] sm:$0xf] }
 0x15e   :  { %v1460_v3 = vmul.f32 0.8125, %v1459_v47  ;;  %v1462_v37 = vmul.f32 0.1875, %v1461_v34  ;;  %v1307_v7 = vadd.f32 %v1306_v52, %v1304_v49  ;;  %v1509_v11 = vld [vmem:[#allocation2 + $0x78] sm:$0xf]  ;;  %v1511_v12 = vld [vmem:[#allocation2 + $0x7c] sm:$0xf] }
 0x15f   :  { %1315 = vrot.lane.b32.xlu0 %v1313_v60, %s20953_s23  ;;  %1345 = vrot.lane.b32.xlu1 %v1343_v10, %s20955_s25  ;;  %v1381_v24 = vadd.f32 %v1380_v62, %v1379_v35  ;;  %v1457_v38 = vadd.f32 %v1456_v0, %v1454_v63  ;;  %v1413_v48 = vld [vmem:[#allocation2 + $0x4c] sm:$0xf]  ;;  %v1416_v55 = vmul.f32 0.5625, %v1415_v8  ;;  %v1510_v61 = vmul.f32 0.1875, %v1509_v11  ;;  %v1423_v4 = vld [vmem:[#allocation2 + $0x50] sm:$0xf] }
 0x160   :  { %1308 = vst.msk [vmem:[#allocation3 + $0x4] sm:$0xf] %vm1224_vm1, %v1307_v7  ;;  %v1463_v51 = vadd.f32 %v1462_v37, %v1460_v3  ;;  %v1512_v1 = vmul.f32 0.8125, %v1511_v12  ;;  %v1425_v6 = vld [vmem:[#allocation2 + $0x54] sm:$0xf]  ;;  %v1414_v14 = vmul.f32 0.4375, %v1413_v48 }
 0x161   :  { %1382 = vst.msk [vmem:[#allocation3 + $0x8] sm:$0xf] %vm1224_vm1, %v1381_v24  ;;  %1458 = vst.msk [vmem:[#allocation3 + $0xc] sm:$0xf] %vm1224_vm1, %v1457_v38  ;;  %v1481_v39 = vld [vmem:[#allocation2 + $0x70] sm:$0xf] }
 0x162   :  { %v1424_v19 = vmul.f32 0.3125, %v1423_v4  ;;  %v1479_v33 = vld [vmem:[#allocation2 + $0x6c] sm:$0xf]  ;;  %v1417_v36 = vadd.f32 %v1416_v55, %v1414_v14  ;;  %v1513_v41 = vadd.f32 %v1512_v1, %v1510_v61  ;;  %v1426_v40 = vmul.f32 0.6875, %v1425_v6  ;;  %v1433_v44 = vld [vmem:[#allocation2 + $0x54] sm:$0xf] }
 0x163   :  { %1355 = vrot.lane.b32.xlu1 %v1353_v21, %s20957_s27  ;;  %1409 = vrot.lane.b32.xlu0 %v1407_v29, %s20951_s0  ;;  %v1482_v42 = vmul.f32 0.4375, %v1481_v39  ;;  %v1435_v46 = vld [vmem:[#allocation2 + $0x58] sm:$0xf]  ;;  %v1489_v16 = vld [vmem:[#allocation2 + $0x70] sm:$0xf]  ;;  %v1480_v56 = vmul.f32 0.5625, %v1479_v33 }
 0x164   :  { %v1491_v17 = vld [vmem:[#allocation2 + $0x74] sm:$0xf]  ;;  %v1434_v53 = vmul.f32 0.1875, %v1433_v44  ;;  %v1436_v60 = vmul.f32 0.8125, %v1435_v46  ;;  %v1427_v10 = vadd.f32 %v1426_v40, %v1424_v19  ;;  %v1490_v5 = vmul.f32 0.4375, %v1489_v16 }
 0x165   :  { %v1483_v58 = vadd.f32 %v1482_v42, %v1480_v56  ;;  %v1492_v13 = vmul.f32 0.5625, %v1491_v17  ;;  %v1443_v27 = vld [vmem:[#allocation2 + $0x58] sm:$0xf]  ;;  %v1445_v23 = vld [vmem:[#allocation2 + $0x5c] sm:$0xf]  ;;  %v1552_v17 = vlaneseq }
 0x166   :  { %v1499_v32 = vld [vmem:[#allocation2 + $0x74] sm:$0xf]  ;;  %v1501_v20 = vld [vmem:[#allocation2 + $0x78] sm:$0xf]  ;;  %v1437_v9 = vadd.f32 %v1436_v60, %v1434_v53  ;;  %v1444_v15 = vmul.f32 0.0625, %v1443_v27  ;;  %v1446_v21 = vmul.f32 0.9375, %v1445_v23 }
 0x167   :  { %1389 = vrot.lane.b32.xlu0 %v1387_v59, %s20953_s23  ;;  %1475 = vrot.lane.b32.xlu1 %v1473_v2, %s20952_s22  ;;  %v1493_v18 = vadd.f32 %v1492_v13, %v1490_v5  ;;  %v1500_v22 = vmul.f32 0.3125, %v1499_v32  ;;  %v1502_v25 = vmul.f32 0.6875, %v1501_v20  ;;  %v1519_v26 = vld [vmem:[#allocation2 + $0x7c] sm:$0xf]  ;;  %v21409_v34 = vld [vmem:[%s22727_s3] sm:$0xf] }
 0x168   :  { %v1447_v29 = vadd.f32 %v1446_v21, %v1444_v15  ;;  %v1520_v31 = vmul.f32 0.0625, %v1519_v26  ;;  %v1521_v43 = vmul.f32 0.0, %v1519_v26  ;;  %v4524_v40 = vld [vmem:[%s22727_s3] sm:$0xf]  ;;  %v21545_v56 = vshrl.u32 %v1552_v17, 7 }
 0x169   :  { %v1503_v30 = vadd.f32 %v1502_v25, %v1500_v22  ;;  %v6455_v42 = vld [vmem:[%s22727_s3] sm:$0xf]  ;;  %v21547_v60 = vand.u32 127, %v1552_v17 }
 0x16a   :  { %v1522_v45 = vadd.f32 %v1521_v43, %v1520_v31  ;;  %v7440_v44 = vld [vmem:[%s22727_s3] sm:$0xf] }
 0x16b   :  { %1399 = vrot.lane.b32.xlu0 %v1397_v28, %s20952_s22  ;;  %1465 = vrot.lane.b32.xlu1 %v1463_v51, %s20953_s23  ;;  %v8425_v46 = vld [vmem:[%s22727_s3] sm:$0xf]  ;;  %vm1588_vm9 = vcmp.lt.s32.totalorder %v21547_v60, 16  ;;  %vm1554_vm12 = vcmp.lt.s32.totalorder %v21547_v60, 17  ;;  %vm3514_vm13 = vcmp.lt.s32.totalorder %v21547_v60, 15  ;;  %vm4499_vm14 = vcmp.lt.s32.totalorder %v21547_v60, 1 }
 0x16c   :  { %v9410_v16 = vld [vmem:[%s22727_s3] sm:$0xf]  ;;  %vm6430_vm15 = vcmp.lt.s32.totalorder %v21547_v60, 127  ;;  %vm7415_vm0 = vcmp.lt.s32.totalorder %v21547_v60, 113  ;;  %vm8400_vm1 = vcmp.lt.s32.totalorder %v21547_v60, 112 }
 0x16d   :  { %v21572_v25 = vld [vmem:[%s22726_s2] sm:$0xff] }
 0x16f   :  { %1419 = vrot.lane.b32.xlu0 %v1417_v36, %s20955_s25  ;;  %1515 = vrot.lane.b32.xlu1 %v1513_v41, %s20956_s26  ;;  %v20959_v36 = vmov 0.0   ;;  %v3539_v41 = vld [vmem:[%s22727_s3] sm:$0xf] }
 0x170   :  { %1698 = vmatprep.mubr.f32.mxu1 %v20959_v36  ;;  %10492 = vmatprep.mubr.f32.mxu0 %v20959_v36 }
 0x173   :  { %1429 = vrot.lane.b32.xlu0 %v1427_v10, %s20957_s27  ;;  %1485 = vrot.lane.b32.xlu1 %v1483_v58, %s20951_s0  ;;  %v1595_v10 = vsub.s32 1, %v21545_v56  ;;  %v21553_v58 = vld [vmem:[%s22726_s2 + $0x8] sm:$0xff] }
 0x175   :  { %v21557_v5 = vrot.slane %v21553_v58, %v1595_v10 }
 0x177   :  { %1439 = vrot.lane.b32.xlu0 %v1437_v9, %s20956_s26  ;;  %1495 = vrot.lane.b32.xlu1 %v1493_v18, %s20955_s25  ;;  %s20967_s25 = smov 113  }
 0x17b   :  { %1449 = vrot.lane.b32.xlu0 %v1447_v29, %s20954_s24  ;;  %1505 = vrot.lane.b32.xlu1 %v1503_v30, %s20957_s27  ;;  %s20968_s27 = smov 104   ;;  %v21578_v29 = vrot.slane %v21572_v25, %v1595_v10 }
 0x17f   :  { %1524 = vrot.lane.b32.xlu1 %v1522_v45, %s20954_s24  ;;  %1614 = vrot.lane.b32.xlu0 %v21409_v34, %s20958_s30 }
 0x1b9   :  { %v1255_v47 = vpop.permute.xlu0 %1254 }
 0x1bb   :  { %v1244_v49 = vpop.permute.xlu1 %1243 }
 0x1bd   :  { %v1233_v50 = vpop.permute.xlu0 %1232 }
 0x1be   :  { %1236 = vst.msk [vmem:[#allocation3] sm:$0xf] %vm1235_vm2, %v1233_v50 }
 0x1bf   :  { %1247 = vst.msk [vmem:[#allocation3] sm:$0xf] %vm1246_vm3, %v1244_v49 }
 0x1c0   :  { %1258 = vst.msk [vmem:[#allocation3] sm:$0xf] %vm1257_vm4, %v1255_v47 }
 0x1c1   :  { %v1299_v52 = vpop.permute.xlu0 %1298  ;;  %v1326_v35 = vpop.permute.xlu1 %1325 }
 0x1c5   :  { %v1266_v54 = vpop.permute.xlu0 %1265  ;;  %v1366_v57 = vpop.permute.xlu1 %1365 }
 0x1c6   :  { %1269 = vst.msk [vmem:[#allocation3] sm:$0xf] %vm1268_vm5, %v1266_v54 }
 0x1c9   :  { %v1277_v59 = vpop.permute.xlu0 %1276  ;;  %v1375_v62 = vpop.permute.xlu1 %1374 }
 0x1ca   :  { %1280 = vst.msk [vmem:[#allocation3] sm:$0xf] %vm1279_vm6, %v1277_v59 }
 0x1cd   :  { %v1288_v63 = vpop.permute.xlu0 %1287  ;;  %v1336_v0 = vpop.permute.xlu1 %1335 }
 0x1ce   :  { %1291 = vst.msk [vmem:[#allocation3] sm:$0xf] %vm1290_vm7, %v1288_v63 }
 0x1cf   :  { %1302 = vst.msk [vmem:[#allocation3] sm:$0xf] %vm1301_vm8, %v1299_v52 }
 0x1d1   :  { %v1316_v2 = vpop.permute.xlu0 %1315  ;;  %v1346_v3 = vpop.permute.xlu1 %1345 }
 0x1d2   :  { %1318 = vst.msk [vmem:[#allocation3 + $0x4] sm:$0xf] %vm1235_vm2, %v1316_v2  ;;  %v21597_v2 = vld [vmem:[%s22726_s2 + $0x10] sm:$0xff] }
 0x1d3   :  { %1328 = vst.msk [vmem:[#allocation3 + $0x4] sm:$0xf] %vm1246_vm3, %v1326_v35 }
 0x1d4   :  { %1338 = vst.msk [vmem:[#allocation3 + $0x4] sm:$0xf] %vm1257_vm4, %v1336_v0  ;;  %v21592_v0 = vld [vmem:[%s22726_s2 + $0x18] sm:$0xff] }
 0x1d5   :  { %1348 = vst.msk [vmem:[#allocation3 + $0x4] sm:$0xf] %vm1268_vm5, %v1346_v3  ;;  %v1356_v37 = vpop.permute.xlu1 %1355  ;;  %v1410_v7 = vpop.permute.xlu0 %1409 }
 0x1d6   :  { %1358 = vst.msk [vmem:[#allocation3 + $0x4] sm:$0xf] %vm1279_vm6, %v1356_v37  ;;  %v21600_v37 = vrot.slane %v21592_v0, %v1595_v10 }
 0x1d7   :  { %1368 = vst.msk [vmem:[#allocation3 + $0x4] sm:$0xf] %vm1290_vm7, %v1366_v57 }
 0x1d8   :  { %1377 = vst.msk [vmem:[#allocation3 + $0x4] sm:$0xf] %vm1301_vm8, %v1375_v62 }
 0x1d9   :  { %v1390_v8 = vpop.permute.xlu0 %1389  ;;  %v1476_v11 = vpop.permute.xlu1 %1475 }
 0x1da   :  { %1392 = vst.msk [vmem:[#allocation3 + $0x8] sm:$0xf] %vm1235_vm2, %v1390_v8  ;;  %v21605_v8 = vrot.slane %v21597_v2, %v1595_v10 }
 0x1dd   :  { %v1400_v12 = vpop.permute.xlu0 %1399  ;;  %v1466_v24 = vpop.permute.xlu1 %1465 }
 0x1de   :  { %1402 = vst.msk [vmem:[#allocation3 + $0x8] sm:$0xf] %vm1246_vm3, %v1400_v12 }
 0x1df   :  { %1468 = vst.msk [vmem:[#allocation3 + $0xc] sm:$0xf] %vm1235_vm2, %v1466_v24  ;;  %v21433_v38 = vld [vmem:[#allocation3] sm:$0xff]  ;;  %vm9385_vm2 = vcmp.lt.s32.totalorder %v21547_v60, 111 }
 0x1e0   :  { %1412 = vst.msk [vmem:[#allocation3 + $0x8] sm:$0xf] %vm1257_vm4, %v1410_v7  ;;  %1580 = vrot.lane.b32.xlu1 %v21433_v38, %s20953_s23  ;;  %v21439_v28 = vcombine.high %v21433_v38, %v21433_v38 }
 0x1e1   :  { %1478 = vst.msk [vmem:[#allocation3 + $0xc] sm:$0xf] %vm1246_vm3, %v1476_v11  ;;  %v1420_v48 = vpop.permute.xlu0 %1419  ;;  %v1516_v51 = vpop.permute.xlu1 %1515 }
 0x1e2   :  { %1422 = vst.msk [vmem:[#allocation3 + $0x8] sm:$0xf] %vm1268_vm5, %v1420_v48  ;;  %1582 = vrot.lane.b32.xlu0 %v21439_v28, %s20953_s23 }
 0x1e5   :  { %v1430_v55 = vpop.permute.xlu0 %1429  ;;  %v1486_v61 = vpop.permute.xlu1 %1485 }
 0x1e6   :  { %1432 = vst.msk [vmem:[#allocation3 + $0x8] sm:$0xf] %vm1279_vm6, %v1430_v55 }
 0x1e7   :  { %1488 = vst.msk [vmem:[#allocation3 + $0xc] sm:$0xf] %vm1257_vm4, %v1486_v61 }
 0x1e9   :  { %v1440_v1 = vpop.permute.xlu0 %1439  ;;  %v1496_v4 = vpop.permute.xlu1 %1495 }
 0x1ea   :  { %1442 = vst.msk [vmem:[#allocation3 + $0x8] sm:$0xf] %vm1290_vm7, %v1440_v1 }
 0x1eb   :  { %1498 = vst.msk [vmem:[#allocation3 + $0xc] sm:$0xf] %vm1268_vm5, %v1496_v4 }
 0x1ed   :  { %v1450_v6 = vpop.permute.xlu0 %1449  ;;  %v1506_v39 = vpop.permute.xlu1 %1505 }
 0x1ee   :  { %1452 = vst.msk [vmem:[#allocation3 + $0x8] sm:$0xf] %vm1301_vm8, %v1450_v6 }
 0x1ef   :  { %1508 = vst.msk [vmem:[#allocation3 + $0xc] sm:$0xf] %vm1279_vm6, %v1506_v39 }
 0x1f0   :  { %1518 = vst.msk [vmem:[#allocation3 + $0xc] sm:$0xf] %vm1290_vm7, %v1516_v51 }
 0x1f1   :  { %v1525_v14 = vpop.permute.xlu1 %1524  ;;  %v1615_v53 = vpop.permute.xlu0 %1614 }
 0x1f2   :  { %1527 = vst.msk [vmem:[#allocation3 + $0xc] sm:$0xf] %vm1301_vm8, %v1525_v14  ;;  %v1617_v15 = vsel %vm1616_vm11, %v1615_v53, 0 }
 0x1f3   :  { %v21564_v18 = vand.u32 4294901760, %v1617_v15 }
 0x1f5   :  { %v21567_v21 = vsub.f32 %v1617_v15, %v21564_v18 }
 0x1f7   :  { %v21575_v26 = vand.u32 4294901760, %v21567_v21 }
 0x1f9   :  { %v21452_v19 = vld [vmem:[#allocation3 + $0x8] sm:$0xff]  ;;  %v1702_v45 = vsub.f32 %v21567_v21, %v21575_v26 }
 0x1fa   :  { %1584 = vrot.lane.b32.xlu0 %v21452_v19, %s20953_s23  ;;  %v21458_v33 = vcombine.high %v21452_v19, %v21452_v19 }
 0x1fb   :  { %v1703_v35 = vand.u32 4294901760, %v1702_v45 }
 0x1fc   :  { %1586 = vrot.lane.b32.xlu1 %v21458_v33, %s20953_s23 }
 0x1fe   :  { %1546 = vrot.lane.b32.xlu0 %v21439_v28, %s20960_s10 }
 0x200   :  { %1544 = vrot.lane.b32.xlu1 %v21433_v38, %s20960_s10 }
 0x202   :  { %1548 = vrot.lane.b32.xlu0 %v21452_v19, %s20960_s10 }
 0x204   :  { %1550 = vrot.lane.b32.xlu1 %v21458_v33, %s20960_s10 }
 0x206   :  { %3506 = vrot.lane.b32.xlu0 %v21433_v38, %s20961_s13 }
 0x208   :  { %3541 = vrot.lane.b32.xlu1 %v3539_v41, %s20962_s14 }
 0x20a   :  { %3512 = vrot.lane.b32.xlu0 %v21458_v33, %s20961_s13 }
 0x20c   :  { %3508 = vrot.lane.b32.xlu1 %v21439_v28, %s20961_s13 }
 0x20e   :  { %4526 = vrot.lane.b32.xlu0 %v4524_v40, %s20963_s17 }
 0x210   :  { %3510 = vrot.lane.b32.xlu1 %v21452_v19, %s20961_s13 }
 0x212   :  { %4493 = vrot.lane.b32.xlu0 %v21439_v28, %s20964_s18 }
 0x214   :  { %4491 = vrot.lane.b32.xlu1 %v21433_v38, %s20964_s18 }
 0x216   :  { %4495 = vrot.lane.b32.xlu0 %v21452_v19, %s20964_s18 }
 0x218   :  { %4497 = vrot.lane.b32.xlu1 %v21458_v33, %s20964_s18 }
 0x21a   :  { %6457 = vrot.lane.b32.xlu0 %v6455_v42, %s20965_s1 }
 0x21c   :  { %5476 = vrot.lane.b32.xlu1 %v4524_v40, %s20954_s24 }
 0x21e   :  { %6426 = vrot.lane.b32.xlu0 %v21452_v19, %s20966_s21 }
 0x220   :  { %6424 = vrot.lane.b32.xlu1 %v21439_v28, %s20966_s21 }
 0x222   :  { %6428 = vrot.lane.b32.xlu0 %v21458_v33, %s20966_s21 }
 0x224   :  { %6422 = vrot.lane.b32.xlu1 %v21433_v38, %s20966_s21 }
 0x226   :  { %7409 = vrot.lane.b32.xlu0 %v21439_v28, %s20967_s25 }
 0x228   :  { %7442 = vrot.lane.b32.xlu1 %v7440_v44, %s20968_s27 }
 0x22a   :  { %7407 = vrot.lane.b32.xlu0 %v21433_v38, %s20967_s25 }
 0x22c   :  { %7411 = vrot.lane.b32.xlu1 %v21452_v19, %s20967_s25 }
 0x22e   :  { %8427 = vrot.lane.b32.xlu0 %v8425_v46, %s20969_s11  ;;  %v1561_v46 = vsub.s32 0, %v21545_v56 }
 0x230   :  { %7413 = vrot.lane.b32.xlu1 %v21458_v33, %s20967_s25  ;;  %v21627_v17 = vrot.slane %v21553_v58, %v1561_v46 }
 0x232   :  { %8396 = vrot.lane.b32.xlu0 %v21452_v19, %s20954_s24 }
 0x234   :  { %8394 = vrot.lane.b32.xlu1 %v21439_v28, %s20954_s24 }
 0x236   :  { %8398 = vrot.lane.b32.xlu0 %v21458_v33, %s20954_s24 }
 0x238   :  { %8392 = vrot.lane.b32.xlu1 %v21433_v38, %s20954_s24 }
 0x23a   :  { %9379 = vrot.lane.b32.xlu0 %v21439_v28, %s20970_s16 }
 0x23c   :  { %9412 = vrot.lane.b32.xlu1 %v9410_v16, %s20956_s26 }
 0x23e   :  { %9377 = vrot.lane.b32.xlu0 %v21433_v38, %s20970_s16 }
 0x240   :  { %9381 = vrot.lane.b32.xlu1 %v21452_v19, %s20970_s16 }
 0x244   :  { %9383 = vrot.lane.b32.xlu1 %v21458_v33, %s20970_s16 }
 0x252   :  { %v1581_v13 = vpop.permute.xlu1 %1580 }
 0x254   :  { %v1583_v27 = vpop.permute.xlu0 %1582 }
 0x255   :  { %v1591_v23 = vsel %vm1588_vm9, %v1581_v13, %v1583_v27 }
 0x256   :  { %v1610_v32 = vmul.f32 %v21557_v5, %v1591_v23 }
 0x258   :  { %v1624_v20 = vsel %vm1619_vm10, %v1610_v32, 0 }
 0x259   :  { %v1632_v9 = vand.u32 4294901760, %v1624_v20 }
 0x25b   :  { %1633 = vmatprep.subr.mxu1 %v1632_v9  ;;  %v1711_v22 = vsub.f32 %v1624_v20, %v1632_v9  ;;  %v2562_v20 = vsel %vm1616_vm11, %v21409_v34, 0 }
 0x25c   :  { %v21643_v15 = vand.u32 4294901760, %v2562_v20 }
 0x25d   :  { %v1712_v30 = vand.u32 4294901760, %v1711_v22 }
 0x25f   :  { %v1713_v49 = vsub.f32 %v1711_v22, %v1712_v30 }
 0x261   :  { %v1714_v54 = vand.u32 4294901760, %v1713_v49 }
 0x26c   :  { %v1585_v3 = vpop.permute.xlu0 %1584 }
 0x26d   :  { %v1590_v11 = vsel %vm1588_vm9, %v1583_v27, %v1585_v3 }
 0x26e   :  { %v1587_v31 = vpop.permute.xlu1 %1586  ;;  %v1611_v24 = vmul.f32 %v21605_v8, %v1590_v11 }
 0x26f   :  { %v1592_v43 = vsel %vm1588_vm9, %v1587_v31, %v1581_v13  ;;  %v1589_v7 = vsel %vm1588_vm9, %v1585_v3, %v1587_v31  ;;  %v21632_v13 = vrot.slane %v21572_v25, %v1561_v46  ;;  %v21649_v31 = vsub.f32 %v2562_v20, %v21643_v15 }
 0x270   :  { %v1609_v47 = vmul.f32 %v21578_v29, %v1592_v43  ;;  %v1612_v12 = vmul.f32 %v21600_v37, %v1589_v7  ;;  %v1627_v51 = vsel %vm1619_vm10, %v1611_v24, 0  ;;  %v1547_v16 = vpop.permute.xlu0 %1546 }
 0x271   :  { %v2099_v61 = vand.u32 4294901760, %v1627_v51  ;;  %v21652_v34 = vand.u32 4294901760, %v21649_v31 }
 0x272   :  { %v1621_v50 = vsel %vm1619_vm10, %v1609_v47, 0  ;;  %v1630_v48 = vsel %vm1619_vm10, %v1612_v12, 0  ;;  %v1545_v44 = vpop.permute.xlu1 %1544 }
 0x273   :  { %v1634_v52 = vand.u32 4294901760, %v1621_v50  ;;  %v2097_v55 = vand.u32 4294901760, %v1630_v48  ;;  %v2182_v4 = vsub.f32 %v1627_v51, %v2099_v61  ;;  %v1557_v53 = vsel %vm1554_vm12, %v1545_v44, %v1547_v16 }
 0x274   :  { %v1576_v27 = vmul.f32 %v21627_v17, %v1557_v53 }
 0x275   :  { %v1717_v57 = vsub.f32 %v1621_v50, %v1634_v52  ;;  %1635 = vmatpush1.msra.mxu1 %v1634_v52  ;;  %v2176_v1 = vsub.f32 %v1630_v48, %v2097_v55  ;;  %v2183_v39 = vand.u32 4294901760, %v2182_v4  ;;  %v2646_v50 = vsub.f32 %v21649_v31, %v21652_v34 }
 0x276   :  { %1704 = vmatmul.mubr.f32.vlgmr.msra.gmra.mrb[16].mxu1 %v1703_v35  ;;  %1715 = vmatprep.subr.mxu1 %v1714_v54  ;;  %v1551_v10 = vpop.permute.xlu1 %1550 }
 0x277   :  { %v1718_v59 = vand.u32 4294901760, %v1717_v57  ;;  %1784 = vmatprep.mubr.f32.mxu1 %v20959_v36  ;;  %v2177_v6 = vand.u32 4294901760, %v2176_v1  ;;  %v2184_v41 = vsub.f32 %v2182_v4, %v2183_v39  ;;  %v1558_v23 = vsel %vm1554_vm12, %v1551_v10, %v1545_v44 }
 0x278   :  { %v1575_v32 = vmul.f32 %v21632_v13, %v1558_v23  ;;  %v2647_v54 = vand.u32 4294901760, %v2646_v50  ;;  %v3521_v44 = vsub.s32 2, %v21545_v56 }
 0x279   :  { %v1719_v62 = vsub.f32 %v1717_v57, %v1718_v59  ;;  %v2178_v14 = vsub.f32 %v2176_v1, %v2177_v6  ;;  %v2185_v42 = vand.u32 4294901760, %v2184_v41 }
 0x27b   :  { %v1720_v63 = vand.u32 4294901760, %v1719_v62  ;;  %v2179_v40 = vand.u32 4294901760, %v2178_v14 }
 0x27d   :  { %1721 = vmatpush1.msra.mxu1 %v1720_v63  ;;  %v21669_v63 = vrot.slane %v21597_v2, %v1561_v46 }
 0x27e   :  { %1786 = vmatmul.mubr.f32.vlgmr.msra.gmra.mrb[16].mxu1 %v21564_v18  ;;  %1794 = vmatprep.subr.mxu1 %v1711_v22 }
 0x27f   :  { %1797 = vmatpush1.msra.mxu1 %v1717_v57  ;;  %1860 = vmatprep.mubr.f32.mxu1 %v20959_v36 }
 0x280   :  { %1870 = vmatprep.subr.mxu1 %v1632_v9 }
 0x286   :  { %1863 = vmatmul.mubr.f32.vlgmr.msra.gmra.mrb[16].mxu1 %v21567_v21 }
 0x287   :  { %1872 = vmatpush1.msra.mxu1 %v1634_v52  ;;  %1935 = vmatprep.mubr.f32.mxu1 %v20959_v36 }
 0x288   :  { %1948 = vmatprep.subr.mxu1 %v1712_v30 }
 0x28e   :  { %1939 = vmatmul.mubr.f32.vlgmr.msra.gmra.mrb[16].mxu1 %v21575_v26 }
 0x28f   :  { %1952 = vmatpush1.msra.mxu1 %v1718_v59  ;;  %2015 = vmatprep.mubr.f32.mxu1 %v20959_v36  ;;  %v1549_v59 = vpop.permute.xlu0 %1548 }
 0x290   :  { %2024 = vmatprep.subr.mxu1 %v1632_v9  ;;  %v2568_v9 = vsel %vm1619_vm10, %v1576_v27, 0  ;;  %v1555_v62 = vsel %vm1554_vm12, %v1549_v59, %v1551_v10  ;;  %v1556_v3 = vsel %vm1554_vm12, %v1547_v16, %v1549_v59  ;;  %v21691_v16 = vrot.slane %v21553_v58, %v3521_v44 }
 0x291   :  { %v2576_v22 = vand.u32 4294901760, %v2568_v9  ;;  %v1577_v11 = vmul.f32 %v21669_v63, %v1556_v3  ;;  %v21696_v27 = vrot.slane %v21572_v25, %v3521_v44 }
 0x293   :  { %v2655_v43 = vsub.f32 %v2568_v9, %v2576_v22  ;;  %v2571_v24 = vsel %vm1619_vm10, %v1577_v11, 0  ;;  %v21732_v11 = vrot.slane %v21597_v2, %v3521_v44 }
 0x294   :  { %v3043_v51 = vand.u32 4294901760, %v2571_v24 }
 0x295   :  { %v2656_v47 = vand.u32 4294901760, %v2655_v43 }
 0x296   :  { %2017 = vmatmul.mubr.f32.vlgmr.msra.gmra.mrb[16].mxu1 %v21564_v18 }
 0x297   :  { %2026 = vmatpush1.msra.mxu1 %v1634_v52  ;;  %2089 = vmatprep.mubr.f32.mxu1 %v20959_v36  ;;  %v2657_v49 = vsub.f32 %v2655_v43, %v2656_v47 }
 0x298   :  { %2098 = vmatprep.subr.mxu1 %v2097_v55 }
 0x29e   :  { %2091 = vmatmul.mubr.f32.vlgmr.msra.gmra.mrb[16].mxu1 %v21564_v18 }
 0x29f   :  { %2100 = vmatpush1.msra.mxu1 %v2099_v61  ;;  %2163 = vmatprep.mubr.f32.mxu1 %v20959_v36 }
 0x2a0   :  { %2180 = vmatprep.subr.mxu1 %v2179_v40  ;;  %v3542_v40 = vpop.permute.xlu1 %3541 }
 0x2a2   :  { %2169 = vmatmul.mubr.f32.vlgmr.msra.gmra.mrb[18].mxu1 %v1703_v35  ;;  %v2658_v35 = vand.u32 4294901760, %v2657_v49 }
 0x2a3   :  { %2186 = vmatpush1.msra.mxu1 %v2185_v42  ;;  %2249 = vmatprep.mubr.f32.mxu1 %v20959_v36  ;;  %v3507_v42 = vpop.permute.xlu0 %3506 }
 0x2a4   :  { %2259 = vmatprep.subr.mxu1 %v2176_v1 }
 0x2a7   :  { %v3513_v53 = vpop.permute.xlu0 %3512 }
 0x2a8   :  { %v3518_v23 = vsel %vm3514_vm13, %v3513_v53, %v3507_v42 }
 0x2a9   :  { %v3535_v20 = vmul.f32 %v21696_v27, %v3518_v23 }
 0x2aa   :  { %2251 = vmatmul.mubr.f32.vlgmr.msra.gmra.mrb[18].mxu1 %v21564_v18 }
 0x2ab   :  { %2262 = vmatpush1.msra.mxu1 %v2182_v4  ;;  %2325 = vmatprep.mubr.f32.mxu1 %v20959_v36 }
 0x2ac   :  { %2335 = vmatprep.subr.mxu1 %v2097_v55 }
 0x2b2   :  { %2328 = vmatmul.mubr.f32.vlgmr.msra.gmra.mrb[18].mxu1 %v21567_v21  ;;  %v2565_v21 = vsel %vm1619_vm10, %v1575_v32, 0 }
 0x2b3   :  { %2337 = vmatpush1.msra.mxu1 %v2099_v61  ;;  %2400 = vmatprep.mubr.f32.mxu1 %v20959_v36  ;;  %v2578_v30 = vand.u32 4294901760, %v2565_v21 }
 0x2b4   :  { %2413 = vmatprep.subr.mxu1 %v2177_v6 }
 0x2b5   :  { %v2661_v45 = vsub.f32 %v2565_v21, %v2578_v30  ;;  %v3546_v21 = vsel %vm1619_vm10, %v3535_v20, 0 }
 0x2ba   :  { %2404 = vmatmul.mubr.f32.vlgmr.msra.gmra.mrb[18].mxu1 %v21575_v26  ;;  %v2662_v26 = vand.u32 4294901760, %v2661_v45 }
 0x2bb   :  { %2417 = vmatpush1.msra.mxu1 %v2183_v39  ;;  %2480 = vmatprep.mubr.f32.mxu1 %v20959_v36 }
 0x2bc   :  { %2489 = vmatprep.subr.mxu1 %v2097_v55  ;;  %v2663_v52 = vsub.f32 %v2661_v45, %v2662_v26 }
 0x2be   :  { %v2664_v57 = vand.u32 4294901760, %v2663_v52 }
 0x2c2   :  { %2482 = vmatmul.mubr.f32.vlgmr.msra.gmra.mrb[18].mxu1 %v21564_v18 }
 0x2c3   :  { %2491 = vmatpush1.msra.mxu1 %v2099_v61  ;;  %2554 = vmatprep.mubr.f32.mxu1 %v20959_v36  ;;  %v3126_v61 = vsub.f32 %v2571_v24, %v3043_v51 }
 0x2c4   :  { %2577 = vmatprep.subr.mxu1 %v2576_v22 }
 0x2c5   :  { %v3127_v4 = vand.u32 4294901760, %v3126_v61 }
 0x2c7   :  { %v3128_v39 = vsub.f32 %v3126_v61, %v3127_v4 }
 0x2c9   :  { %v3129_v41 = vand.u32 4294901760, %v3128_v39 }
 0x2ca   :  { %2556 = vmatmul.mubr.f32.vlgmr.msra.gmra.mrb[18].mxu1 %v21564_v18  ;;  %v21664_v18 = vrot.slane %v21592_v0, %v1561_v46  ;;  %v3509_v46 = vpop.permute.xlu1 %3508 }
 0x2cb   :  { %2579 = vmatpush1.msra.mxu1 %v2578_v30  ;;  %2642 = vmatprep.mubr.f32.mxu1 %v20959_v36  ;;  %v3517_v10 = vsel %vm3514_vm13, %v3507_v42, %v3509_v46 }
 0x2cc   :  { %2659 = vmatprep.subr.mxu1 %v2658_v35  ;;  %v1578_v7 = vmul.f32 %v21664_v18, %v1555_v62  ;;  %v3536_v32 = vmul.f32 %v21691_v16, %v3517_v10  ;;  %v4506_v10 = vsub.s32 3, %v21545_v56 }
 0x2ce   :  { %2648 = vmatmul.mubr.f32.vlgmr.msra.gmra.mrb[16].mxu1 %v2647_v54  ;;  %v2574_v12 = vsel %vm1619_vm10, %v1578_v7, 0  ;;  %v3549_v9 = vsel %vm1619_vm10, %v3536_v32, 0  ;;  %v3511_v3 = vpop.permute.xlu1 %3510  ;;  %v21754_v32 = vrot.slane %v21553_v58, %v4506_v10 }
 0x2cf   :  { %2665 = vmatpush1.msra.mxu1 %v2664_v57  ;;  %2728 = vmatprep.mubr.f32.mxu1 %v20959_v36  ;;  %v3041_v48 = vand.u32 4294901760, %v2574_v12  ;;  %v3515_v7 = vsel %vm3514_vm13, %v3511_v3, %v3513_v53 }
 0x2d0   :  { %2738 = vmatprep.subr.mxu1 %v2655_v43  ;;  %v3559_v43 = vand.u32 4294901760, %v3546_v21 }
 0x2d1   :  { %v3120_v55 = vsub.f32 %v2574_v12, %v3041_v48  ;;  %v3516_v12 = vsel %vm3514_vm13, %v3509_v46, %v3511_v3  ;;  %v4527_v46 = vpop.permute.xlu0 %4526 }
 0x2d2   :  { %v4492_v53 = vpop.permute.xlu1 %4491 }
 0x2d3   :  { %v3121_v1 = vand.u32 4294901760, %v3120_v55 }
 0x2d5   :  { %v3122_v6 = vsub.f32 %v3120_v55, %v3121_v1  ;;  %v4494_v23 = vpop.permute.xlu0 %4493 }
 0x2d6   :  { %2730 = vmatmul.mubr.f32.vlgmr.msra.gmra.mrb[16].mxu1 %v21643_v15  ;;  %v4502_v20 = vsel %vm4499_vm14, %v4492_v53, %v4494_v23 }
 0x2d7   :  { %2741 = vmatpush1.msra.mxu1 %v2661_v45  ;;  %2804 = vmatprep.mubr.f32.mxu1 %v20959_v36  ;;  %v3123_v14 = vand.u32 4294901760, %v3122_v6 }
 0x2d8   :  { %2814 = vmatprep.subr.mxu1 %v2576_v22 }
 0x2de   :  { %2807 = vmatmul.mubr.f32.vlgmr.msra.gmra.mrb[16].mxu1 %v21649_v31 }
 0x2df   :  { %2816 = vmatpush1.msra.mxu1 %v2578_v30  ;;  %2879 = vmatprep.mubr.f32.mxu1 %v20959_v36 }
 0x2e0   :  { %2892 = vmatprep.subr.mxu1 %v2656_v47 }
 0x2e6   :  { %2883 = vmatmul.mubr.f32.vlgmr.msra.gmra.mrb[16].mxu1 %v21652_v34 }
 0x2e7   :  { %2896 = vmatpush1.msra.mxu1 %v2662_v26  ;;  %2959 = vmatprep.mubr.f32.mxu1 %v20959_v36  ;;  %v3642_v26 = vsub.f32 %v3546_v21, %v3559_v43  ;;  %v4521_v21 = vmul.f32 %v21754_v32, %v4502_v20 }
 0x2e8   :  { %2968 = vmatprep.subr.mxu1 %v2576_v22  ;;  %v3543_v22 = vsel %vm1616_vm11, %v3542_v40, 0 }
 0x2e9   :  { %v3643_v50 = vand.u32 4294901760, %v3642_v26 }
 0x2ee   :  { %2961 = vmatmul.mubr.f32.vlgmr.msra.gmra.mrb[16].mxu1 %v21643_v15 }
 0x2ef   :  { %2970 = vmatpush1.msra.mxu1 %v2578_v30  ;;  %3033 = vmatprep.mubr.f32.mxu1 %v20959_v36  ;;  %v3557_v30 = vand.u32 4294901760, %v3549_v9 }
 0x2f0   :  { %3042 = vmatprep.subr.mxu1 %v3041_v48 }
 0x2f1   :  { %v3636_v45 = vsub.f32 %v3549_v9, %v3557_v30  ;;  %v4498_v9 = vpop.permute.xlu1 %4497 }
 0x2f3   :  { %v3637_v49 = vand.u32 4294901760, %v3636_v45 }
 0x2f5   :  { %v3638_v52 = vsub.f32 %v3636_v45, %v3637_v49 }
 0x2f6   :  { %3035 = vmatmul.mubr.f32.vlgmr.msra.gmra.mrb[16].mxu1 %v21643_v15 }
 0x2f7   :  { %3044 = vmatpush1.msra.mxu1 %v3043_v51  ;;  %3107 = vmatprep.mubr.f32.mxu1 %v20959_v36  ;;  %v3639_v57 = vand.u32 4294901760, %v3638_v52 }
 0x2f8   :  { %3124 = vmatprep.subr.mxu1 %v3123_v14 }
 0x2fa   :  { %3113 = vmatmul.mubr.f32.vlgmr.msra.gmra.mrb[18].mxu1 %v2647_v54  ;;  %v3644_v54 = vsub.f32 %v3642_v26, %v3643_v50 }
 0x2fb   :  { %3130 = vmatpush1.msra.mxu1 %v3129_v41  ;;  %3193 = vmatprep.mubr.f32.mxu1 %v20959_v36 }
 0x2fc   :  { %3203 = vmatprep.subr.mxu1 %v3120_v55  ;;  %v3645_v62 = vand.u32 4294901760, %v3644_v54 }
 0x302   :  { %3195 = vmatmul.mubr.f32.vlgmr.msra.gmra.mrb[18].mxu1 %v21643_v15 }
 0x303   :  { %3206 = vmatpush1.msra.mxu1 %v3126_v61  ;;  %3269 = vmatprep.mubr.f32.mxu1 %v20959_v36 }
 0x304   :  { %3279 = vmatprep.subr.mxu1 %v3041_v48 }
 0x30a   :  { %3272 = vmatmul.mubr.f32.vlgmr.msra.gmra.mrb[18].mxu1 %v21649_v31  ;;  %v21709_v31 = vand.u32 4294901760, %v3543_v22 }
 0x30b   :  { %3281 = vmatpush1.msra.mxu1 %v3043_v51  ;;  %3344 = vmatprep.mubr.f32.mxu1 %v20959_v36 }
 0x30c   :  { %3357 = vmatprep.subr.mxu1 %v3121_v1  ;;  %v21712_v47 = vsub.f32 %v3543_v22, %v21709_v31  ;;  %v21759_v22 = vrot.slane %v21572_v25, %v4506_v10 }
 0x312   :  { %3348 = vmatmul.mubr.f32.vlgmr.msra.gmra.mrb[18].mxu1 %v21652_v34  ;;  %v21717_v34 = vand.u32 4294901760, %v21712_v47 }
 0x313   :  { %3361 = vmatpush1.msra.mxu1 %v3127_v4  ;;  %3424 = vmatprep.mubr.f32.mxu1 %v20959_v36 }
 0x314   :  { %3433 = vmatprep.subr.mxu1 %v3041_v48  ;;  %v3627_v35 = vsub.f32 %v21712_v47, %v21717_v34  ;;  %v3537_v48 = vmul.f32 %v21732_v11, %v3516_v12 }
 0x316   :  { %v3628_v59 = vand.u32 4294901760, %v3627_v35  ;;  %v3552_v55 = vsel %vm1619_vm10, %v3537_v48, 0 }
 0x317   :  { %v4024_v1 = vand.u32 4294901760, %v3552_v55 }
 0x319   :  { %v4107_v6 = vsub.f32 %v3552_v55, %v4024_v1  ;;  %v4496_v55 = vpop.permute.xlu0 %4495 }
 0x31a   :  { %3426 = vmatmul.mubr.f32.vlgmr.msra.gmra.mrb[18].mxu1 %v21643_v15 }
 0x31b   :  { %3435 = vmatpush1.msra.mxu1 %v3043_v51  ;;  %3498 = vmatprep.mubr.f32.mxu1 %v20959_v36  ;;  %v4108_v14 = vand.u32 4294901760, %v4107_v6 }
 0x31c   :  { %3558 = vmatprep.subr.mxu1 %v3557_v30 }
 0x31d   :  { %v4109_v40 = vsub.f32 %v4107_v6, %v4108_v14 }
 0x322   :  { %3500 = vmatmul.mubr.f32.vlgmr.msra.gmra.mrb[18].mxu1 %v21643_v15  ;;  %v21727_v15 = vrot.slane %v21592_v0, %v3521_v44  ;;  %v4110_v44 = vand.u32 4294901760, %v4109_v40 }
 0x323   :  { %3560 = vmatpush1.msra.mxu1 %v3559_v43  ;;  %3623 = vmatprep.mubr.f32.mxu1 %v20959_v36 }
 0x324   :  { %3640 = vmatprep.subr.mxu1 %v3639_v57  ;;  %v3538_v24 = vmul.f32 %v21727_v15, %v3515_v7 }
 0x326   :  { %3629 = vmatmul.mubr.f32.vlgmr.msra.gmra.mrb[16].mxu1 %v3628_v59  ;;  %v3555_v51 = vsel %vm1619_vm10, %v3538_v24, 0 }
 0x327   :  { %3646 = vmatpush1.msra.mxu1 %v3645_v62  ;;  %3709 = vmatprep.mubr.f32.mxu1 %v20959_v36  ;;  %v4022_v61 = vand.u32 4294901760, %v3555_v51 }
 0x328   :  { %3719 = vmatprep.subr.mxu1 %v3636_v45  ;;  %v4534_v45 = vsel %vm1619_vm10, %v4521_v21, 0 }
 0x329   :  { %v4101_v4 = vsub.f32 %v3555_v51, %v4022_v61 }
 0x32b   :  { %v4102_v39 = vand.u32 4294901760, %v4101_v4 }
 0x32d   :  { %v4103_v41 = vsub.f32 %v4101_v4, %v4102_v39 }
 0x32e   :  { %3711 = vmatmul.mubr.f32.vlgmr.msra.gmra.mrb[16].mxu1 %v21709_v31 }
 0x32f   :  { %3722 = vmatpush1.msra.mxu1 %v3642_v26  ;;  %3785 = vmatprep.mubr.f32.mxu1 %v20959_v36  ;;  %v4104_v42 = vand.u32 4294901760, %v4103_v41  ;;  %v4528_v26 = vsel %vm1616_vm11, %v4527_v46, 0 }
 0x330   :  { %3795 = vmatprep.subr.mxu1 %v3557_v30 }
 0x336   :  { %3788 = vmatmul.mubr.f32.vlgmr.msra.gmra.mrb[16].mxu1 %v21712_v47 }
 0x337   :  { %3797 = vmatpush1.msra.mxu1 %v3559_v43  ;;  %3860 = vmatprep.mubr.f32.mxu1 %v20959_v36 }
 0x338   :  { %3873 = vmatprep.subr.mxu1 %v3637_v49  ;;  %v4542_v49 = vand.u32 4294901760, %v4534_v45 }
 0x33a   :  { %v4621_v35 = vsub.f32 %v4534_v45, %v4542_v49 }
 0x33e   :  { %3864 = vmatmul.mubr.f32.vlgmr.msra.gmra.mrb[16].mxu1 %v21717_v34 }
 0x33f   :  { %3877 = vmatpush1.msra.mxu1 %v3643_v50  ;;  %3940 = vmatprep.mubr.f32.mxu1 %v20959_v36 }
 0x340   :  { %3949 = vmatprep.subr.mxu1 %v3557_v30  ;;  %v4503_v30 = vsel %vm4499_vm14, %v4498_v9, %v4492_v53 }
 0x346   :  { %3942 = vmatmul.mubr.f32.vlgmr.msra.gmra.mrb[16].mxu1 %v21709_v31 }
 0x347   :  { %3951 = vmatpush1.msra.mxu1 %v3559_v43  ;;  %4014 = vmatprep.mubr.f32.mxu1 %v20959_v36  ;;  %v4520_v43 = vmul.f32 %v21759_v22, %v4503_v30  ;;  %v5482_v30 = vsel %vm1619_vm10, %v21439_v28, 0 }
 0x348   :  { %4023 = vmatprep.subr.mxu1 %v4022_v61 }
 0x349   :  { %v4531_v50 = vsel %vm1619_vm10, %v4520_v43, 0  ;;  %v5477_v43 = vpop.permute.xlu1 %5476 }
 0x34a   :  { %v4544_v52 = vand.u32 4294901760, %v4531_v50  ;;  %v5478_v45 = vsel %vm1616_vm11, %v5477_v43, 0 }
 0x34c   :  { %v4627_v57 = vsub.f32 %v4531_v50, %v4544_v52  ;;  %v21823_v50 = vand.u32 4294901760, %v5478_v45 }
 0x34e   :  { %4016 = vmatmul.mubr.f32.vlgmr.msra.gmra.mrb[16].mxu1 %v21709_v31  ;;  %v4628_v62 = vand.u32 4294901760, %v4627_v57 }
 0x34f   :  { %4025 = vmatpush1.msra.mxu1 %v4024_v1  ;;  %4088 = vmatprep.mubr.f32.mxu1 %v20959_v36 }
 0x350   :  { %4105 = vmatprep.subr.mxu1 %v4104_v42  ;;  %v4629_v12 = vsub.f32 %v4627_v57, %v4628_v62 }
 0x352   :  { %4094 = vmatmul.mubr.f32.vlgmr.msra.gmra.mrb[18].mxu1 %v3628_v59  ;;  %v4622_v59 = vand.u32 4294901760, %v4621_v35  ;;  %v4630_v51 = vand.u32 4294901760, %v4629_v12 }
 0x353   :  { %4111 = vmatpush1.msra.mxu1 %v4110_v44  ;;  %4174 = vmatprep.mubr.f32.mxu1 %v20959_v36 }
 0x354   :  { %4184 = vmatprep.subr.mxu1 %v4101_v4  ;;  %v4623_v3 = vsub.f32 %v4621_v35, %v4622_v59  ;;  %v4501_v4 = vsel %vm4499_vm14, %v4494_v23, %v4496_v55 }
 0x356   :  { %v4624_v24 = vand.u32 4294901760, %v4623_v3 }
 0x35a   :  { %4176 = vmatmul.mubr.f32.vlgmr.msra.gmra.mrb[18].mxu1 %v21709_v31 }
 0x35b   :  { %4187 = vmatpush1.msra.mxu1 %v4107_v6  ;;  %4250 = vmatprep.mubr.f32.mxu1 %v20959_v36 }
 0x35c   :  { %4260 = vmatprep.subr.mxu1 %v4022_v61 }
 0x362   :  { %4253 = vmatmul.mubr.f32.vlgmr.msra.gmra.mrb[18].mxu1 %v21712_v47  ;;  %v21772_v47 = vand.u32 4294901760, %v4528_v26 }
 0x363   :  { %4262 = vmatpush1.msra.mxu1 %v4024_v1  ;;  %4325 = vmatprep.mubr.f32.mxu1 %v20959_v36 }
 0x364   :  { %4338 = vmatprep.subr.mxu1 %v4102_v39  ;;  %v21775_v54 = vsub.f32 %v4528_v26, %v21772_v47  ;;  %v5488_v26 = vand.u32 4294901760, %v5482_v30 }
 0x36a   :  { %4329 = vmatmul.mubr.f32.vlgmr.msra.gmra.mrb[18].mxu1 %v21717_v34  ;;  %v21780_v34 = vand.u32 4294901760, %v21775_v54 }
 0x36b   :  { %4342 = vmatpush1.msra.mxu1 %v4108_v14  ;;  %4405 = vmatprep.mubr.f32.mxu1 %v20959_v36 }
 0x36c   :  { %4414 = vmatprep.subr.mxu1 %v4022_v61  ;;  %v4612_v7 = vsub.f32 %v21775_v54, %v21780_v34  ;;  %v4500_v61 = vsel %vm4499_vm14, %v4496_v55, %v4498_v9 }
 0x36e   :  { %v4613_v48 = vand.u32 4294901760, %v4612_v7 }
 0x372   :  { %4407 = vmatmul.mubr.f32.vlgmr.msra.gmra.mrb[18].mxu1 %v21709_v31 }
 0x373   :  { %4416 = vmatpush1.msra.mxu1 %v4024_v1  ;;  %4479 = vmatprep.mubr.f32.mxu1 %v20959_v36  ;;  %v21795_v1 = vrot.slane %v21597_v2, %v4506_v10 }
 0x374   :  { %4543 = vmatprep.subr.mxu1 %v4542_v49 }
 0x375   :  { %v4522_v39 = vmul.f32 %v21795_v1, %v4501_v4 }
 0x377   :  { %v4537_v41 = vsel %vm1619_vm10, %v4522_v39, 0 }
 0x378   :  { %v5009_v42 = vand.u32 4294901760, %v4537_v41 }
 0x37a   :  { %4481 = vmatmul.mubr.f32.vlgmr.msra.gmra.mrb[18].mxu1 %v21709_v31  ;;  %v21790_v31 = vrot.slane %v21592_v0, %v4506_v10  ;;  %v5092_v46 = vsub.f32 %v4537_v41, %v5009_v42 }
 0x37b   :  { %4545 = vmatpush1.msra.mxu1 %v4544_v52  ;;  %4608 = vmatprep.mubr.f32.mxu1 %v20959_v36 }
 0x37c   :  { %4625 = vmatprep.subr.mxu1 %v4624_v24  ;;  %v4523_v6 = vmul.f32 %v21790_v31, %v4500_v61  ;;  %v5093_v10 = vand.u32 4294901760, %v5092_v46 }
 0x37e   :  { %4614 = vmatmul.mubr.f32.vlgmr.msra.gmra.mrb[16].mxu1 %v4613_v48  ;;  %v4540_v14 = vsel %vm1619_vm10, %v4523_v6, 0  ;;  %v5094_v20 = vsub.f32 %v5092_v46, %v5093_v10 }
 0x37f   :  { %4631 = vmatpush1.msra.mxu1 %v4630_v51  ;;  %4694 = vmatprep.mubr.f32.mxu1 %v20959_v36  ;;  %v5007_v40 = vand.u32 4294901760, %v4540_v14  ;;  %v5484_v51 = vsel %vm1619_vm10, %v21452_v19, 0 }
 0x380   :  { %4704 = vmatprep.subr.mxu1 %v4621_v35  ;;  %v5095_v21 = vand.u32 4294901760, %v5094_v20  ;;  %v5567_v35 = vsub.f32 %v5482_v30, %v5488_v26  ;;  %v5955_v55 = vand.u32 4294901760, %v5484_v51 }
 0x381   :  { %v5086_v44 = vsub.f32 %v4540_v14, %v5007_v40 }
 0x382   :  { %v6038_v4 = vsub.f32 %v5484_v51, %v5955_v55 }
 0x383   :  { %v5087_v53 = vand.u32 4294901760, %v5086_v44 }
 0x385   :  { %v5088_v23 = vsub.f32 %v5086_v44, %v5087_v53 }
 0x386   :  { %4696 = vmatmul.mubr.f32.vlgmr.msra.gmra.mrb[16].mxu1 %v21772_v47 }
 0x387   :  { %4707 = vmatpush1.msra.mxu1 %v4627_v57  ;;  %4770 = vmatprep.mubr.f32.mxu1 %v20959_v36  ;;  %v5089_v9 = vand.u32 4294901760, %v5088_v23  ;;  %v5568_v57 = vand.u32 4294901760, %v5567_v35 }
 0x388   :  { %4780 = vmatprep.subr.mxu1 %v4542_v49 }
 0x38e   :  { %4773 = vmatmul.mubr.f32.vlgmr.msra.gmra.mrb[16].mxu1 %v21775_v54 }
 0x38f   :  { %4782 = vmatpush1.msra.mxu1 %v4544_v52  ;;  %4845 = vmatprep.mubr.f32.mxu1 %v20959_v36 }
 0x390   :  { %4858 = vmatprep.subr.mxu1 %v4622_v59 }
 0x396   :  { %4849 = vmatmul.mubr.f32.vlgmr.msra.gmra.mrb[16].mxu1 %v21780_v34 }
 0x397   :  { %4862 = vmatpush1.msra.mxu1 %v4628_v62  ;;  %4925 = vmatprep.mubr.f32.mxu1 %v20959_v36 }
 0x398   :  { %4934 = vmatprep.subr.mxu1 %v4542_v49  ;;  %v5480_v49 = vsel %vm1619_vm10, %v21433_v38, 0 }
 0x39e   :  { %4927 = vmatmul.mubr.f32.vlgmr.msra.gmra.mrb[16].mxu1 %v21772_v47 }
 0x39f   :  { %4936 = vmatpush1.msra.mxu1 %v4544_v52  ;;  %4999 = vmatprep.mubr.f32.mxu1 %v20959_v36  ;;  %v5490_v52 = vand.u32 4294901760, %v5480_v49 }
 0x3a0   :  { %5008 = vmatprep.subr.mxu1 %v5007_v40 }
 0x3a1   :  { %v5573_v28 = vsub.f32 %v5480_v49, %v5490_v52 }
 0x3a3   :  { %v5574_v59 = vand.u32 4294901760, %v5573_v28 }
 0x3a5   :  { %v5575_v3 = vsub.f32 %v5573_v28, %v5574_v59 }
 0x3a6   :  { %5001 = vmatmul.mubr.f32.vlgmr.msra.gmra.mrb[16].mxu1 %v21772_v47 }
 0x3a7   :  { %5010 = vmatpush1.msra.mxu1 %v5009_v42  ;;  %5073 = vmatprep.mubr.f32.mxu1 %v20959_v36  ;;  %v5576_v24 = vand.u32 4294901760, %v5575_v3 }
 0x3a8   :  { %5090 = vmatprep.subr.mxu1 %v5089_v9 }
 0x3aa   :  { %5079 = vmatmul.mubr.f32.vlgmr.msra.gmra.mrb[18].mxu1 %v4613_v48 }
 0x3ab   :  { %5096 = vmatpush1.msra.mxu1 %v5095_v21  ;;  %5159 = vmatprep.mubr.f32.mxu1 %v20959_v36 }
 0x3ac   :  { %5169 = vmatprep.subr.mxu1 %v5086_v44  ;;  %v6437_v44 = vsub.s32 5, %v21545_v56 }
 0x3ae   :  { %v21863_v20 = vrot.slane %v21572_v25, %v6437_v44 }
 0x3b2   :  { %5161 = vmatmul.mubr.f32.vlgmr.msra.gmra.mrb[18].mxu1 %v21772_v47 }
 0x3b3   :  { %5172 = vmatpush1.msra.mxu1 %v5092_v46  ;;  %5235 = vmatprep.mubr.f32.mxu1 %v20959_v36 }
 0x3b4   :  { %5245 = vmatprep.subr.mxu1 %v5007_v40 }
 0x3ba   :  { %5238 = vmatmul.mubr.f32.vlgmr.msra.gmra.mrb[18].mxu1 %v21775_v54  ;;  %v21826_v54 = vsub.f32 %v5478_v45, %v21823_v50 }
 0x3bb   :  { %5247 = vmatpush1.msra.mxu1 %v5009_v42  ;;  %5310 = vmatprep.mubr.f32.mxu1 %v20959_v36 }
 0x3bc   :  { %5323 = vmatprep.subr.mxu1 %v5087_v53  ;;  %v21831_v38 = vand.u32 4294901760, %v21826_v54  ;;  %v21858_v53 = vrot.slane %v21553_v58, %v6437_v44 }
 0x3be   :  { %v5558_v62 = vsub.f32 %v21826_v54, %v21831_v38 }
 0x3c0   :  { %v5559_v12 = vand.u32 4294901760, %v5558_v62 }
 0x3c2   :  { %5314 = vmatmul.mubr.f32.vlgmr.msra.gmra.mrb[18].mxu1 %v21780_v34  ;;  %v5569_v34 = vsub.f32 %v5567_v35, %v5568_v57 }
 0x3c3   :  { %5327 = vmatpush1.msra.mxu1 %v5093_v10  ;;  %5390 = vmatprep.mubr.f32.mxu1 %v20959_v36 }
 0x3c4   :  { %5399 = vmatprep.subr.mxu1 %v5007_v40  ;;  %v5570_v7 = vand.u32 4294901760, %v5569_v34  ;;  %v6458_v40 = vpop.permute.xlu0 %6457 }
 0x3c5   :  { %v6459_v43 = vsel %vm1616_vm11, %v6458_v40, 0 }
 0x3c8   :  { %v6427_v46 = vpop.permute.xlu0 %6426 }
 0x3ca   :  { %5392 = vmatmul.mubr.f32.vlgmr.msra.gmra.mrb[18].mxu1 %v21772_v47 }
 0x3cb   :  { %5401 = vmatpush1.msra.mxu1 %v5009_v42  ;;  %5464 = vmatprep.mubr.f32.mxu1 %v20959_v36  ;;  %v6425_v42 = vpop.permute.xlu1 %6424 }
 0x3cc   :  { %5489 = vmatprep.subr.mxu1 %v5488_v26  ;;  %v6432_v10 = vsel %vm6430_vm15, %v6425_v42, %v6427_v46 }
 0x3cd   :  { %v6452_v9 = vmul.f32 %v21858_v53, %v6432_v10 }
 0x3cf   :  { %v6423_v23 = vpop.permute.xlu1 %6422  ;;  %v6465_v30 = vsel %vm1619_vm10, %v6452_v9, 0 }
 0x3d0   :  { %v6433_v21 = vsel %vm6430_vm15, %v6423_v23, %v6425_v42  ;;  %v6473_v45 = vand.u32 4294901760, %v6465_v30 }
 0x3d1   :  { %v6451_v58 = vmul.f32 %v21863_v20, %v6433_v21  ;;  %v21923_v21 = vld [vmem:[%s22726_s2 + $0x8] sm:$0xff] }
 0x3d2   :  { %5466 = vmatmul.mubr.f32.vlgmr.msra.gmra.mrb[18].mxu1 %v21772_v47  ;;  %v5486_v47 = vsel %vm1619_vm10, %v21458_v33, 0  ;;  %v6039_v33 = vand.u32 4294901760, %v6038_v4 }
 0x3d3   :  { %5491 = vmatpush1.msra.mxu1 %v5490_v52  ;;  %5554 = vmatprep.mubr.f32.mxu1 %v20959_v36  ;;  %v5953_v48 = vand.u32 4294901760, %v5486_v47  ;;  %v6462_v25 = vsel %vm1619_vm10, %v6451_v58, 0 }
 0x3d4   :  { %5571 = vmatprep.subr.mxu1 %v5570_v7  ;;  %v6040_v14 = vsub.f32 %v6038_v4, %v6039_v33  ;;  %v6475_v49 = vand.u32 4294901760, %v6462_v25 }
 0x3d5   :  { %v6032_v61 = vsub.f32 %v5486_v47, %v5953_v48 }
 0x3d6   :  { %5560 = vmatmul.mubr.f32.vlgmr.msra.gmra.mrb[16].mxu1 %v5559_v12  ;;  %v6041_v41 = vand.u32 4294901760, %v6040_v14 }
 0x3d7   :  { %5577 = vmatpush1.msra.mxu1 %v5576_v24  ;;  %5640 = vmatprep.mubr.f32.mxu1 %v20959_v36  ;;  %v6033_v6 = vand.u32 4294901760, %v6032_v61  ;;  %v6429_v24 = vpop.permute.xlu0 %6428 }
 0x3d8   :  { %5650 = vmatprep.subr.mxu1 %v5567_v35  ;;  %v6434_v47 = vsel %vm6430_vm15, %v6429_v24, %v6423_v23  ;;  %v6431_v51 = vsel %vm6430_vm15, %v6427_v46, %v6429_v24  ;;  %v7443_v46 = vpop.permute.xlu1 %7442  ;;  %v7422_v23 = vsub.s32 6, %v21545_v56 }
 0x3d9   :  { %v6034_v39 = vsub.f32 %v6032_v61, %v6033_v6 }
 0x3da   :  { %v21926_v58 = vrot.slane %v21923_v21, %v7422_v23 }
 0x3db   :  { %v6035_v19 = vand.u32 4294901760, %v6034_v39  ;;  %v7410_v10 = vpop.permute.xlu0 %7409 }
 0x3dc   :  { %v7412_v9 = vpop.permute.xlu1 %7411 }
 0x3de   :  { %5642 = vmatmul.mubr.f32.vlgmr.msra.gmra.mrb[16].mxu1 %v21823_v50 }
 0x3df   :  { %5653 = vmatpush1.msra.mxu1 %v5573_v28  ;;  %5716 = vmatprep.mubr.f32.mxu1 %v20959_v36 }
 0x3e0   :  { %5726 = vmatprep.subr.mxu1 %v5488_v26 }
 0x3e6   :  { %5719 = vmatmul.mubr.f32.vlgmr.msra.gmra.mrb[16].mxu1 %v21826_v54 }
 0x3e7   :  { %5728 = vmatpush1.msra.mxu1 %v5490_v52  ;;  %5791 = vmatprep.mubr.f32.mxu1 %v20959_v36 }
 0x3e8   :  { %5804 = vmatprep.subr.mxu1 %v5568_v57 }
 0x3ee   :  { %5795 = vmatmul.mubr.f32.vlgmr.msra.gmra.mrb[16].mxu1 %v21831_v38 }
 0x3ef   :  { %5808 = vmatpush1.msra.mxu1 %v5574_v59  ;;  %5871 = vmatprep.mubr.f32.mxu1 %v20959_v36 }
 0x3f0   :  { %5880 = vmatprep.subr.mxu1 %v5488_v26  ;;  %v21876_v26 = vand.u32 4294901760, %v6459_v43 }
 0x3f2   :  { %v21879_v35 = vsub.f32 %v6459_v43, %v21876_v26  ;;  %v7417_v43 = vsel %vm7415_vm0, %v7410_v10, %v7412_v9 }
 0x3f4   :  { %v21884_v57 = vand.u32 4294901760, %v21879_v35 }
 0x3f6   :  { %5873 = vmatmul.mubr.f32.vlgmr.msra.gmra.mrb[16].mxu1 %v21823_v50  ;;  %v6543_v34 = vsub.f32 %v21879_v35, %v21884_v57 }
 0x3f7   :  { %5882 = vmatpush1.msra.mxu1 %v5490_v52  ;;  %5945 = vmatprep.mubr.f32.mxu1 %v20959_v36  ;;  %v6552_v52 = vsub.f32 %v6465_v30, %v6473_v45  ;;  %v7408_v30 = vpop.permute.xlu0 %7407 }
 0x3f8   :  { %5954 = vmatprep.subr.mxu1 %v5953_v48  ;;  %v6544_v7 = vand.u32 4294901760, %v6543_v34 }
 0x3f9   :  { %v6553_v28 = vand.u32 4294901760, %v6552_v52 }
 0x3fb   :  { %v6554_v59 = vsub.f32 %v6552_v52, %v6553_v28 }
 0x3fd   :  { %v6555_v3 = vand.u32 4294901760, %v6554_v59 }
 0x3fe   :  { %5947 = vmatmul.mubr.f32.vlgmr.msra.gmra.mrb[16].mxu1 %v21823_v50 }
 0x3ff   :  { %5956 = vmatpush1.msra.mxu1 %v5955_v55  ;;  %6019 = vmatprep.mubr.f32.mxu1 %v20959_v36 }
 0x400   :  { %6036 = vmatprep.subr.mxu1 %v6035_v19 }
 0x402   :  { %6025 = vmatmul.mubr.f32.vlgmr.msra.gmra.mrb[18].mxu1 %v5559_v12 }
 0x403   :  { %6042 = vmatpush1.msra.mxu1 %v6041_v41  ;;  %6105 = vmatprep.mubr.f32.mxu1 %v20959_v36 }
 0x404   :  { %6115 = vmatprep.subr.mxu1 %v6032_v61 }
 0x40a   :  { %6107 = vmatmul.mubr.f32.vlgmr.msra.gmra.mrb[18].mxu1 %v21823_v50 }
 0x40b   :  { %6118 = vmatpush1.msra.mxu1 %v6038_v4  ;;  %6181 = vmatprep.mubr.f32.mxu1 %v20959_v36 }
 0x40c   :  { %6191 = vmatprep.subr.mxu1 %v5953_v48 }
 0x412   :  { %6184 = vmatmul.mubr.f32.vlgmr.msra.gmra.mrb[18].mxu1 %v21826_v54  ;;  %v6558_v54 = vsub.f32 %v6462_v25, %v6475_v49 }
 0x413   :  { %6193 = vmatpush1.msra.mxu1 %v5955_v55  ;;  %6256 = vmatprep.mubr.f32.mxu1 %v20959_v36 }
 0x414   :  { %6269 = vmatprep.subr.mxu1 %v6033_v6 }
 0x41a   :  { %6260 = vmatmul.mubr.f32.vlgmr.msra.gmra.mrb[18].mxu1 %v21831_v38  ;;  %v6559_v38 = vand.u32 4294901760, %v6558_v54 }
 0x41b   :  { %6273 = vmatpush1.msra.mxu1 %v6039_v33  ;;  %6336 = vmatprep.mubr.f32.mxu1 %v20959_v36 }
 0x41c   :  { %6345 = vmatprep.subr.mxu1 %v5953_v48  ;;  %v6560_v62 = vsub.f32 %v6558_v54, %v6559_v38  ;;  %v21899_v48 = vrot.slane %v21597_v2, %v6437_v44 }
 0x41e   :  { %v6561_v12 = vand.u32 4294901760, %v6560_v62 }
 0x422   :  { %6338 = vmatmul.mubr.f32.vlgmr.msra.gmra.mrb[18].mxu1 %v21823_v50 }
 0x423   :  { %6347 = vmatpush1.msra.mxu1 %v5955_v55  ;;  %6410 = vmatprep.mubr.f32.mxu1 %v20959_v36 }
 0x424   :  { %6474 = vmatprep.subr.mxu1 %v6473_v45 }
 0x42a   :  { %6412 = vmatmul.mubr.f32.vlgmr.msra.gmra.mrb[18].mxu1 %v21823_v50  ;;  %v21894_v50 = vrot.slane %v21592_v0, %v6437_v44  ;;  %v6453_v0 = vmul.f32 %v21899_v48, %v6431_v51 }
 0x42b   :  { %6476 = vmatpush1.msra.mxu1 %v6475_v49  ;;  %6539 = vmatprep.mubr.f32.mxu1 %v20959_v36 }
 0x42c   :  { %6556 = vmatprep.subr.mxu1 %v6555_v3  ;;  %v6454_v55 = vmul.f32 %v21894_v50, %v6434_v47  ;;  %v6468_v4 = vsel %vm1619_vm10, %v6453_v0, 0 }
 0x42d   :  { %v6940_v2 = vand.u32 4294901760, %v6468_v4 }
 0x42e   :  { %6545 = vmatmul.mubr.f32.vlgmr.msra.gmra.mrb[16].mxu1 %v6544_v7  ;;  %v6471_v61 = vsel %vm1619_vm10, %v6454_v55, 0 }
 0x42f   :  { %6562 = vmatpush1.msra.mxu1 %v6561_v12  ;;  %6625 = vmatprep.mubr.f32.mxu1 %v20959_v36  ;;  %v6938_v6 = vand.u32 4294901760, %v6471_v61  ;;  %v7023_v39 = vsub.f32 %v6468_v4, %v6940_v2 }
 0x430   :  { %6635 = vmatprep.subr.mxu1 %v6552_v52  ;;  %v7437_v52 = vmul.f32 %v21926_v58, %v7417_v43 }
 0x431   :  { %v7017_v33 = vsub.f32 %v6471_v61, %v6938_v6  ;;  %v7024_v19 = vand.u32 4294901760, %v7023_v39 }
 0x433   :  { %v7018_v14 = vand.u32 4294901760, %v7017_v33  ;;  %v7025_v40 = vsub.f32 %v7023_v39, %v7024_v19 }
 0x435   :  { %v7019_v41 = vsub.f32 %v7017_v33, %v7018_v14  ;;  %v7026_v44 = vand.u32 4294901760, %v7025_v40 }
 0x436   :  { %6627 = vmatmul.mubr.f32.vlgmr.msra.gmra.mrb[16].mxu1 %v21876_v26 }
 0x437   :  { %6638 = vmatpush1.msra.mxu1 %v6558_v54  ;;  %6701 = vmatprep.mubr.f32.mxu1 %v20959_v36  ;;  %v7020_v42 = vand.u32 4294901760, %v7019_v41 }
 0x438   :  { %6711 = vmatprep.subr.mxu1 %v6473_v45 }
 0x43e   :  { %6704 = vmatmul.mubr.f32.vlgmr.msra.gmra.mrb[16].mxu1 %v21879_v35 }
 0x43f   :  { %6713 = vmatpush1.msra.mxu1 %v6475_v49  ;;  %6776 = vmatprep.mubr.f32.mxu1 %v20959_v36 }
 0x440   :  { %6789 = vmatprep.subr.mxu1 %v6553_v28  ;;  %v7450_v28 = vsel %vm1619_vm10, %v7437_v52, 0 }
 0x441   :  { %v7458_v34 = vand.u32 4294901760, %v7450_v28 }
 0x443   :  { %v7537_v3 = vsub.f32 %v7450_v28, %v7458_v34 }
 0x445   :  { %v7538_v24 = vand.u32 4294901760, %v7537_v3 }
 0x446   :  { %6780 = vmatmul.mubr.f32.vlgmr.msra.gmra.mrb[16].mxu1 %v21884_v57 }
 0x447   :  { %6793 = vmatpush1.msra.mxu1 %v6559_v38  ;;  %6856 = vmatprep.mubr.f32.mxu1 %v20959_v36  ;;  %v7444_v38 = vsel %vm1616_vm11, %v7443_v46, 0  ;;  %v7539_v51 = vsub.f32 %v7537_v3, %v7538_v24 }
 0x448   :  { %6865 = vmatprep.subr.mxu1 %v6473_v45  ;;  %v21933_v45 = vld [vmem:[%s22726_s2] sm:$0xff] }
 0x449   :  { %v21936_v25 = vrot.slane %v21933_v45, %v7422_v23  ;;  %v7540_v61 = vand.u32 4294901760, %v7539_v51 }
 0x44e   :  { %6858 = vmatmul.mubr.f32.vlgmr.msra.gmra.mrb[16].mxu1 %v21876_v26 }
 0x44f   :  { %6867 = vmatpush1.msra.mxu1 %v6475_v49  ;;  %6930 = vmatprep.mubr.f32.mxu1 %v20959_v36  ;;  %v7418_v49 = vsel %vm7415_vm0, %v7408_v30, %v7410_v10 }
 0x450   :  { %6939 = vmatprep.subr.mxu1 %v6938_v6  ;;  %v7436_v54 = vmul.f32 %v21936_v25, %v7418_v49 }
 0x452   :  { %v7447_v59 = vsel %vm1619_vm10, %v7436_v54, 0 }
 0x453   :  { %v7460_v62 = vand.u32 4294901760, %v7447_v59 }
 0x455   :  { %v7543_v12 = vsub.f32 %v7447_v59, %v7460_v62  ;;  %v8428_v59 = vpop.permute.xlu0 %8427 }
 0x456   :  { %6932 = vmatmul.mubr.f32.vlgmr.msra.gmra.mrb[16].mxu1 %v21876_v26 }
 0x457   :  { %6941 = vmatpush1.msra.mxu1 %v6940_v2  ;;  %7004 = vmatprep.mubr.f32.mxu1 %v20959_v36  ;;  %v7544_v47 = vand.u32 4294901760, %v7543_v12 }
 0x458   :  { %7021 = vmatprep.subr.mxu1 %v7020_v42 }
 0x459   :  { %v7545_v0 = vsub.f32 %v7543_v12, %v7544_v47 }
 0x45a   :  { %7010 = vmatmul.mubr.f32.vlgmr.msra.gmra.mrb[18].mxu1 %v6544_v7 }
 0x45b   :  { %7027 = vmatpush1.msra.mxu1 %v7026_v44  ;;  %7090 = vmatprep.mubr.f32.mxu1 %v20959_v36 }
 0x45c   :  { %7100 = vmatprep.subr.mxu1 %v7017_v33 }
 0x462   :  { %7092 = vmatmul.mubr.f32.vlgmr.msra.gmra.mrb[18].mxu1 %v21876_v26 }
 0x463   :  { %7103 = vmatpush1.msra.mxu1 %v7023_v39  ;;  %7166 = vmatprep.mubr.f32.mxu1 %v20959_v36 }
 0x464   :  { %7176 = vmatprep.subr.mxu1 %v6938_v6 }
 0x46a   :  { %7169 = vmatmul.mubr.f32.vlgmr.msra.gmra.mrb[18].mxu1 %v21879_v35  ;;  %v21949_v35 = vand.u32 4294901760, %v7444_v38 }
 0x46b   :  { %7178 = vmatpush1.msra.mxu1 %v6940_v2  ;;  %7241 = vmatprep.mubr.f32.mxu1 %v20959_v36 }
 0x46c   :  { %7254 = vmatprep.subr.mxu1 %v7018_v14  ;;  %v21952_v7 = vsub.f32 %v7444_v38, %v21949_v35  ;;  %v21979_v14 = vld [vmem:[%s22726_s2 + $0x10] sm:$0xff] }
 0x472   :  { %7245 = vmatmul.mubr.f32.vlgmr.msra.gmra.mrb[18].mxu1 %v21884_v57  ;;  %v21957_v57 = vand.u32 4294901760, %v21952_v7 }
 0x473   :  { %7258 = vmatpush1.msra.mxu1 %v7024_v19  ;;  %7321 = vmatprep.mubr.f32.mxu1 %v20959_v36  ;;  %v21982_v19 = vrot.slane %v21979_v14, %v7422_v23 }
 0x474   :  { %7330 = vmatprep.subr.mxu1 %v6938_v6  ;;  %v7528_v55 = vsub.f32 %v21952_v7, %v21957_v57  ;;  %v7546_v6 = vand.u32 4294901760, %v7545_v0 }
 0x476   :  { %v7529_v4 = vand.u32 4294901760, %v7528_v55 }
 0x47a   :  { %7323 = vmatmul.mubr.f32.vlgmr.msra.gmra.mrb[18].mxu1 %v21876_v26 }
 0x47b   :  { %7332 = vmatpush1.msra.mxu1 %v6940_v2  ;;  %7395 = vmatprep.mubr.f32.mxu1 %v20959_v36  ;;  %v7414_v2 = vpop.permute.xlu1 %7413 }
 0x47c   :  { %7459 = vmatprep.subr.mxu1 %v7458_v34  ;;  %v7419_v39 = vsel %vm7415_vm0, %v7414_v2, %v7408_v30  ;;  %v7416_v41 = vsel %vm7415_vm0, %v7412_v9, %v7414_v2 }
 0x47d   :  { %v7438_v42 = vmul.f32 %v21982_v19, %v7416_v41 }
 0x47f   :  { %v7453_v46 = vsel %vm1619_vm10, %v7438_v42, 0 }
 0x482   :  { %7397 = vmatmul.mubr.f32.vlgmr.msra.gmra.mrb[18].mxu1 %v21876_v26  ;;  %v21969_v26 = vld [vmem:[%s22726_s2 + $0x18] sm:$0xff] }
 0x483   :  { %7461 = vmatpush1.msra.mxu1 %v7460_v62  ;;  %7524 = vmatprep.mubr.f32.mxu1 %v20959_v36  ;;  %v21972_v33 = vrot.slane %v21969_v26, %v7422_v23  ;;  %v7925_v23 = vand.u32 4294901760, %v7453_v46 }
 0x484   :  { %7541 = vmatprep.subr.mxu1 %v7540_v61  ;;  %v8429_v61 = vsel %vm1616_vm11, %v8428_v59, 0 }
 0x485   :  { %v7439_v40 = vmul.f32 %v21972_v33, %v7419_v39  ;;  %v8008_v30 = vsub.f32 %v7453_v46, %v7925_v23 }
 0x486   :  { %7530 = vmatmul.mubr.f32.vlgmr.msra.gmra.mrb[16].mxu1 %v7529_v4 }
 0x487   :  { %7547 = vmatpush1.msra.mxu1 %v7546_v6  ;;  %7610 = vmatprep.mubr.f32.mxu1 %v20959_v36  ;;  %v7456_v44 = vsel %vm1619_vm10, %v7439_v40, 0  ;;  %v8009_v49 = vand.u32 4294901760, %v8008_v30 }
 0x488   :  { %7620 = vmatprep.subr.mxu1 %v7537_v3  ;;  %v7923_v10 = vand.u32 4294901760, %v7456_v44  ;;  %v8397_v3 = vpop.permute.xlu0 %8396 }
 0x489   :  { %v8010_v54 = vsub.f32 %v8008_v30, %v8009_v49 }
 0x48a   :  { %v8002_v9 = vsub.f32 %v7456_v44, %v7923_v10 }
 0x48b   :  { %v8011_v38 = vand.u32 4294901760, %v8010_v54 }
 0x48c   :  { %v8003_v43 = vand.u32 4294901760, %v8002_v9 }
 0x48e   :  { %7612 = vmatmul.mubr.f32.vlgmr.msra.gmra.mrb[16].mxu1 %v21949_v35  ;;  %v8004_v52 = vsub.f32 %v8002_v9, %v8003_v43 }
 0x48f   :  { %7623 = vmatpush1.msra.mxu1 %v7543_v12  ;;  %7686 = vmatprep.mubr.f32.mxu1 %v20959_v36 }
 0x490   :  { %7696 = vmatprep.subr.mxu1 %v7458_v34  ;;  %v8005_v28 = vand.u32 4294901760, %v8004_v52 }
 0x496   :  { %7689 = vmatmul.mubr.f32.vlgmr.msra.gmra.mrb[16].mxu1 %v21952_v7 }
 0x497   :  { %7698 = vmatpush1.msra.mxu1 %v7460_v62  ;;  %7761 = vmatprep.mubr.f32.mxu1 %v20959_v36 }
 0x498   :  { %7774 = vmatprep.subr.mxu1 %v7538_v24 }
 0x49e   :  { %7765 = vmatmul.mubr.f32.vlgmr.msra.gmra.mrb[16].mxu1 %v21957_v57 }
 0x49f   :  { %7778 = vmatpush1.msra.mxu1 %v7544_v47  ;;  %7841 = vmatprep.mubr.f32.mxu1 %v20959_v36 }
 0x4a0   :  { %7850 = vmatprep.subr.mxu1 %v7458_v34  ;;  %v8395_v34 = vpop.permute.xlu1 %8394 }
 0x4a1   :  { %v8402_v24 = vsel %vm8400_vm1, %v8395_v34, %v8397_v3 }
 0x4a4   :  { %v8393_v47 = vpop.permute.xlu1 %8392 }
 0x4a5   :  { %v8403_v55 = vsel %vm8400_vm1, %v8393_v47, %v8395_v34 }
 0x4a6   :  { %7843 = vmatmul.mubr.f32.vlgmr.msra.gmra.mrb[16].mxu1 %v21949_v35 }
 0x4a7   :  { %7852 = vmatpush1.msra.mxu1 %v7460_v62  ;;  %7915 = vmatprep.mubr.f32.mxu1 %v20959_v36  ;;  %v8407_v62 = vsub.s32 7, %v21545_v56 }
 0x4a8   :  { %7924 = vmatprep.subr.mxu1 %v7923_v10 }
 0x4a9   :  { %v22004_v12 = vrot.slane %v21923_v21, %v8407_v62  ;;  %v22009_v51 = vrot.slane %v21933_v45, %v8407_v62  ;;  %v22045_v52 = vrot.slane %v21979_v14, %v8407_v62 }
 0x4ab   :  { %v8422_v56 = vmul.f32 %v22004_v12, %v8402_v24  ;;  %v8421_v21 = vmul.f32 %v22009_v51, %v8403_v55 }
 0x4ad   :  { %v8435_v0 = vsel %vm1619_vm10, %v8422_v56, 0  ;;  %v8432_v45 = vsel %vm1619_vm10, %v8421_v21, 0 }
 0x4ae   :  { %7917 = vmatmul.mubr.f32.vlgmr.msra.gmra.mrb[16].mxu1 %v21949_v35  ;;  %v8445_v6 = vand.u32 4294901760, %v8432_v45 }
 0x4af   :  { %7926 = vmatpush1.msra.mxu1 %v7925_v23  ;;  %7989 = vmatprep.mubr.f32.mxu1 %v20959_v36 }
 0x4b0   :  { %8006 = vmatprep.subr.mxu1 %v8005_v28  ;;  %v8528_v41 = vsub.f32 %v8432_v45, %v8445_v6  ;;  %v9413_v45 = vpop.permute.xlu1 %9412 }
 0x4b2   :  { %7995 = vmatmul.mubr.f32.vlgmr.msra.gmra.mrb[18].mxu1 %v7529_v4  ;;  %v8443_v4 = vand.u32 4294901760, %v8435_v0  ;;  %v8529_v42 = vand.u32 4294901760, %v8528_v41 }
 0x4b3   :  { %8012 = vmatpush1.msra.mxu1 %v8011_v38  ;;  %8075 = vmatprep.mubr.f32.mxu1 %v20959_v36 }
 0x4b4   :  { %8085 = vmatprep.subr.mxu1 %v8002_v9  ;;  %v8522_v2 = vsub.f32 %v8435_v0, %v8443_v4 }
 0x4b6   :  { %v8523_v40 = vand.u32 4294901760, %v8522_v2 }
 0x4b8   :  { %v8524_v44 = vsub.f32 %v8522_v2, %v8523_v40 }
 0x4ba   :  { %8077 = vmatmul.mubr.f32.vlgmr.msra.gmra.mrb[18].mxu1 %v21949_v35  ;;  %v8525_v9 = vand.u32 4294901760, %v8524_v44  ;;  %v20052_v44 = vld [vmem:[%s22726_s2 + $0x20] ss:$0 sm:$0xff] }
 0x4bb   :  { %8088 = vmatpush1.msra.mxu1 %v8008_v30  ;;  %8151 = vmatprep.mubr.f32.mxu1 %v20959_v36 }
 0x4bc   :  { %8161 = vmatprep.subr.mxu1 %v7923_v10 }
 0x4c2   :  { %8154 = vmatmul.mubr.f32.vlgmr.msra.gmra.mrb[18].mxu1 %v21952_v7  ;;  %v22022_v7 = vand.u32 4294901760, %v8429_v61 }
 0x4c3   :  { %8163 = vmatpush1.msra.mxu1 %v7925_v23  ;;  %8226 = vmatprep.mubr.f32.mxu1 %v20959_v36 }
 0x4c4   :  { %8239 = vmatprep.subr.mxu1 %v8003_v43  ;;  %v22025_v39 = vsub.f32 %v8429_v61, %v22022_v7  ;;  %v8399_v43 = vpop.permute.xlu0 %8398  ;;  %v10362_v61 = vld [vmem:[%s22728_s4] sm:$0xf] }
 0x4c5   :  { %v8401_v54 = vsel %vm8400_vm1, %v8397_v3, %v8399_v43 }
 0x4ca   :  { %8230 = vmatmul.mubr.f32.vlgmr.msra.gmra.mrb[18].mxu1 %v21957_v57  ;;  %v22030_v57 = vand.u32 4294901760, %v22025_v39 }
 0x4cb   :  { %8243 = vmatpush1.msra.mxu1 %v8009_v49  ;;  %8306 = vmatprep.mubr.f32.mxu1 %v20959_v36  ;;  %v8404_v49 = vsel %vm8400_vm1, %v8399_v43, %v8393_v47 }
 0x4cc   :  { %8315 = vmatprep.subr.mxu1 %v7923_v10  ;;  %v8513_v46 = vsub.f32 %v22025_v39, %v22030_v57  ;;  %v8530_v10 = vsub.f32 %v8528_v41, %v8529_v42 }
 0x4ce   :  { %v8531_v30 = vand.u32 4294901760, %v8530_v10 }
 0x4d2   :  { %8308 = vmatmul.mubr.f32.vlgmr.msra.gmra.mrb[18].mxu1 %v21949_v35 }
 0x4d3   :  { %8317 = vmatpush1.msra.mxu1 %v7925_v23  ;;  %8380 = vmatprep.mubr.f32.mxu1 %v20959_v36  ;;  %v8514_v23 = vand.u32 4294901760, %v8513_v46 }
 0x4d4   :  { %8444 = vmatprep.subr.mxu1 %v8443_v4 }
 0x4da   :  { %8382 = vmatmul.mubr.f32.vlgmr.msra.gmra.mrb[18].mxu1 %v21949_v35  ;;  %v22040_v35 = vrot.slane %v21969_v26, %v8407_v62  ;;  %v8423_v26 = vmul.f32 %v22045_v52, %v8401_v54 }
 0x4db   :  { %8446 = vmatpush1.msra.mxu1 %v8445_v6  ;;  %8509 = vmatprep.mubr.f32.mxu1 %v20959_v36 }
 0x4dc   :  { %8526 = vmatprep.subr.mxu1 %v8525_v9  ;;  %v8424_v28 = vmul.f32 %v22040_v35, %v8404_v49  ;;  %v8438_v59 = vsel %vm1619_vm10, %v8423_v26, 0 }
 0x4dd   :  { %v8910_v14 = vand.u32 4294901760, %v8438_v59 }
 0x4de   :  { %8515 = vmatmul.mubr.f32.vlgmr.msra.gmra.mrb[16].mxu1 %v8514_v23  ;;  %v8441_v38 = vsel %vm1619_vm10, %v8424_v28, 0 }
 0x4df   :  { %8532 = vmatpush1.msra.mxu1 %v8531_v30  ;;  %8595 = vmatprep.mubr.f32.mxu1 %v20959_v36  ;;  %v8908_v34 = vand.u32 4294901760, %v8441_v38  ;;  %v8993_v3 = vsub.f32 %v8438_v59, %v8910_v14  ;;  %v9414_v30 = vsel %vm1616_vm11, %v9413_v45, 0 }
 0x4e0   :  { %8605 = vmatprep.subr.mxu1 %v8522_v2  ;;  %v9382_v2 = vpop.permute.xlu1 %9381  ;;  %v22085_v49 = vand.u32 4294901760, %v9414_v30 }
 0x4e1   :  { %v8987_v62 = vsub.f32 %v8441_v38, %v8908_v34  ;;  %v8994_v47 = vand.u32 4294901760, %v8993_v3 }
 0x4e2   :  { %v22088_v26 = vsub.f32 %v9414_v30, %v22085_v49 }
 0x4e3   :  { %v8988_v24 = vand.u32 4294901760, %v8987_v62  ;;  %v8995_v55 = vsub.f32 %v8993_v3, %v8994_v47 }
 0x4e5   :  { %v8989_v56 = vsub.f32 %v8987_v62, %v8988_v24  ;;  %v8996_v0 = vand.u32 4294901760, %v8995_v55  ;;  %v9384_v55 = vpop.permute.xlu1 %9383 }
 0x4e6   :  { %8597 = vmatmul.mubr.f32.vlgmr.msra.gmra.mrb[16].mxu1 %v22022_v7 }
 0x4e7   :  { %8608 = vmatpush1.msra.mxu1 %v8528_v41  ;;  %8671 = vmatprep.mubr.f32.mxu1 %v20959_v36  ;;  %v8990_v21 = vand.u32 4294901760, %v8989_v56 }
 0x4e8   :  { %8681 = vmatprep.subr.mxu1 %v8443_v4 }
 0x4ee   :  { %8674 = vmatmul.mubr.f32.vlgmr.msra.gmra.mrb[16].mxu1 %v22025_v39 }
 0x4ef   :  { %8683 = vmatpush1.msra.mxu1 %v8445_v6  ;;  %8746 = vmatprep.mubr.f32.mxu1 %v20959_v36 }
 0x4f0   :  { %8759 = vmatprep.subr.mxu1 %v8523_v40  ;;  %v20053_v40 = vld [vmem:[%s22726_s2 + $0x28] ss:$0 sm:$0xff] }
 0x4f6   :  { %8750 = vmatmul.mubr.f32.vlgmr.msra.gmra.mrb[16].mxu1 %v22030_v57 }
 0x4f7   :  { %8763 = vmatpush1.msra.mxu1 %v8529_v42  ;;  %8826 = vmatprep.mubr.f32.mxu1 %v20959_v36 }
 0x4f8   :  { %8835 = vmatprep.subr.mxu1 %v8443_v4  ;;  %v20971_v4 = vmov 0  }
 0x4f9   :  { %20908 = vset.pattern.permute.xlu0 %v20971_v4  ;;  %20909 = vset.pattern.permute.xlu1 %v20971_v4 }
 0x4fa   :  { %10365 = vperm.xlu0 %20908, %v10362_v61   ;;  %v9386_v61 = vsel %vm9385_vm2, %v9382_v2, %v9384_v55 }
 0x4fe   :  { %8828 = vmatmul.mubr.f32.vlgmr.msra.gmra.mrb[16].mxu1 %v22022_v7 }
 0x4ff   :  { %8837 = vmatpush1.msra.mxu1 %v8445_v6  ;;  %8900 = vmatprep.mubr.f32.mxu1 %v20959_v36  ;;  %v9380_v6 = vpop.permute.xlu0 %9379 }
 0x500   :  { %8909 = vmatprep.subr.mxu1 %v8908_v34  ;;  %v9387_v42 = vsel %vm9385_vm2, %v9380_v6, %v9382_v2 }
 0x501   :  { %v9407_v10 = vmul.f32 %v20053_v40, %v9387_v42 }
 0x503   :  { %v9378_v41 = vpop.permute.xlu0 %9377 }
 0x504   :  { %v9388_v46 = vsel %vm9385_vm2, %v9378_v41, %v9380_v6 }
 0x505   :  { %v9406_v9 = vmul.f32 %v20052_v44, %v9388_v46 }
 0x506   :  { %8902 = vmatmul.mubr.f32.vlgmr.msra.gmra.mrb[16].mxu1 %v22022_v7 }
 0x507   :  { %8911 = vmatpush1.msra.mxu1 %v8910_v14  ;;  %8974 = vmatprep.mubr.f32.mxu1 %v20959_v36  ;;  %v9417_v43 = vsel %vm1619_vm10, %v9406_v9, 0 }
 0x508   :  { %8991 = vmatprep.subr.mxu1 %v8990_v21  ;;  %v9430_v54 = vand.u32 4294901760, %v9417_v43  ;;  %v9389_v21 = vsel %vm9385_vm2, %v9384_v55, %v9378_v41  ;;  %v19046_v55 = vld [vmem:[%s22730_s6] sm:$0xf] }
 0x50a   :  { %8980 = vmatmul.mubr.f32.vlgmr.msra.gmra.mrb[18].mxu1 %v8514_v23  ;;  %v9420_v23 = vsel %vm1619_vm10, %v9407_v10, 0  ;;  %v9513_v38 = vsub.f32 %v9417_v43, %v9430_v54 }
 0x50b   :  { %8997 = vmatpush1.msra.mxu1 %v8996_v0  ;;  %9060 = vmatprep.mubr.f32.mxu1 %v20959_v36  ;;  %v20054_v0 = vld [vmem:[%s22726_s2 + $0x30] ss:$0 sm:$0xff] }
 0x50c   :  { %9070 = vmatprep.subr.mxu1 %v8987_v62  ;;  %v9514_v62 = vand.u32 4294901760, %v9513_v38  ;;  %v9408_v45 = vmul.f32 %v20054_v0, %v9386_v61 }
 0x50e   :  { %v9423_v40 = vsel %vm1619_vm10, %v9408_v45, 0 }
 0x50f   :  { %v9895_v42 = vand.u32 4294901760, %v9423_v40 }
 0x511   :  { %v9978_v2 = vsub.f32 %v9423_v40, %v9895_v42 }
 0x512   :  { %9062 = vmatmul.mubr.f32.vlgmr.msra.gmra.mrb[18].mxu1 %v22022_v7 }
 0x513   :  { %9073 = vmatpush1.msra.mxu1 %v8993_v3  ;;  %9136 = vmatprep.mubr.f32.mxu1 %v20959_v36  ;;  %v9979_v10 = vand.u32 4294901760, %v9978_v2 }
 0x514   :  { %9146 = vmatprep.subr.mxu1 %v8908_v34 }
 0x51a   :  { %9139 = vmatmul.mubr.f32.vlgmr.msra.gmra.mrb[18].mxu1 %v22025_v39  ;;  %v9428_v39 = vand.u32 4294901760, %v9420_v23 }
 0x51b   :  { %9148 = vmatpush1.msra.mxu1 %v8910_v14  ;;  %9211 = vmatprep.mubr.f32.mxu1 %v20959_v36 }
 0x51c   :  { %9224 = vmatprep.subr.mxu1 %v8988_v24  ;;  %v9507_v28 = vsub.f32 %v9420_v23, %v9428_v39  ;;  %v9515_v24 = vsub.f32 %v9513_v38, %v9514_v62  ;;  %v9980_v23 = vsub.f32 %v9978_v2, %v9979_v10 }
 0x51e   :  { %v9508_v59 = vand.u32 4294901760, %v9507_v28  ;;  %v9516_v56 = vand.u32 4294901760, %v9515_v24  ;;  %v9981_v43 = vand.u32 4294901760, %v9980_v23 }
 0x520   :  { %v9509_v3 = vsub.f32 %v9507_v28, %v9508_v59 }
 0x522   :  { %9215 = vmatmul.mubr.f32.vlgmr.msra.gmra.mrb[18].mxu1 %v22030_v57  ;;  %v22093_v57 = vand.u32 4294901760, %v22088_v26 }
 0x523   :  { %9228 = vmatpush1.msra.mxu1 %v8994_v47  ;;  %9291 = vmatprep.mubr.f32.mxu1 %v20959_v36  ;;  %v9510_v47 = vand.u32 4294901760, %v9509_v3 }
 0x524   :  { %9300 = vmatprep.subr.mxu1 %v8908_v34  ;;  %v9498_v34 = vsub.f32 %v22088_v26, %v22093_v57 }
 0x52a   :  { %9293 = vmatmul.mubr.f32.vlgmr.msra.gmra.mrb[18].mxu1 %v22022_v7 }
 0x52b   :  { %9302 = vmatpush1.msra.mxu1 %v8910_v14  ;;  %9365 = vmatprep.mubr.f32.mxu1 %v20959_v36  ;;  %v9499_v14 = vand.u32 4294901760, %v9498_v34 }
 0x52c   :  { %9429 = vmatprep.subr.mxu1 %v9428_v39 }
 0x532   :  { %9367 = vmatmul.mubr.f32.vlgmr.msra.gmra.mrb[18].mxu1 %v22022_v7  ;;  %v20055_v7 = vld [vmem:[%s22726_s2 + $0x38] ss:$0 sm:$0xff] }
 0x533   :  { %9431 = vmatpush1.msra.mxu1 %v9430_v54  ;;  %9494 = vmatprep.mubr.f32.mxu1 %v20959_v36  ;;  %v9409_v4 = vmul.f32 %v20055_v7, %v9389_v21 }
 0x534   :  { %9511 = vmatprep.subr.mxu1 %v9510_v47 }
 0x535   :  { %v9426_v6 = vsel %vm1619_vm10, %v9409_v4, 0 }
 0x536   :  { %9500 = vmatmul.mubr.f32.vlgmr.msra.gmra.mrb[16].mxu1 %v9499_v14  ;;  %v9893_v41 = vand.u32 4294901760, %v9426_v6 }
 0x537   :  { %9517 = vmatpush1.msra.mxu1 %v9516_v56  ;;  %9580 = vmatprep.mubr.f32.mxu1 %v20959_v36 }
 0x538   :  { %9590 = vmatprep.subr.mxu1 %v9507_v28  ;;  %v9972_v44 = vsub.f32 %v9426_v6, %v9893_v41 }
 0x53a   :  { %v9973_v46 = vand.u32 4294901760, %v9972_v44 }
 0x53c   :  { %v9974_v9 = vsub.f32 %v9972_v44, %v9973_v46 }
 0x53e   :  { %9582 = vmatmul.mubr.f32.vlgmr.msra.gmra.mrb[16].mxu1 %v22085_v49  ;;  %v9975_v30 = vand.u32 4294901760, %v9974_v9 }
 0x53f   :  { %9593 = vmatpush1.msra.mxu1 %v9513_v38  ;;  %9656 = vmatprep.mubr.f32.mxu1 %v20959_v36 }
 0x540   :  { %9666 = vmatprep.subr.mxu1 %v9428_v39 }
 0x546   :  { %9659 = vmatmul.mubr.f32.vlgmr.msra.gmra.mrb[16].mxu1 %v22088_v26 }
 0x547   :  { %9668 = vmatpush1.msra.mxu1 %v9430_v54  ;;  %9731 = vmatprep.mubr.f32.mxu1 %v20959_v36 }
 0x548   :  { %9744 = vmatprep.subr.mxu1 %v9508_v59 }
 0x54e   :  { %9735 = vmatmul.mubr.f32.vlgmr.msra.gmra.mrb[16].mxu1 %v22093_v57 }
 0x54f   :  { %9748 = vmatpush1.msra.mxu1 %v9514_v62  ;;  %9811 = vmatprep.mubr.f32.mxu1 %v20959_v36 }
 0x550   :  { %9820 = vmatprep.subr.mxu1 %v9428_v39  ;;  %v22136_v39 = vld [vmem:[%s22729_s5] sm:$0xf] }
 0x551   :  { %10410 = vrot.lane.b32.xlu1 %v22136_v39, %s20958_s30 }
 0x556   :  { %9813 = vmatmul.mubr.f32.vlgmr.msra.gmra.mrb[16].mxu1 %v22085_v49 }
 0x557   :  { %9822 = vmatpush1.msra.mxu1 %v9430_v54  ;;  %9885 = vmatprep.mubr.f32.mxu1 %v20959_v36 }
 0x558   :  { %9894 = vmatprep.subr.mxu1 %v9893_v41 }
 0x55e   :  { %9887 = vmatmul.mubr.f32.vlgmr.msra.gmra.mrb[16].mxu1 %v22085_v49 }
 0x55f   :  { %9896 = vmatpush1.msra.mxu1 %v9895_v42  ;;  %9959 = vmatprep.mubr.f32.mxu1 %v20959_v36 }
 0x560   :  { %9976 = vmatprep.subr.mxu1 %v9975_v30 }
 0x562   :  { %9965 = vmatmul.mubr.f32.vlgmr.msra.gmra.mrb[18].mxu1 %v9499_v14 }
 0x563   :  { %9982 = vmatpush1.msra.mxu1 %v9981_v43  ;;  %10045 = vmatprep.mubr.f32.mxu1 %v20959_v36 }
 0x564   :  { %10055 = vmatprep.subr.mxu1 %v9972_v44 }
 0x56a   :  { %10047 = vmatmul.mubr.f32.vlgmr.msra.gmra.mrb[18].mxu1 %v22085_v49 }
 0x56b   :  { %10058 = vmatpush1.msra.mxu1 %v9978_v2  ;;  %10121 = vmatprep.mubr.f32.mxu1 %v20959_v36 }
 0x56c   :  { %10131 = vmatprep.subr.mxu1 %v9893_v41 }
 0x572   :  { %10124 = vmatmul.mubr.f32.vlgmr.msra.gmra.mrb[18].mxu1 %v22088_v26 }
 0x573   :  { %10133 = vmatpush1.msra.mxu1 %v9895_v42  ;;  %10196 = vmatprep.mubr.f32.mxu1 %v20959_v36 }
 0x574   :  { %10209 = vmatprep.subr.mxu1 %v9973_v46 }
 0x579   :  { %v10366_v54 = vpop.permute.xlu0 %10365 }
 0x57a   :  { %10200 = vmatmul.mubr.f32.vlgmr.msra.gmra.mrb[18].mxu1 %v22093_v57 }
 0x57b   :  { %10213 = vmatpush1.msra.mxu1 %v9979_v10  ;;  %10276 = vmatprep.mubr.f32.mxu1 %v20959_v36 }
 0x57c   :  { %10285 = vmatprep.subr.mxu1 %v9893_v41 }
 0x582   :  { %10278 = vmatmul.mubr.f32.vlgmr.msra.gmra.mrb[18].mxu1 %v22085_v49 }
 0x583   :  { %10287 = vmatpush1.msra.mxu1 %v9895_v42  ;;  %10350 = vmatprep.mubr.f32.mxu1 %v20959_v36 }
 0x58a   :  { %10352 = vmatmul.mubr.f32.vlgmr.msra.gmra.mrb[18].mxu1 %v22085_v49 }
 0x58b   :  { %19148 = vmatprep.mubr.f32.mxu1 %v20959_v36 }
 0x5c3   :  { %v10411_v56 = vpop.permute.xlu1 %10410 }
 0x5c4   :  { %v10412_v6 = vsel %vm1616_vm11, %v10411_v56, 0 }
 0x5c5   :  { %v22234_v40 = vand.u32 4294901760, %v10412_v6 }
 0x5c7   :  { %v22237_v41 = vsub.f32 %v10412_v6, %v22234_v40 }
 0x5c9   :  { %v22240_v44 = vand.u32 4294901760, %v22237_v41 }
 0x5cb   :  { %v10496_v10 = vsub.f32 %v22237_v41, %v22240_v44 }
 0x631   :  { %v9888_v28 = vpop.f32.mrb[16].mxu1 }
 0x632   :  { %v10368_v26 = vadd.f32 %v10366_v54, %v9888_v28  ;;  %v9890_v38 = vpop.f32.mrb[17].mxu1 }
 0x633   :  { %v10369_v59 = vadd.f32 %v10366_v54, %v9890_v38 }
 0x634   :  { %v22140_v57 = vmax.f32 %v10368_v26, 0.0 }
 0x635   :  { %v22142_v62 = vmax.f32 %v10369_v59, 0.0 }
 0x636   :  { %10393 = vrot.lane.b32.xlu1 %v22140_v57, %s20953_s23 }
 0x637   :  { %10395 = vrot.lane.b32.xlu0 %v22142_v62, %s20953_s23 }
 0x65d   :  { %v10353_v49 = vpop.f32.mrb[18].mxu1 }
 0x65e   :  { %v10370_v3 = vadd.f32 %v10366_v54, %v10353_v49  ;;  %v10355_v34 = vpop.f32.mrb[19].mxu1 }
 0x65f   :  { %v10371_v24 = vadd.f32 %v10366_v54, %v10355_v34  ;;  %v10497_v54 = vand.u32 4294901760, %v10496_v10 }
 0x660   :  { %v22148_v47 = vmax.f32 %v10370_v3, 0.0 }
 0x661   :  { %v22150_v14 = vmax.f32 %v10371_v24, 0.0 }
 0x662   :  { %10397 = vrot.lane.b32.xlu0 %v22148_v47, %s20953_s23 }
 0x663   :  { %10399 = vrot.lane.b32.xlu1 %v22150_v14, %s20953_s23 }
 0x666   :  { %10378 = vrot.lane.b32.xlu0 %v22142_v62, %s20960_s10 }
 0x667   :  { %10376 = vrot.lane.b32.xlu1 %v22140_v57, %s20960_s10 }
 0x66a   :  { %10380 = vrot.lane.b32.xlu0 %v22148_v47, %s20960_s10 }
 0x66b   :  { %10382 = vrot.lane.b32.xlu1 %v22150_v14, %s20960_s10 }
 0x66e   :  { %12300 = vrot.lane.b32.xlu0 %v22140_v57, %s20961_s13 }
 0x66f   :  { %12316 = vrot.lane.b32.xlu1 %v22136_v39, %s20962_s14 }
 0x672   :  { %12306 = vrot.lane.b32.xlu0 %v22150_v14, %s20961_s13 }
 0x673   :  { %12302 = vrot.lane.b32.xlu1 %v22142_v62, %s20961_s13 }
 0x676   :  { %13282 = vrot.lane.b32.xlu0 %v22136_v39, %s20963_s17 }
 0x677   :  { %12304 = vrot.lane.b32.xlu1 %v22148_v47, %s20961_s13 }
 0x67a   :  { %13268 = vrot.lane.b32.xlu0 %v22142_v62, %s20964_s18 }
 0x67b   :  { %13266 = vrot.lane.b32.xlu1 %v22140_v57, %s20964_s18 }
 0x67e   :  { %13270 = vrot.lane.b32.xlu0 %v22148_v47, %s20964_s18 }
 0x67f   :  { %13272 = vrot.lane.b32.xlu1 %v22150_v14, %s20964_s18 }
 0x682   :  { %15198 = vrot.lane.b32.xlu0 %v22136_v39, %s20965_s1 }
 0x683   :  { %14232 = vrot.lane.b32.xlu1 %v22136_v39, %s20954_s24 }
 0x686   :  { %15186 = vrot.lane.b32.xlu0 %v22148_v47, %s20966_s21 }
 0x687   :  { %15184 = vrot.lane.b32.xlu1 %v22142_v62, %s20966_s21 }
 0x68a   :  { %15188 = vrot.lane.b32.xlu0 %v22150_v14, %s20966_s21 }
 0x68b   :  { %15182 = vrot.lane.b32.xlu1 %v22140_v57, %s20966_s21 }
 0x68e   :  { %16150 = vrot.lane.b32.xlu0 %v22142_v62, %s20967_s25 }
 0x68f   :  { %16164 = vrot.lane.b32.xlu1 %v22136_v39, %s20968_s27 }
 0x692   :  { %16148 = vrot.lane.b32.xlu0 %v22140_v57, %s20967_s25 }
 0x693   :  { %16152 = vrot.lane.b32.xlu1 %v22148_v47, %s20967_s25 }
 0x696   :  { %17130 = vrot.lane.b32.xlu0 %v22136_v39, %s20969_s11 }
 0x697   :  { %16154 = vrot.lane.b32.xlu1 %v22150_v14, %s20967_s25 }
 0x69a   :  { %17118 = vrot.lane.b32.xlu0 %v22148_v47, %s20954_s24 }
 0x69b   :  { %17116 = vrot.lane.b32.xlu1 %v22142_v62, %s20954_s24 }
 0x69e   :  { %17120 = vrot.lane.b32.xlu0 %v22150_v14, %s20954_s24 }
 0x69f   :  { %17114 = vrot.lane.b32.xlu1 %v22140_v57, %s20954_s24 }
 0x6a2   :  { %18082 = vrot.lane.b32.xlu0 %v22142_v62, %s20970_s16 }
 0x6a3   :  { %18096 = vrot.lane.b32.xlu1 %v22136_v39, %s20956_s26 }
 0x6a6   :  { %18080 = vrot.lane.b32.xlu0 %v22140_v57, %s20970_s16 }
 0x6a7   :  { %18084 = vrot.lane.b32.xlu1 %v22148_v47, %s20970_s16 }
 0x6a8   :  { %v10394_v7 = vpop.permute.xlu1 %10393 }
 0x6a9   :  { %v10396_v21 = vpop.permute.xlu0 %10395 }
 0x6aa   :  { %v10403_v0 = vsel %vm1588_vm9, %v10394_v7, %v10396_v21  ;;  %19049 = vperm.xlu0 %20908, %v19046_v55  }
 0x6ab   :  { %v10406_v61 = vmul.f32 %v10403_v0, %v21557_v5  ;;  %18086 = vrot.lane.b32.xlu1 %v22150_v14, %s20970_s16 }
 0x6ad   :  { %v10418_v4 = vsel %vm1619_vm10, %v10406_v61, 0 }
 0x6ae   :  { %v10426_v45 = vand.u32 4294901760, %v10418_v4 }
 0x6b0   :  { %10427 = vmatprep.subr.mxu0 %v10426_v45  ;;  %v10505_v42 = vsub.f32 %v10418_v4, %v10426_v45 }
 0x6b2   :  { %v10506_v2 = vand.u32 4294901760, %v10505_v42 }
 0x6b4   :  { %v10507_v23 = vsub.f32 %v10505_v42, %v10506_v2 }
 0x6b6   :  { %v10508_v28 = vand.u32 4294901760, %v10507_v23 }
 0x6d5   :  { %v10400_v5 = vpop.permute.xlu1 %10399 }
 0x6d6   :  { %v10404_v46 = vsel %vm1588_vm9, %v10400_v5, %v10394_v7 }
 0x6d7   :  { %v10405_v9 = vmul.f32 %v10404_v46, %v21578_v29  ;;  %v10398_v29 = vpop.permute.xlu0 %10397 }
 0x6d8   :  { %v10401_v3 = vsel %vm1588_vm9, %v10398_v29, %v10400_v5  ;;  %v10402_v34 = vsel %vm1588_vm9, %v10396_v21, %v10398_v29 }
 0x6d9   :  { %v10415_v30 = vsel %vm1619_vm10, %v10405_v9, 0  ;;  %v10408_v24 = vmul.f32 %v10401_v3, %v21600_v37  ;;  %v10407_v56 = vmul.f32 %v10402_v34, %v21605_v8  ;;  %v10377_v5 = vpop.permute.xlu1 %10376 }
 0x6da   :  { %v10428_v43 = vand.u32 4294901760, %v10415_v30 }
 0x6db   :  { %v10424_v55 = vsel %vm1619_vm10, %v10408_v24, 0  ;;  %v10421_v7 = vsel %vm1619_vm10, %v10407_v56, 0  ;;  %v10379_v46 = vpop.permute.xlu0 %10378 }
 0x6dc   :  { %v10511_v26 = vsub.f32 %v10415_v30, %v10428_v43  ;;  %10429 = vmatpush1.msra.mxu0 %v10428_v43  ;;  %v10891_v0 = vand.u32 4294901760, %v10424_v55  ;;  %v10893_v21 = vand.u32 4294901760, %v10421_v7  ;;  %v10386_v10 = vsel %vm1554_vm12, %v10377_v5, %v10379_v46 }
 0x6dd   :  { %10498 = vmatmul.mubr.f32.vlgmr.msra.gmra.mrb[16].mxu0 %v10497_v54  ;;  %10509 = vmatprep.subr.mxu0 %v10508_v28  ;;  %v10383_v9 = vpop.permute.xlu1 %10382  ;;  %v10389_v23 = vmul.f32 %v10386_v10, %v21627_v17  ;;  %v11356_v28 = vsel %vm1616_vm11, %v22136_v39, 0 }
 0x6de   :  { %10578 = vmatprep.mubr.f32.mxu0 %v20959_v36  ;;  %v10512_v38 = vand.u32 4294901760, %v10511_v26  ;;  %v10970_v61 = vsub.f32 %v10424_v55, %v10891_v0  ;;  %v10976_v37 = vsub.f32 %v10421_v7, %v10893_v21  ;;  %v10387_v30 = vsel %vm1554_vm12, %v10383_v9, %v10377_v5 }
 0x6df   :  { %v22283_v17 = vand.u32 4294901760, %v11356_v28 }
 0x6e0   :  { %v10513_v59 = vsub.f32 %v10511_v26, %v10512_v38  ;;  %v10971_v4 = vand.u32 4294901760, %v10970_v61  ;;  %v10977_v8 = vand.u32 4294901760, %v10976_v37 }
 0x6e2   :  { %v10514_v49 = vand.u32 4294901760, %v10513_v59  ;;  %v10972_v6 = vsub.f32 %v10970_v61, %v10971_v4 }
 0x6e4   :  { %10515 = vmatpush1.msra.mxu0 %v10514_v49 }
 0x6e5   :  { %10580 = vmatmul.mubr.f32.vlgmr.msra.gmra.mrb[16].mxu0 %v22234_v40  ;;  %10588 = vmatprep.subr.mxu0 %v10505_v42  ;;  %v10978_v42 = vsub.f32 %v10976_v37, %v10977_v8 }
 0x6e6   :  { %10591 = vmatpush1.msra.mxu0 %v10511_v26  ;;  %10654 = vmatprep.mubr.f32.mxu0 %v20959_v36 }
 0x6e7   :  { %10664 = vmatprep.subr.mxu0 %v10426_v45 }
 0x6ed   :  { %10657 = vmatmul.mubr.f32.vlgmr.msra.gmra.mrb[16].mxu0 %v22237_v41 }
 0x6ee   :  { %10666 = vmatpush1.msra.mxu0 %v10428_v43  ;;  %10729 = vmatprep.mubr.f32.mxu0 %v20959_v36 }
 0x6ef   :  { %10742 = vmatprep.subr.mxu0 %v10506_v2  ;;  %v10973_v2 = vand.u32 4294901760, %v10972_v6 }
 0x6f5   :  { %10733 = vmatmul.mubr.f32.vlgmr.msra.gmra.mrb[16].mxu0 %v22240_v44 }
 0x6f6   :  { %10746 = vmatpush1.msra.mxu0 %v10512_v38  ;;  %10809 = vmatprep.mubr.f32.mxu0 %v20959_v36 }
 0x6f7   :  { %10818 = vmatprep.subr.mxu0 %v10426_v45  ;;  %v10979_v45 = vand.u32 4294901760, %v10978_v42 }
 0x6fd   :  { %10811 = vmatmul.mubr.f32.vlgmr.msra.gmra.mrb[16].mxu0 %v22234_v40 }
 0x6fe   :  { %10820 = vmatpush1.msra.mxu0 %v10428_v43  ;;  %10883 = vmatprep.mubr.f32.mxu0 %v20959_v36  ;;  %v10388_v43 = vmul.f32 %v10387_v30, %v21632_v13  ;;  %v22287_v13 = vsub.f32 %v11356_v28, %v22283_v17 }
 0x6ff   :  { %10892 = vmatprep.subr.mxu0 %v10891_v0 }
 0x700   :  { %v11359_v38 = vsel %vm1619_vm10, %v10388_v43, 0  ;;  %v22291_v29 = vand.u32 4294901760, %v22287_v13 }
 0x702   :  { %v11440_v34 = vsub.f32 %v22287_v13, %v22291_v29 }
 0x704   :  { %v11441_v55 = vand.u32 4294901760, %v11440_v34 }
 0x705   :  { %10885 = vmatmul.mubr.f32.vlgmr.msra.gmra.mrb[16].mxu0 %v22234_v40 }
 0x706   :  { %10894 = vmatpush1.msra.mxu0 %v10893_v21  ;;  %10957 = vmatprep.mubr.f32.mxu0 %v20959_v36 }
 0x707   :  { %10974 = vmatprep.subr.mxu0 %v10973_v2 }
 0x709   :  { %10963 = vmatmul.mubr.f32.vlgmr.msra.gmra.mrb[18].mxu0 %v10497_v54  ;;  %v11362_v54 = vsel %vm1619_vm10, %v10389_v23, 0  ;;  %v12317_v23 = vpop.permute.xlu1 %12316 }
 0x70a   :  { %10980 = vmatpush1.msra.mxu0 %v10979_v45  ;;  %11043 = vmatprep.mubr.f32.mxu0 %v20959_v36  ;;  %v11370_v26 = vand.u32 4294901760, %v11362_v54 }
 0x70b   :  { %11053 = vmatprep.subr.mxu0 %v10970_v61 }
 0x70c   :  { %v11449_v59 = vsub.f32 %v11362_v54, %v11370_v26 }
 0x70d   :  { %v12303_v43 = vpop.permute.xlu1 %12302 }
 0x70e   :  { %v11450_v39 = vand.u32 4294901760, %v11449_v59 }
 0x710   :  { %v11451_v3 = vsub.f32 %v11449_v59, %v11450_v39 }
 0x711   :  { %11045 = vmatmul.mubr.f32.vlgmr.msra.gmra.mrb[18].mxu0 %v22234_v40 }
 0x712   :  { %11056 = vmatpush1.msra.mxu0 %v10976_v37  ;;  %11119 = vmatprep.mubr.f32.mxu0 %v20959_v36  ;;  %v11452_v56 = vand.u32 4294901760, %v11451_v3 }
 0x713   :  { %11129 = vmatprep.subr.mxu0 %v10891_v0 }
 0x719   :  { %11122 = vmatmul.mubr.f32.vlgmr.msra.gmra.mrb[18].mxu0 %v22237_v41  ;;  %v11372_v41 = vand.u32 4294901760, %v11359_v38 }
 0x71a   :  { %11131 = vmatpush1.msra.mxu0 %v10893_v21  ;;  %11194 = vmatprep.mubr.f32.mxu0 %v20959_v36 }
 0x71b   :  { %11207 = vmatprep.subr.mxu0 %v10971_v4  ;;  %v11455_v49 = vsub.f32 %v11359_v38, %v11372_v41 }
 0x721   :  { %11198 = vmatmul.mubr.f32.vlgmr.msra.gmra.mrb[18].mxu0 %v22240_v44  ;;  %v11456_v44 = vand.u32 4294901760, %v11455_v49 }
 0x722   :  { %11211 = vmatpush1.msra.mxu0 %v10977_v8  ;;  %11274 = vmatprep.mubr.f32.mxu0 %v20959_v36 }
 0x723   :  { %11283 = vmatprep.subr.mxu0 %v10891_v0  ;;  %v11457_v24 = vsub.f32 %v11455_v49, %v11456_v44  ;;  %v10381_v0 = vpop.permute.xlu0 %10380 }
 0x725   :  { %v11458_v7 = vand.u32 4294901760, %v11457_v24 }
 0x727   :  { %v12301_v30 = vpop.permute.xlu0 %12300 }
 0x728   :  { %v12310_v28 = vsel %vm3514_vm13, %v12301_v30, %v12303_v43 }
 0x729   :  { %11276 = vmatmul.mubr.f32.vlgmr.msra.gmra.mrb[18].mxu0 %v22234_v40  ;;  %v12313_v38 = vmul.f32 %v12310_v28, %v21691_v16 }
 0x72a   :  { %11285 = vmatpush1.msra.mxu0 %v10893_v21  ;;  %11348 = vmatprep.mubr.f32.mxu0 %v20959_v36  ;;  %v10385_v21 = vsel %vm1554_vm12, %v10379_v46, %v10381_v0 }
 0x72b   :  { %11371 = vmatprep.subr.mxu0 %v11370_v26  ;;  %v10390_v37 = vmul.f32 %v10385_v21, %v21669_v63  ;;  %v12307_v54 = vpop.permute.xlu0 %12306 }
 0x72d   :  { %v11365_v8 = vsel %vm1619_vm10, %v10390_v37, 0  ;;  %v12305_v37 = vpop.permute.xlu1 %12304 }
 0x72e   :  { %v11837_v42 = vand.u32 4294901760, %v11365_v8 }
 0x731   :  { %11350 = vmatmul.mubr.f32.vlgmr.msra.gmra.mrb[18].mxu0 %v22234_v40  ;;  %v10384_v40 = vsel %vm1554_vm12, %v10381_v0, %v10383_v9 }
 0x732   :  { %11373 = vmatpush1.msra.mxu0 %v11372_v41  ;;  %11436 = vmatprep.mubr.f32.mxu0 %v20959_v36  ;;  %v10391_v61 = vmul.f32 %v10384_v40, %v21664_v18  ;;  %v11920_v18 = vsub.f32 %v11365_v8, %v11837_v42 }
 0x733   :  { %11453 = vmatprep.subr.mxu0 %v11452_v56 }
 0x734   :  { %v11368_v4 = vsel %vm1619_vm10, %v10391_v61, 0  ;;  %v11921_v63 = vand.u32 4294901760, %v11920_v18 }
 0x735   :  { %11442 = vmatmul.mubr.f32.vlgmr.msra.gmra.mrb[16].mxu0 %v11441_v55  ;;  %v11835_v6 = vand.u32 4294901760, %v11368_v4 }
 0x736   :  { %11459 = vmatpush1.msra.mxu0 %v11458_v7  ;;  %11522 = vmatprep.mubr.f32.mxu0 %v20959_v36  ;;  %v11922_v46 = vsub.f32 %v11920_v18, %v11921_v63 }
 0x737   :  { %11532 = vmatprep.subr.mxu0 %v11449_v59  ;;  %v11914_v2 = vsub.f32 %v11368_v4, %v11835_v6  ;;  %v12324_v59 = vsel %vm1619_vm10, %v12313_v38, 0  ;;  %v12309_v4 = vsel %vm3514_vm13, %v12303_v43, %v12305_v37  ;;  %v13267_v43 = vpop.permute.xlu1 %13266 }
 0x738   :  { %v11923_v9 = vand.u32 4294901760, %v11922_v46 }
 0x739   :  { %v11915_v45 = vand.u32 4294901760, %v11914_v2 }
 0x73b   :  { %v11916_v5 = vsub.f32 %v11914_v2, %v11915_v45 }
 0x73d   :  { %11524 = vmatmul.mubr.f32.vlgmr.msra.gmra.mrb[16].mxu0 %v22283_v17  ;;  %v11917_v10 = vand.u32 4294901760, %v11916_v5 }
 0x73e   :  { %11535 = vmatpush1.msra.mxu0 %v11455_v49  ;;  %11598 = vmatprep.mubr.f32.mxu0 %v20959_v36  ;;  %v12318_v49 = vsel %vm1616_vm11, %v12317_v23, 0 }
 0x73f   :  { %11608 = vmatprep.subr.mxu0 %v11370_v26 }
 0x745   :  { %11601 = vmatmul.mubr.f32.vlgmr.msra.gmra.mrb[16].mxu0 %v22287_v13 }
 0x746   :  { %11610 = vmatpush1.msra.mxu0 %v11372_v41  ;;  %11673 = vmatprep.mubr.f32.mxu0 %v20959_v36 }
 0x747   :  { %11686 = vmatprep.subr.mxu0 %v11450_v39 }
 0x74d   :  { %11677 = vmatmul.mubr.f32.vlgmr.msra.gmra.mrb[16].mxu0 %v22291_v29 }
 0x74e   :  { %11690 = vmatpush1.msra.mxu0 %v11456_v44  ;;  %11753 = vmatprep.mubr.f32.mxu0 %v20959_v36  ;;  %v12332_v44 = vand.u32 4294901760, %v12324_v59 }
 0x74f   :  { %11762 = vmatprep.subr.mxu0 %v11370_v26  ;;  %v12311_v26 = vsel %vm3514_vm13, %v12307_v54, %v12301_v30  ;;  %v13283_v30 = vpop.permute.xlu0 %13282 }
 0x750   :  { %v12411_v3 = vsub.f32 %v12324_v59, %v12332_v44 }
 0x752   :  { %v12412_v24 = vand.u32 4294901760, %v12411_v3 }
 0x755   :  { %11755 = vmatmul.mubr.f32.vlgmr.msra.gmra.mrb[16].mxu0 %v22283_v17 }
 0x756   :  { %11764 = vmatpush1.msra.mxu0 %v11372_v41  ;;  %11827 = vmatprep.mubr.f32.mxu0 %v20959_v36  ;;  %v12312_v41 = vmul.f32 %v12311_v26, %v21696_v27  ;;  %v13273_v26 = vpop.permute.xlu1 %13272 }
 0x757   :  { %11836 = vmatprep.subr.mxu0 %v11835_v6 }
 0x758   :  { %v12321_v39 = vsel %vm1619_vm10, %v12312_v41, 0  ;;  %v13277_v41 = vsel %vm4499_vm14, %v13273_v26, %v13267_v43 }
 0x759   :  { %v12334_v16 = vand.u32 4294901760, %v12321_v39  ;;  %v13278_v59 = vmul.f32 %v13277_v41, %v21759_v22 }
 0x75b   :  { %v12417_v27 = vsub.f32 %v12321_v39, %v12334_v16  ;;  %v13284_v39 = vsel %vm1616_vm11, %v13283_v30, 0 }
 0x75d   :  { %11829 = vmatmul.mubr.f32.vlgmr.msra.gmra.mrb[16].mxu0 %v22283_v17  ;;  %v12418_v56 = vand.u32 4294901760, %v12417_v27 }
 0x75e   :  { %11838 = vmatpush1.msra.mxu0 %v11837_v42  ;;  %11901 = vmatprep.mubr.f32.mxu0 %v20959_v36 }
 0x75f   :  { %11918 = vmatprep.subr.mxu0 %v11917_v10  ;;  %v12419_v0 = vsub.f32 %v12417_v27, %v12418_v56 }
 0x761   :  { %11907 = vmatmul.mubr.f32.vlgmr.msra.gmra.mrb[18].mxu0 %v11441_v55  ;;  %v12413_v55 = vsub.f32 %v12411_v3, %v12412_v24  ;;  %v12420_v61 = vand.u32 4294901760, %v12419_v0 }
 0x762   :  { %11924 = vmatpush1.msra.mxu0 %v11923_v9  ;;  %11987 = vmatprep.mubr.f32.mxu0 %v20959_v36 }
 0x763   :  { %11997 = vmatprep.subr.mxu0 %v11914_v2  ;;  %v12414_v40 = vand.u32 4294901760, %v12413_v55 }
 0x769   :  { %11989 = vmatmul.mubr.f32.vlgmr.msra.gmra.mrb[18].mxu0 %v22283_v17 }
 0x76a   :  { %12000 = vmatpush1.msra.mxu0 %v11920_v18  ;;  %12063 = vmatprep.mubr.f32.mxu0 %v20959_v36 }
 0x76b   :  { %12073 = vmatprep.subr.mxu0 %v11835_v6 }
 0x771   :  { %12066 = vmatmul.mubr.f32.vlgmr.msra.gmra.mrb[18].mxu0 %v22287_v13  ;;  %v22333_v13 = vand.u32 4294901760, %v12318_v49 }
 0x772   :  { %12075 = vmatpush1.msra.mxu0 %v11837_v42  ;;  %12138 = vmatprep.mubr.f32.mxu0 %v20959_v36 }
 0x773   :  { %12151 = vmatprep.subr.mxu0 %v11915_v45  ;;  %v22336_v34 = vsub.f32 %v12318_v49, %v22333_v13 }
 0x779   :  { %12142 = vmatmul.mubr.f32.vlgmr.msra.gmra.mrb[18].mxu0 %v22291_v29  ;;  %v22341_v29 = vand.u32 4294901760, %v22336_v34 }
 0x77a   :  { %12155 = vmatpush1.msra.mxu0 %v11921_v63  ;;  %12218 = vmatprep.mubr.f32.mxu0 %v20959_v36 }
 0x77b   :  { %12227 = vmatprep.subr.mxu0 %v11835_v6  ;;  %v12402_v7 = vsub.f32 %v22336_v34, %v22341_v29  ;;  %v12314_v6 = vmul.f32 %v12309_v4, %v21732_v11 }
 0x77d   :  { %v12403_v21 = vand.u32 4294901760, %v12402_v7  ;;  %v12327_v2 = vsel %vm1619_vm10, %v12314_v6, 0 }
 0x77e   :  { %v12799_v45 = vand.u32 4294901760, %v12327_v2 }
 0x781   :  { %12220 = vmatmul.mubr.f32.vlgmr.msra.gmra.mrb[18].mxu0 %v22283_v17 }
 0x782   :  { %12229 = vmatpush1.msra.mxu0 %v11837_v42  ;;  %12292 = vmatprep.mubr.f32.mxu0 %v20959_v36 }
 0x783   :  { %12333 = vmatprep.subr.mxu0 %v12332_v44 }
 0x789   :  { %12294 = vmatmul.mubr.f32.vlgmr.msra.gmra.mrb[18].mxu0 %v22283_v17  ;;  %v12308_v17 = vsel %vm3514_vm13, %v12305_v37, %v12307_v54  ;;  %v13269_v54 = vpop.permute.xlu0 %13268 }
 0x78a   :  { %12335 = vmatpush1.msra.mxu0 %v12334_v16  ;;  %12398 = vmatprep.mubr.f32.mxu0 %v20959_v36  ;;  %v12315_v8 = vmul.f32 %v12308_v17, %v21727_v15  ;;  %v12882_v15 = vsub.f32 %v12327_v2, %v12799_v45  ;;  %v13276_v28 = vsel %vm4499_vm14, %v13267_v43, %v13269_v54  ;;  %v14237_v43 = vsel %vm1619_vm10, %v22140_v57, 0 }
 0x78b   :  { %12415 = vmatprep.subr.mxu0 %v12414_v40  ;;  %v13279_v38 = vmul.f32 %v13276_v28, %v21754_v32  ;;  %v22382_v32 = vand.u32 4294901760, %v13284_v39  ;;  %v14250_v28 = vand.u32 4294901760, %v14237_v43 }
 0x78c   :  { %v12330_v42 = vsel %vm1619_vm10, %v12315_v8, 0  ;;  %v12883_v11 = vand.u32 4294901760, %v12882_v15 }
 0x78d   :  { %12404 = vmatmul.mubr.f32.vlgmr.msra.gmra.mrb[16].mxu0 %v12403_v21  ;;  %v12797_v18 = vand.u32 4294901760, %v12330_v42  ;;  %v13290_v49 = vsel %vm1619_vm10, %v13279_v38, 0  ;;  %v13271_v37 = vpop.permute.xlu0 %13270 }
 0x78e   :  { %12421 = vmatpush1.msra.mxu0 %v12420_v61  ;;  %12484 = vmatprep.mubr.f32.mxu0 %v20959_v36  ;;  %v12884_v10 = vsub.f32 %v12882_v15, %v12883_v11  ;;  %v13275_v17 = vsel %vm4499_vm14, %v13269_v54, %v13271_v37 }
 0x78f   :  { %12494 = vmatprep.subr.mxu0 %v12411_v3  ;;  %v12876_v63 = vsub.f32 %v12330_v42, %v12797_v18  ;;  %v13280_v8 = vmul.f32 %v13275_v17, %v21795_v1 }
 0x790   :  { %v12885_v23 = vand.u32 4294901760, %v12884_v10  ;;  %v14240_v10 = vsel %vm1619_vm10, %v22142_v62, 0  ;;  %v14333_v62 = vsub.f32 %v14237_v43, %v14250_v28 }
 0x791   :  { %v12877_v5 = vand.u32 4294901760, %v12876_v63  ;;  %v13293_v42 = vsel %vm1619_vm10, %v13280_v8, 0  ;;  %v14248_v30 = vand.u32 4294901760, %v14240_v10 }
 0x793   :  { %v12878_v46 = vsub.f32 %v12876_v63, %v12877_v5 }
 0x795   :  { %12486 = vmatmul.mubr.f32.vlgmr.msra.gmra.mrb[16].mxu0 %v22333_v13  ;;  %v12879_v9 = vand.u32 4294901760, %v12878_v46 }
 0x796   :  { %12497 = vmatpush1.msra.mxu0 %v12417_v27  ;;  %12560 = vmatprep.mubr.f32.mxu0 %v20959_v36  ;;  %v22385_v27 = vsub.f32 %v13284_v39, %v22382_v32 }
 0x797   :  { %12570 = vmatprep.subr.mxu0 %v12332_v44 }
 0x79d   :  { %12563 = vmatmul.mubr.f32.vlgmr.msra.gmra.mrb[16].mxu0 %v22336_v34 }
 0x79e   :  { %12572 = vmatpush1.msra.mxu0 %v12334_v16  ;;  %12635 = vmatprep.mubr.f32.mxu0 %v20959_v36 }
 0x79f   :  { %12648 = vmatprep.subr.mxu0 %v12412_v24 }
 0x7a5   :  { %12639 = vmatmul.mubr.f32.vlgmr.msra.gmra.mrb[16].mxu0 %v22341_v29 }
 0x7a6   :  { %12652 = vmatpush1.msra.mxu0 %v12418_v56  ;;  %12715 = vmatprep.mubr.f32.mxu0 %v20959_v36 }
 0x7a7   :  { %12724 = vmatprep.subr.mxu0 %v12332_v44  ;;  %v13298_v44 = vand.u32 4294901760, %v13290_v49 }
 0x7ad   :  { %12717 = vmatmul.mubr.f32.vlgmr.msra.gmra.mrb[16].mxu0 %v22333_v13 }
 0x7ae   :  { %12726 = vmatpush1.msra.mxu0 %v12334_v16  ;;  %12789 = vmatprep.mubr.f32.mxu0 %v20959_v36  ;;  %v13287_v16 = vsel %vm1619_vm10, %v13278_v59, 0  ;;  %v14334_v59 = vand.u32 4294901760, %v14333_v62 }
 0x7af   :  { %12798 = vmatprep.subr.mxu0 %v12797_v18  ;;  %v13300_v3 = vand.u32 4294901760, %v13287_v16 }
 0x7b1   :  { %v13383_v22 = vsub.f32 %v13287_v16, %v13300_v3 }
 0x7b3   :  { %v13384_v56 = vand.u32 4294901760, %v13383_v22 }
 0x7b5   :  { %12791 = vmatmul.mubr.f32.vlgmr.msra.gmra.mrb[16].mxu0 %v22333_v13  ;;  %v13385_v0 = vsub.f32 %v13383_v22, %v13384_v56 }
 0x7b6   :  { %12800 = vmatpush1.msra.mxu0 %v12799_v45  ;;  %12863 = vmatprep.mubr.f32.mxu0 %v20959_v36 }
 0x7b7   :  { %12880 = vmatprep.subr.mxu0 %v12879_v9  ;;  %v13386_v61 = vand.u32 4294901760, %v13385_v0  ;;  %v14233_v9 = vpop.permute.xlu1 %14232 }
 0x7b9   :  { %12869 = vmatmul.mubr.f32.vlgmr.msra.gmra.mrb[18].mxu0 %v12403_v21 }
 0x7ba   :  { %12886 = vmatpush1.msra.mxu0 %v12885_v23  ;;  %12949 = vmatprep.mubr.f32.mxu0 %v20959_v36  ;;  %v14234_v23 = vsel %vm1616_vm11, %v14233_v9, 0 }
 0x7bb   :  { %12959 = vmatprep.subr.mxu0 %v12876_v63  ;;  %v22427_v54 = vand.u32 4294901760, %v14234_v23 }
 0x7bd   :  { %v22430_v38 = vsub.f32 %v14234_v23, %v22427_v54 }
 0x7bf   :  { %v22435_v57 = vand.u32 4294901760, %v22430_v38 }
 0x7c1   :  { %12951 = vmatmul.mubr.f32.vlgmr.msra.gmra.mrb[18].mxu0 %v22333_v13  ;;  %v14318_v39 = vsub.f32 %v22430_v38, %v22435_v57 }
 0x7c2   :  { %12962 = vmatpush1.msra.mxu0 %v12882_v15  ;;  %13025 = vmatprep.mubr.f32.mxu0 %v20959_v36 }
 0x7c3   :  { %13035 = vmatprep.subr.mxu0 %v12797_v18 }
 0x7c9   :  { %13028 = vmatmul.mubr.f32.vlgmr.msra.gmra.mrb[18].mxu0 %v22336_v34  ;;  %v13377_v34 = vsub.f32 %v13290_v49, %v13298_v44 }
 0x7ca   :  { %13037 = vmatpush1.msra.mxu0 %v12799_v45  ;;  %13100 = vmatprep.mubr.f32.mxu0 %v20959_v36 }
 0x7cb   :  { %13113 = vmatprep.subr.mxu0 %v12877_v5  ;;  %v13378_v24 = vand.u32 4294901760, %v13377_v34 }
 0x7cd   :  { %v13379_v55 = vsub.f32 %v13377_v34, %v13378_v24 }
 0x7cf   :  { %v13380_v40 = vand.u32 4294901760, %v13379_v55 }
 0x7d1   :  { %13104 = vmatmul.mubr.f32.vlgmr.msra.gmra.mrb[18].mxu0 %v22341_v29  ;;  %v22390_v29 = vand.u32 4294901760, %v22385_v27 }
 0x7d2   :  { %13117 = vmatpush1.msra.mxu0 %v12883_v11  ;;  %13180 = vmatprep.mubr.f32.mxu0 %v20959_v36 }
 0x7d3   :  { %13189 = vmatprep.subr.mxu0 %v12797_v18  ;;  %v13368_v7 = vsub.f32 %v22385_v27, %v22390_v29  ;;  %v13765_v18 = vand.u32 4294901760, %v13293_v42 }
 0x7d5   :  { %v13369_v21 = vand.u32 4294901760, %v13368_v7 }
 0x7d9   :  { %13182 = vmatmul.mubr.f32.vlgmr.msra.gmra.mrb[18].mxu0 %v22333_v13 }
 0x7da   :  { %13191 = vmatpush1.msra.mxu0 %v12799_v45  ;;  %13254 = vmatprep.mubr.f32.mxu0 %v20959_v36 }
 0x7db   :  { %13299 = vmatprep.subr.mxu0 %v13298_v44 }
 0x7e1   :  { %13256 = vmatmul.mubr.f32.vlgmr.msra.gmra.mrb[18].mxu0 %v22333_v13  ;;  %v13274_v13 = vsel %vm4499_vm14, %v13271_v37, %v13273_v26  ;;  %v14327_v26 = vsub.f32 %v14240_v10, %v14248_v30 }
 0x7e2   :  { %13301 = vmatpush1.msra.mxu0 %v13300_v3  ;;  %13364 = vmatprep.mubr.f32.mxu0 %v20959_v36  ;;  %v13281_v4 = vmul.f32 %v13274_v13, %v21790_v31  ;;  %v13848_v31 = vsub.f32 %v13293_v42, %v13765_v18 }
 0x7e3   :  { %13381 = vmatprep.subr.mxu0 %v13380_v40  ;;  %v14328_v41 = vand.u32 4294901760, %v14327_v26 }
 0x7e4   :  { %v13296_v6 = vsel %vm1619_vm10, %v13281_v4, 0  ;;  %v13849_v1 = vand.u32 4294901760, %v13848_v31 }
 0x7e5   :  { %13370 = vmatmul.mubr.f32.vlgmr.msra.gmra.mrb[16].mxu0 %v13369_v21  ;;  %v13763_v2 = vand.u32 4294901760, %v13296_v6  ;;  %v14329_v49 = vsub.f32 %v14327_v26, %v14328_v41 }
 0x7e6   :  { %13387 = vmatpush1.msra.mxu0 %v13386_v61  ;;  %13450 = vmatprep.mubr.f32.mxu0 %v20959_v36  ;;  %v13850_v5 = vsub.f32 %v13848_v31, %v13849_v1  ;;  %v15185_v61 = vpop.permute.xlu1 %15184 }
 0x7e7   :  { %13460 = vmatprep.subr.mxu0 %v13377_v34  ;;  %v13842_v45 = vsub.f32 %v13296_v6, %v13763_v2  ;;  %v14330_v16 = vand.u32 4294901760, %v14329_v49 }
 0x7e8   :  { %v13851_v46 = vand.u32 4294901760, %v13850_v5 }
 0x7e9   :  { %v13843_v63 = vand.u32 4294901760, %v13842_v45 }
 0x7ea   :  { %v15183_v17 = vpop.permute.xlu1 %15182 }
 0x7eb   :  { %v13844_v15 = vsub.f32 %v13842_v45, %v13843_v63  ;;  %v15192_v8 = vsel %vm6430_vm15, %v15183_v17, %v15185_v61 }
 0x7ec   :  { %v15194_v6 = vmul.f32 %v15192_v8, %v21863_v20 }
 0x7ed   :  { %13452 = vmatmul.mubr.f32.vlgmr.msra.gmra.mrb[16].mxu0 %v22382_v32  ;;  %v13845_v11 = vand.u32 4294901760, %v13844_v15 }
 0x7ee   :  { %13463 = vmatpush1.msra.mxu0 %v13383_v22  ;;  %13526 = vmatprep.mubr.f32.mxu0 %v20959_v36  ;;  %v14243_v22 = vsel %vm1619_vm10, %v22148_v47, 0 }
 0x7ef   :  { %13536 = vmatprep.subr.mxu0 %v13298_v44 }
 0x7f5   :  { %13529 = vmatmul.mubr.f32.vlgmr.msra.gmra.mrb[16].mxu0 %v22385_v27 }
 0x7f6   :  { %13538 = vmatpush1.msra.mxu0 %v13300_v3  ;;  %13601 = vmatprep.mubr.f32.mxu0 %v20959_v36 }
 0x7f7   :  { %13614 = vmatprep.subr.mxu0 %v13378_v24  ;;  %v14715_v24 = vand.u32 4294901760, %v14243_v22 }
 0x7fd   :  { %13605 = vmatmul.mubr.f32.vlgmr.msra.gmra.mrb[16].mxu0 %v22390_v29 }
 0x7fe   :  { %13618 = vmatpush1.msra.mxu0 %v13384_v56  ;;  %13681 = vmatprep.mubr.f32.mxu0 %v20959_v36  ;;  %v14798_v56 = vsub.f32 %v14243_v22, %v14715_v24 }
 0x7ff   :  { %13690 = vmatprep.subr.mxu0 %v13298_v44  ;;  %v14335_v44 = vsub.f32 %v14333_v62, %v14334_v59 }
 0x801   :  { %v14336_v34 = vand.u32 4294901760, %v14335_v44 }
 0x805   :  { %13683 = vmatmul.mubr.f32.vlgmr.msra.gmra.mrb[16].mxu0 %v22382_v32 }
 0x806   :  { %13692 = vmatpush1.msra.mxu0 %v13300_v3  ;;  %13755 = vmatprep.mubr.f32.mxu0 %v20959_v36  ;;  %v14319_v3 = vand.u32 4294901760, %v14318_v39 }
 0x807   :  { %13764 = vmatprep.subr.mxu0 %v13763_v2 }
 0x80d   :  { %13757 = vmatmul.mubr.f32.vlgmr.msra.gmra.mrb[16].mxu0 %v22382_v32 }
 0x80e   :  { %13766 = vmatpush1.msra.mxu0 %v13765_v18  ;;  %13829 = vmatprep.mubr.f32.mxu0 %v20959_v36 }
 0x80f   :  { %13846 = vmatprep.subr.mxu0 %v13845_v11 }
 0x811   :  { %13835 = vmatmul.mubr.f32.vlgmr.msra.gmra.mrb[18].mxu0 %v13369_v21  ;;  %v15199_v21 = vpop.permute.xlu0 %15198 }
 0x812   :  { %13852 = vmatpush1.msra.mxu0 %v13851_v46  ;;  %13915 = vmatprep.mubr.f32.mxu0 %v20959_v36 }
 0x813   :  { %13925 = vmatprep.subr.mxu0 %v13842_v45  ;;  %v15203_v45 = vsel %vm1619_vm10, %v15194_v6, 0 }
 0x815   :  { %v15187_v37 = vpop.permute.xlu0 %15186 }
 0x816   :  { %v15191_v13 = vsel %vm6430_vm15, %v15185_v61, %v15187_v37 }
 0x817   :  { %v15195_v4 = vmul.f32 %v15191_v13, %v21858_v53 }
 0x819   :  { %13917 = vmatmul.mubr.f32.vlgmr.msra.gmra.mrb[18].mxu0 %v22382_v32  ;;  %v15206_v42 = vsel %vm1619_vm10, %v15195_v4, 0 }
 0x81a   :  { %13928 = vmatpush1.msra.mxu0 %v13848_v31  ;;  %13991 = vmatprep.mubr.f32.mxu0 %v20959_v36  ;;  %v15216_v31 = vand.u32 4294901760, %v15203_v45 }
 0x81b   :  { %14001 = vmatprep.subr.mxu0 %v13763_v2 }
 0x81c   :  { %v15299_v20 = vsub.f32 %v15203_v45, %v15216_v31 }
 0x81e   :  { %v15300_v11 = vand.u32 4294901760, %v15299_v20 }
 0x820   :  { %v15301_v9 = vsub.f32 %v15299_v20, %v15300_v11 }
 0x821   :  { %13994 = vmatmul.mubr.f32.vlgmr.msra.gmra.mrb[18].mxu0 %v22385_v27 }
 0x822   :  { %14003 = vmatpush1.msra.mxu0 %v13765_v18  ;;  %14066 = vmatprep.mubr.f32.mxu0 %v20959_v36  ;;  %v15302_v43 = vand.u32 4294901760, %v15301_v9 }
 0x823   :  { %14079 = vmatprep.subr.mxu0 %v13843_v63 }
 0x829   :  { %14070 = vmatmul.mubr.f32.vlgmr.msra.gmra.mrb[18].mxu0 %v22390_v29 }
 0x82a   :  { %14083 = vmatpush1.msra.mxu0 %v13849_v1  ;;  %14146 = vmatprep.mubr.f32.mxu0 %v20959_v36 }
 0x82b   :  { %14155 = vmatprep.subr.mxu0 %v13763_v2  ;;  %v15200_v2 = vsel %vm1616_vm11, %v15199_v21, 0 }
 0x82c   :  { %v22472_v53 = vand.u32 4294901760, %v15200_v2 }
 0x82e   :  { %v22475_v1 = vsub.f32 %v15200_v2, %v22472_v53 }
 0x830   :  { %v22480_v5 = vand.u32 4294901760, %v22475_v1 }
 0x831   :  { %14148 = vmatmul.mubr.f32.vlgmr.msra.gmra.mrb[18].mxu0 %v22382_v32 }
 0x832   :  { %14157 = vmatpush1.msra.mxu0 %v13765_v18  ;;  %14220 = vmatprep.mubr.f32.mxu0 %v20959_v36  ;;  %v15214_v18 = vand.u32 4294901760, %v15206_v42  ;;  %v15284_v10 = vsub.f32 %v22475_v1, %v22480_v5 }
 0x833   :  { %14249 = vmatprep.subr.mxu0 %v14248_v30 }
 0x834   :  { %v15293_v63 = vsub.f32 %v15206_v42, %v15214_v18 }
 0x836   :  { %v15294_v15 = vand.u32 4294901760, %v15293_v63 }
 0x838   :  { %v15295_v46 = vsub.f32 %v15293_v63, %v15294_v15 }
 0x839   :  { %14222 = vmatmul.mubr.f32.vlgmr.msra.gmra.mrb[18].mxu0 %v22382_v32  ;;  %v14246_v32 = vsel %vm1619_vm10, %v22150_v14, 0  ;;  %v14799_v14 = vand.u32 4294901760, %v14798_v56 }
 0x83a   :  { %14251 = vmatpush1.msra.mxu0 %v14250_v28  ;;  %14314 = vmatprep.mubr.f32.mxu0 %v20959_v36  ;;  %v14713_v27 = vand.u32 4294901760, %v14246_v32  ;;  %v15296_v23 = vand.u32 4294901760, %v15295_v46 }
 0x83b   :  { %14331 = vmatprep.subr.mxu0 %v14330_v16  ;;  %v14800_v0 = vsub.f32 %v14798_v56, %v14799_v14 }
 0x83c   :  { %v14792_v29 = vsub.f32 %v14246_v32, %v14713_v27 }
 0x83d   :  { %14320 = vmatmul.mubr.f32.vlgmr.msra.gmra.mrb[16].mxu0 %v14319_v3  ;;  %v14801_v40 = vand.u32 4294901760, %v14800_v0 }
 0x83e   :  { %14337 = vmatpush1.msra.mxu0 %v14336_v34  ;;  %14400 = vmatprep.mubr.f32.mxu0 %v20959_v36  ;;  %v14793_v55 = vand.u32 4294901760, %v14792_v29 }
 0x83f   :  { %14410 = vmatprep.subr.mxu0 %v14327_v26 }
 0x840   :  { %v14794_v7 = vsub.f32 %v14792_v29, %v14793_v55 }
 0x842   :  { %v14795_v47 = vand.u32 4294901760, %v14794_v7 }
 0x845   :  { %14402 = vmatmul.mubr.f32.vlgmr.msra.gmra.mrb[16].mxu0 %v22427_v54 }
 0x846   :  { %14413 = vmatpush1.msra.mxu0 %v14333_v62  ;;  %14476 = vmatprep.mubr.f32.mxu0 %v20959_v36 }
 0x847   :  { %14486 = vmatprep.subr.mxu0 %v14248_v30 }
 0x84d   :  { %14479 = vmatmul.mubr.f32.vlgmr.msra.gmra.mrb[16].mxu0 %v22430_v38 }
 0x84e   :  { %14488 = vmatpush1.msra.mxu0 %v14250_v28  ;;  %14551 = vmatprep.mubr.f32.mxu0 %v20959_v36 }
 0x84f   :  { %14564 = vmatprep.subr.mxu0 %v14328_v41 }
 0x855   :  { %14555 = vmatmul.mubr.f32.vlgmr.msra.gmra.mrb[16].mxu0 %v22435_v57 }
 0x856   :  { %14568 = vmatpush1.msra.mxu0 %v14334_v59  ;;  %14631 = vmatprep.mubr.f32.mxu0 %v20959_v36 }
 0x857   :  { %14640 = vmatprep.subr.mxu0 %v14248_v30  ;;  %v15285_v30 = vand.u32 4294901760, %v15284_v10 }
 0x85d   :  { %14633 = vmatmul.mubr.f32.vlgmr.msra.gmra.mrb[16].mxu0 %v22427_v54 }
 0x85e   :  { %14642 = vmatpush1.msra.mxu0 %v14250_v28  ;;  %14705 = vmatprep.mubr.f32.mxu0 %v20959_v36  ;;  %v15189_v28 = vpop.permute.xlu0 %15188 }
 0x85f   :  { %14714 = vmatprep.subr.mxu0 %v14713_v27  ;;  %v15190_v26 = vsel %vm6430_vm15, %v15187_v37, %v15189_v28 }
 0x860   :  { %v15196_v62 = vmul.f32 %v15190_v26, %v21899_v48 }
 0x862   :  { %v16151_v22 = vpop.permute.xlu0 %16150 }
 0x865   :  { %14707 = vmatmul.mubr.f32.vlgmr.msra.gmra.mrb[16].mxu0 %v22427_v54 }
 0x866   :  { %14716 = vmatpush1.msra.mxu0 %v14715_v24  ;;  %14779 = vmatprep.mubr.f32.mxu0 %v20959_v36 }
 0x867   :  { %14796 = vmatprep.subr.mxu0 %v14795_v47 }
 0x869   :  { %14785 = vmatmul.mubr.f32.vlgmr.msra.gmra.mrb[18].mxu0 %v14319_v3 }
 0x86a   :  { %14802 = vmatpush1.msra.mxu0 %v14801_v40  ;;  %14865 = vmatprep.mubr.f32.mxu0 %v20959_v36 }
 0x86b   :  { %14875 = vmatprep.subr.mxu0 %v14792_v29  ;;  %v16149_v29 = vpop.permute.xlu0 %16148 }
 0x86f   :  { %v17131_v26 = vpop.permute.xlu0 %17130 }
 0x871   :  { %14867 = vmatmul.mubr.f32.vlgmr.msra.gmra.mrb[18].mxu0 %v22427_v54 }
 0x872   :  { %14878 = vmatpush1.msra.mxu0 %v14798_v56  ;;  %14941 = vmatprep.mubr.f32.mxu0 %v20959_v36 }
 0x873   :  { %14951 = vmatprep.subr.mxu0 %v14713_v27 }
 0x879   :  { %14944 = vmatmul.mubr.f32.vlgmr.msra.gmra.mrb[18].mxu0 %v22430_v38 }
 0x87a   :  { %14953 = vmatpush1.msra.mxu0 %v14715_v24  ;;  %15016 = vmatprep.mubr.f32.mxu0 %v20959_v36 }
 0x87b   :  { %15029 = vmatprep.subr.mxu0 %v14793_v55  ;;  %v16158_v55 = vsel %vm7415_vm0, %v16149_v29, %v16151_v22 }
 0x87c   :  { %v16160_v7 = vmul.f32 %v16158_v55, %v21936_v25 }
 0x87e   :  { %v16169_v40 = vsel %vm1619_vm10, %v16160_v7, 0 }
 0x881   :  { %15020 = vmatmul.mubr.f32.vlgmr.msra.gmra.mrb[18].mxu0 %v22435_v57  ;;  %v15209_v57 = vsel %vm1619_vm10, %v15196_v62, 0  ;;  %v17119_v62 = vpop.permute.xlu0 %17118 }
 0x882   :  { %15033 = vmatpush1.msra.mxu0 %v14799_v14  ;;  %15096 = vmatprep.mubr.f32.mxu0 %v20959_v36  ;;  %v15681_v49 = vand.u32 4294901760, %v15209_v57 }
 0x883   :  { %15105 = vmatprep.subr.mxu0 %v14713_v27  ;;  %v16165_v27 = vpop.permute.xlu1 %16164 }
 0x884   :  { %v16166_v47 = vsel %vm1616_vm11, %v16165_v27, 0 }
 0x885   :  { %v22521_v61 = vand.u32 4294901760, %v16166_v47 }
 0x887   :  { %v22524_v13 = vsub.f32 %v16166_v47, %v22521_v61  ;;  %v17121_v47 = vpop.permute.xlu0 %17120 }
 0x889   :  { %15098 = vmatmul.mubr.f32.vlgmr.msra.gmra.mrb[18].mxu0 %v22427_v54  ;;  %v22529_v4 = vand.u32 4294901760, %v22524_v13 }
 0x88a   :  { %15107 = vmatpush1.msra.mxu0 %v14715_v24  ;;  %15170 = vmatprep.mubr.f32.mxu0 %v20959_v36  ;;  %v16153_v24 = vpop.permute.xlu1 %16152 }
 0x88b   :  { %15215 = vmatprep.subr.mxu0 %v15214_v18  ;;  %v16157_v56 = vsel %vm7415_vm0, %v16151_v22, %v16153_v24  ;;  %v16250_v42 = vsub.f32 %v22524_v13, %v22529_v4 }
 0x88c   :  { %v16161_v14 = vmul.f32 %v16157_v56, %v21926_v58  ;;  %v16182_v58 = vand.u32 4294901760, %v16169_v40 }
 0x88d   :  { %v16251_v45 = vand.u32 4294901760, %v16250_v42 }
 0x88e   :  { %v16172_v0 = vsel %vm1619_vm10, %v16161_v14, 0  ;;  %v16265_v25 = vsub.f32 %v16169_v40, %v16182_v58 }
 0x88f   :  { %v16180_v21 = vand.u32 4294901760, %v16172_v0 }
 0x890   :  { %v16266_v8 = vand.u32 4294901760, %v16265_v25 }
 0x891   :  { %15172 = vmatmul.mubr.f32.vlgmr.msra.gmra.mrb[18].mxu0 %v22427_v54  ;;  %v15193_v54 = vsel %vm6430_vm15, %v15189_v28, %v15183_v17  ;;  %v16259_v37 = vsub.f32 %v16172_v0, %v16180_v21 }
 0x892   :  { %15217 = vmatpush1.msra.mxu0 %v15216_v31  ;;  %15280 = vmatprep.mubr.f32.mxu0 %v20959_v36  ;;  %v15197_v38 = vmul.f32 %v15193_v54, %v21894_v50  ;;  %v15764_v50 = vsub.f32 %v15209_v57, %v15681_v49  ;;  %v16267_v2 = vsub.f32 %v16265_v25, %v16266_v8 }
 0x893   :  { %15297 = vmatprep.subr.mxu0 %v15296_v23  ;;  %v16260_v17 = vand.u32 4294901760, %v16259_v37 }
 0x894   :  { %v15212_v41 = vsel %vm1619_vm10, %v15197_v38, 0  ;;  %v15765_v48 = vand.u32 4294901760, %v15764_v50 }
 0x895   :  { %15286 = vmatmul.mubr.f32.vlgmr.msra.gmra.mrb[16].mxu0 %v15285_v30  ;;  %v15679_v59 = vand.u32 4294901760, %v15212_v41  ;;  %v16261_v6 = vsub.f32 %v16259_v37, %v16260_v17 }
 0x896   :  { %15303 = vmatpush1.msra.mxu0 %v15302_v43  ;;  %15366 = vmatprep.mubr.f32.mxu0 %v20959_v36  ;;  %v15766_v3 = vsub.f32 %v15764_v50, %v15765_v48 }
 0x897   :  { %15376 = vmatprep.subr.mxu0 %v15293_v63  ;;  %v15758_v39 = vsub.f32 %v15212_v41, %v15679_v59  ;;  %v16155_v63 = vpop.permute.xlu1 %16154 }
 0x898   :  { %v15767_v32 = vand.u32 4294901760, %v15766_v3 }
 0x899   :  { %v15759_v44 = vand.u32 4294901760, %v15758_v39 }
 0x89b   :  { %v15760_v16 = vsub.f32 %v15758_v39, %v15759_v44  ;;  %v17117_v38 = vpop.permute.xlu1 %17116 }
 0x89c   :  { %v17123_v41 = vsel %vm8400_vm1, %v17117_v38, %v17119_v62 }
 0x89d   :  { %15368 = vmatmul.mubr.f32.vlgmr.msra.gmra.mrb[16].mxu0 %v22472_v53  ;;  %v15761_v34 = vand.u32 4294901760, %v15760_v16 }
 0x89e   :  { %15379 = vmatpush1.msra.mxu0 %v15299_v20  ;;  %15442 = vmatprep.mubr.f32.mxu0 %v20959_v36 }
 0x89f   :  { %15452 = vmatprep.subr.mxu0 %v15214_v18  ;;  %v17115_v57 = vpop.permute.xlu1 %17114 }
 0x8a0   :  { %v17125_v40 = vsel %vm8400_vm1, %v17121_v47, %v17115_v57 }
 0x8a5   :  { %15445 = vmatmul.mubr.f32.vlgmr.msra.gmra.mrb[16].mxu0 %v22475_v1 }
 0x8a6   :  { %15454 = vmatpush1.msra.mxu0 %v15216_v31  ;;  %15517 = vmatprep.mubr.f32.mxu0 %v20959_v36 }
 0x8a7   :  { %15530 = vmatprep.subr.mxu0 %v15294_v15 }
 0x8ad   :  { %15521 = vmatmul.mubr.f32.vlgmr.msra.gmra.mrb[16].mxu0 %v22480_v5 }
 0x8ae   :  { %15534 = vmatpush1.msra.mxu0 %v15300_v11  ;;  %15597 = vmatprep.mubr.f32.mxu0 %v20959_v36 }
 0x8af   :  { %15606 = vmatprep.subr.mxu0 %v15214_v18  ;;  %v16262_v18 = vand.u32 4294901760, %v16261_v6 }
 0x8b5   :  { %15599 = vmatmul.mubr.f32.vlgmr.msra.gmra.mrb[16].mxu0 %v22472_v53 }
 0x8b6   :  { %15608 = vmatpush1.msra.mxu0 %v15216_v31  ;;  %15671 = vmatprep.mubr.f32.mxu0 %v20959_v36  ;;  %v16268_v31 = vand.u32 4294901760, %v16267_v2 }
 0x8b7   :  { %15680 = vmatprep.subr.mxu0 %v15679_v59 }
 0x8bd   :  { %15673 = vmatmul.mubr.f32.vlgmr.msra.gmra.mrb[16].mxu0 %v22472_v53 }
 0x8be   :  { %15682 = vmatpush1.msra.mxu0 %v15681_v49  ;;  %15745 = vmatprep.mubr.f32.mxu0 %v20959_v36 }
 0x8bf   :  { %15762 = vmatprep.subr.mxu0 %v15761_v34 }
 0x8c1   :  { %15751 = vmatmul.mubr.f32.vlgmr.msra.gmra.mrb[18].mxu0 %v15285_v30 }
 0x8c2   :  { %15768 = vmatpush1.msra.mxu0 %v15767_v32  ;;  %15831 = vmatprep.mubr.f32.mxu0 %v20959_v36 }
 0x8c3   :  { %15841 = vmatprep.subr.mxu0 %v15758_v39 }
 0x8c9   :  { %15833 = vmatmul.mubr.f32.vlgmr.msra.gmra.mrb[18].mxu0 %v22472_v53 }
 0x8ca   :  { %15844 = vmatpush1.msra.mxu0 %v15764_v50  ;;  %15907 = vmatprep.mubr.f32.mxu0 %v20959_v36 }
 0x8cb   :  { %15917 = vmatprep.subr.mxu0 %v15679_v59 }
 0x8d1   :  { %15910 = vmatmul.mubr.f32.vlgmr.msra.gmra.mrb[18].mxu0 %v22475_v1  ;;  %v16156_v1 = vsel %vm7415_vm0, %v16153_v24, %v16155_v63 }
 0x8d2   :  { %15919 = vmatpush1.msra.mxu0 %v15681_v49  ;;  %15982 = vmatprep.mubr.f32.mxu0 %v20959_v36  ;;  %v16162_v15 = vmul.f32 %v16156_v1, %v21982_v19 }
 0x8d3   :  { %15995 = vmatprep.subr.mxu0 %v15759_v44  ;;  %v17132_v44 = vsel %vm1616_vm11, %v17131_v26, 0 }
 0x8d4   :  { %v16175_v11 = vsel %vm1619_vm10, %v16162_v15, 0  ;;  %v20923_v15 = vld [vmem:[%s22726_s2 + $0x28] ss:$0 sm:$0xff] }
 0x8d5   :  { %v16647_v10 = vand.u32 4294901760, %v16175_v11 }
 0x8d9   :  { %15986 = vmatmul.mubr.f32.vlgmr.msra.gmra.mrb[18].mxu0 %v22480_v5 }
 0x8da   :  { %15999 = vmatpush1.msra.mxu0 %v15765_v48  ;;  %16062 = vmatprep.mubr.f32.mxu0 %v20959_v36 }
 0x8db   :  { %16071 = vmatprep.subr.mxu0 %v15679_v59  ;;  %v17127_v59 = vmul.f32 %v17123_v41, %v22004_v12  ;;  %v22570_v12 = vand.u32 4294901760, %v17132_v44 }
 0x8dd   :  { %v17138_v50 = vsel %vm1619_vm10, %v17127_v59, 0  ;;  %v22573_v32 = vsub.f32 %v17132_v44, %v22570_v12 }
 0x8de   :  { %v17146_v48 = vand.u32 4294901760, %v17138_v50 }
 0x8df   :  { %v22578_v22 = vand.u32 4294901760, %v22573_v32 }
 0x8e0   :  { %v17225_v34 = vsub.f32 %v17138_v50, %v17146_v48 }
 0x8e1   :  { %16064 = vmatmul.mubr.f32.vlgmr.msra.gmra.mrb[18].mxu0 %v22472_v53  ;;  %v17216_v56 = vsub.f32 %v22573_v32, %v22578_v22 }
 0x8e2   :  { %16073 = vmatpush1.msra.mxu0 %v15681_v49  ;;  %16136 = vmatprep.mubr.f32.mxu0 %v20959_v36  ;;  %v17124_v49 = vsel %vm8400_vm1, %v17115_v57, %v17117_v38  ;;  %v17226_v27 = vand.u32 4294901760, %v17225_v34 }
 0x8e3   :  { %16181 = vmatprep.subr.mxu0 %v16180_v21  ;;  %v17126_v39 = vmul.f32 %v17124_v49, %v22009_v51  ;;  %v17217_v7 = vand.u32 4294901760, %v17216_v56 }
 0x8e5   :  { %v17135_v16 = vsel %vm1619_vm10, %v17126_v39, 0 }
 0x8e6   :  { %v17148_v3 = vand.u32 4294901760, %v17135_v16 }
 0x8e8   :  { %v17231_v51 = vsub.f32 %v17135_v16, %v17148_v3 }
 0x8e9   :  { %16138 = vmatmul.mubr.f32.vlgmr.msra.gmra.mrb[18].mxu0 %v22472_v53  ;;  %v16159_v53 = vsel %vm7415_vm0, %v16155_v63, %v16149_v29  ;;  %v17227_v29 = vsub.f32 %v17225_v34, %v17226_v27 }
 0x8ea   :  { %16183 = vmatpush1.msra.mxu0 %v16182_v58  ;;  %16246 = vmatprep.mubr.f32.mxu0 %v20959_v36  ;;  %v16163_v20 = vmul.f32 %v16159_v53, %v21972_v33  ;;  %v16730_v33 = vsub.f32 %v16175_v11, %v16647_v10  ;;  %v17232_v24 = vand.u32 4294901760, %v17231_v51  ;;  %v20924_v11 = vld [vmem:[%s22726_s2 + $0x20] ss:$0 sm:$0xff] }
 0x8eb   :  { %16263 = vmatprep.subr.mxu0 %v16262_v18  ;;  %v17228_v14 = vand.u32 4294901760, %v17227_v29 }
 0x8ec   :  { %v16178_v5 = vsel %vm1619_vm10, %v16163_v20, 0  ;;  %v16731_v19 = vand.u32 4294901760, %v16730_v33  ;;  %v17233_v55 = vsub.f32 %v17231_v51, %v17232_v24 }
 0x8ed   :  { %16252 = vmatmul.mubr.f32.vlgmr.msra.gmra.mrb[16].mxu0 %v16251_v45  ;;  %v16645_v46 = vand.u32 4294901760, %v16178_v5 }
 0x8ee   :  { %16269 = vmatpush1.msra.mxu0 %v16268_v31  ;;  %16332 = vmatprep.mubr.f32.mxu0 %v20959_v36  ;;  %v16732_v43 = vsub.f32 %v16730_v33, %v16731_v19  ;;  %v17234_v0 = vand.u32 4294901760, %v17233_v55  ;;  %v18083_v31 = vpop.permute.xlu0 %18082 }
 0x8ef   :  { %16342 = vmatprep.subr.mxu0 %v16259_v37  ;;  %v16724_v9 = vsub.f32 %v16178_v5, %v16645_v46 }
 0x8f0   :  { %v16733_v54 = vand.u32 4294901760, %v16732_v43 }
 0x8f1   :  { %v16725_v23 = vand.u32 4294901760, %v16724_v9 }
 0x8f2   :  { %v18081_v53 = vpop.permute.xlu0 %18080 }
 0x8f3   :  { %v16726_v30 = vsub.f32 %v16724_v9, %v16725_v23  ;;  %v18090_v20 = vsel %vm9385_vm2, %v18081_v53, %v18083_v31 }
 0x8f5   :  { %16334 = vmatmul.mubr.f32.vlgmr.msra.gmra.mrb[16].mxu0 %v22521_v61  ;;  %v16727_v28 = vand.u32 4294901760, %v16726_v30 }
 0x8f6   :  { %16345 = vmatpush1.msra.mxu0 %v16265_v25  ;;  %16408 = vmatprep.mubr.f32.mxu0 %v20959_v36 }
 0x8f7   :  { %16418 = vmatprep.subr.mxu0 %v16180_v21 }
 0x8fd   :  { %16411 = vmatmul.mubr.f32.vlgmr.msra.gmra.mrb[16].mxu0 %v22524_v13 }
 0x8fe   :  { %16420 = vmatpush1.msra.mxu0 %v16182_v58  ;;  %16483 = vmatprep.mubr.f32.mxu0 %v20959_v36 }
 0x8ff   :  { %16496 = vmatprep.subr.mxu0 %v16260_v17 }
 0x905   :  { %16487 = vmatmul.mubr.f32.vlgmr.msra.gmra.mrb[16].mxu0 %v22529_v4 }
 0x906   :  { %16500 = vmatpush1.msra.mxu0 %v16266_v8  ;;  %16563 = vmatprep.mubr.f32.mxu0 %v20959_v36 }
 0x907   :  { %16572 = vmatprep.subr.mxu0 %v16180_v21  ;;  %v17122_v21 = vsel %vm8400_vm1, %v17119_v62, %v17121_v47 }
 0x90d   :  { %16565 = vmatmul.mubr.f32.vlgmr.msra.gmra.mrb[16].mxu0 %v22521_v61 }
 0x90e   :  { %16574 = vmatpush1.msra.mxu0 %v16182_v58  ;;  %16637 = vmatprep.mubr.f32.mxu0 %v20959_v36  ;;  %v17128_v58 = vmul.f32 %v17122_v21, %v22045_v52  ;;  %v19060_v21 = vld [vmem:[%s22731_s7] sm:$0x7]  ;;  %s20972_s7 = smov [#allocation4]  }
 0x90f   :  { %16646 = vmatprep.subr.mxu0 %v16645_v46 }
 0x915   :  { %16639 = vmatmul.mubr.f32.vlgmr.msra.gmra.mrb[16].mxu0 %v22521_v61 }
 0x916   :  { %16648 = vmatpush1.msra.mxu0 %v16647_v10  ;;  %16711 = vmatprep.mubr.f32.mxu0 %v20959_v36 }
 0x917   :  { %16728 = vmatprep.subr.mxu0 %v16727_v28 }
 0x919   :  { %16717 = vmatmul.mubr.f32.vlgmr.msra.gmra.mrb[18].mxu0 %v16251_v45  ;;  %v18097_v45 = vpop.permute.xlu1 %18096 }
 0x91a   :  { %16734 = vmatpush1.msra.mxu0 %v16733_v54  ;;  %16797 = vmatprep.mubr.f32.mxu0 %v20959_v36 }
 0x91b   :  { %16807 = vmatprep.subr.mxu0 %v16724_v9  ;;  %v18098_v9 = vsel %vm1616_vm11, %v18097_v45, 0 }
 0x91d   :  { %v18085_v63 = vpop.permute.xlu1 %18084 }
 0x91e   :  { %v18089_v1 = vsel %vm9385_vm2, %v18083_v31, %v18085_v63 }
 0x91f   :  { %v18093_v5 = vmul.f32 %v20923_v15, %v18089_v1 }
 0x921   :  { %16799 = vmatmul.mubr.f32.vlgmr.msra.gmra.mrb[18].mxu0 %v22521_v61  ;;  %v18087_v44 = vpop.permute.xlu1 %18086 }
 0x922   :  { %16810 = vmatpush1.msra.mxu0 %v16730_v33  ;;  %16873 = vmatprep.mubr.f32.mxu0 %v20959_v36  ;;  %v18088_v16 = vsel %vm9385_vm2, %v18085_v63, %v18087_v44 }
 0x923   :  { %16883 = vmatprep.subr.mxu0 %v16645_v46 }
 0x929   :  { %16876 = vmatmul.mubr.f32.vlgmr.msra.gmra.mrb[18].mxu0 %v22524_v13  ;;  %v17141_v13 = vsel %vm1619_vm10, %v17128_v58, 0 }
 0x92a   :  { %16885 = vmatpush1.msra.mxu0 %v16647_v10  ;;  %16948 = vmatprep.mubr.f32.mxu0 %v20959_v36  ;;  %v17613_v17 = vand.u32 4294901760, %v17141_v13 }
 0x92b   :  { %16961 = vmatprep.subr.mxu0 %v16725_v23 }
 0x931   :  { %16952 = vmatmul.mubr.f32.vlgmr.msra.gmra.mrb[18].mxu0 %v22529_v4 }
 0x932   :  { %16965 = vmatpush1.msra.mxu0 %v16731_v19  ;;  %17028 = vmatprep.mubr.f32.mxu0 %v20959_v36  ;;  %v22623_v19 = vand.u32 4294901760, %v18098_v9 }
 0x933   :  { %17037 = vmatprep.subr.mxu0 %v16645_v46  ;;  %v18092_v46 = vmul.f32 %v20924_v11, %v18090_v20 }
 0x934   :  { %v22626_v28 = vsub.f32 %v18098_v9, %v22623_v19 }
 0x935   :  { %v18101_v33 = vsel %vm1619_vm10, %v18092_v46, 0 }
 0x936   :  { %v18114_v30 = vand.u32 4294901760, %v18101_v33  ;;  %v22631_v38 = vand.u32 4294901760, %v22626_v28 }
 0x938   :  { %v18197_v54 = vsub.f32 %v18101_v33, %v18114_v30  ;;  %v18182_v57 = vsub.f32 %v22626_v28, %v22631_v38 }
 0x939   :  { %17030 = vmatmul.mubr.f32.vlgmr.msra.gmra.mrb[18].mxu0 %v22521_v61 }
 0x93a   :  { %17039 = vmatpush1.msra.mxu0 %v16647_v10  ;;  %17102 = vmatprep.mubr.f32.mxu0 %v20959_v36  ;;  %v18104_v10 = vsel %vm1619_vm10, %v18093_v5, 0  ;;  %v18198_v62 = vand.u32 4294901760, %v18197_v54  ;;  %v18183_v39 = vand.u32 4294901760, %v18182_v57 }
 0x93b   :  { %17147 = vmatprep.subr.mxu0 %v17146_v48  ;;  %v18112_v23 = vand.u32 4294901760, %v18104_v10 }
 0x93c   :  { %v18199_v59 = vsub.f32 %v18197_v54, %v18198_v62 }
 0x93d   :  { %v18191_v43 = vsub.f32 %v18104_v10, %v18112_v23 }
 0x93e   :  { %v18200_v50 = vand.u32 4294901760, %v18199_v59 }
 0x93f   :  { %v18192_v26 = vand.u32 4294901760, %v18191_v43 }
 0x941   :  { %17104 = vmatmul.mubr.f32.vlgmr.msra.gmra.mrb[18].mxu0 %v22521_v61  ;;  %v17129_v61 = vmul.f32 %v17125_v40, %v22040_v35  ;;  %v17696_v35 = vsub.f32 %v17141_v13, %v17613_v17  ;;  %v18193_v41 = vsub.f32 %v18191_v43, %v18192_v26  ;;  %v19061_v40 = vld [vmem:[%s22732_s8] sm:$0x7]  ;;  %s20044_s8 = sshll.u32 %s20972_s7, 4  ;;  %s20045_s8 = int_to_ptr.vmem [resolvable:$true] %s20044_s8 }
 0x942   :  { %17149 = vmatpush1.msra.mxu0 %v17148_v3  ;;  %17212 = vmatprep.mubr.f32.mxu0 %v20959_v36  ;;  %s20927_s25 = scalar_lea.vmem %s20045_s8, 256  ;;  %p20932_p1 = scmp.lt.s32.totalorder %s20045_s8, %s20045_s8 }
 0x943   :  { %17229 = vmatprep.subr.mxu0 %v17228_v14  ;;  %v17144_v37 = vsel %vm1619_vm10, %v17129_v61, 0  ;;  %v17697_v52 = vand.u32 4294901760, %v17696_v35  ;;  %v18194_v49 = vand.u32 4294901760, %v18193_v41  ;;  %19064 = vperm.xlu1 %20909, %v19061_v40   ;;  %v19068_v61 = vsel %vm1616_vm11, %v19060_v21, 0  ;;  %p20928_p0 = scmp.ne.s32.totalorder %s20045_s8, %s20927_s25  ;;  %p20933_p2 = scmp.lt.s32.totalorder %s20927_s25, %s20927_s25 }
 0x944   :  { %v17611_v25 = vand.u32 4294901760, %v17144_v37  ;;  %v22677_v58 = vand.u32 4294901760, %v19068_v61 }
 0x945   :  { %17218 = vmatmul.mubr.f32.vlgmr.msra.gmra.mrb[16].mxu0 %v17217_v7  ;;  %v17698_v42 = vsub.f32 %v17696_v35, %v17697_v52  ;;  %p20934_p3 = por %p20933_p2, %p20932_p1 }
 0x946   :  { %17235 = vmatpush1.msra.mxu0 %v17234_v0  ;;  %17298 = vmatprep.mubr.f32.mxu0 %v20959_v36  ;;  %v17690_v4 = vsub.f32 %v17144_v37, %v17611_v25  ;;  %v22680_v37 = vsub.f32 %v19068_v61, %v22677_v58 }
 0x947   :  { %17308 = vmatprep.subr.mxu0 %v17225_v34  ;;  %v17699_v18 = vand.u32 4294901760, %v17698_v42  ;;  %v20926_v34 = vld [vmem:[%s22726_s2 + $0x30] ss:$0 sm:$0xff]  ;;  %p20935_p4 = pnand %p20934_p3, %p20928_p0 }
 0x948   :  { %v17691_v8 = vand.u32 4294901760, %v17690_v4  ;;  %v22683_v13 = vand.u32 4294901760, %v22680_v37 }
 0x94a   :  { %v17692_v6 = vsub.f32 %v17690_v4, %v17691_v8 }
 0x94c   :  { %v17693_v2 = vand.u32 4294901760, %v17692_v6  ;;  %v19152_v6 = vsub.f32 %v22680_v37, %v22683_v13 }
 0x94d   :  { %17300 = vmatmul.mubr.f32.vlgmr.msra.gmra.mrb[16].mxu0 %v22570_v12 }
 0x94e   :  { %17311 = vmatpush1.msra.mxu0 %v17231_v51  ;;  %17374 = vmatprep.mubr.f32.mxu0 %v20959_v36  ;;  %v19153_v63 = vand.u32 4294901760, %v19152_v6 }
 0x94f   :  { %17384 = vmatprep.subr.mxu0 %v17146_v48 }
 0x955   :  { %17377 = vmatmul.mubr.f32.vlgmr.msra.gmra.mrb[16].mxu0 %v22573_v32 }
 0x956   :  { %17386 = vmatpush1.msra.mxu0 %v17148_v3  ;;  %17449 = vmatprep.mubr.f32.mxu0 %v20959_v36 }
 0x957   :  { %17462 = vmatprep.subr.mxu0 %v17226_v27 }
 0x95d   :  { %17453 = vmatmul.mubr.f32.vlgmr.msra.gmra.mrb[16].mxu0 %v22578_v22 }
 0x95e   :  { %17466 = vmatpush1.msra.mxu0 %v17232_v24  ;;  %17529 = vmatprep.mubr.f32.mxu0 %v20959_v36 }
 0x95f   :  { %17538 = vmatprep.subr.mxu0 %v17146_v48  ;;  %v18091_v48 = vsel %vm9385_vm2, %v18087_v44, %v18081_v53 }
 0x965   :  { %17531 = vmatmul.mubr.f32.vlgmr.msra.gmra.mrb[16].mxu0 %v22570_v12 }
 0x966   :  { %17540 = vmatpush1.msra.mxu0 %v17148_v3  ;;  %17603 = vmatprep.mubr.f32.mxu0 %v20959_v36 }
 0x967   :  { %17612 = vmatprep.subr.mxu0 %v17611_v25 }
 0x96d   :  { %17605 = vmatmul.mubr.f32.vlgmr.msra.gmra.mrb[16].mxu0 %v22570_v12 }
 0x96e   :  { %17614 = vmatpush1.msra.mxu0 %v17613_v17  ;;  %17677 = vmatprep.mubr.f32.mxu0 %v20959_v36 }
 0x96f   :  { %17694 = vmatprep.subr.mxu0 %v17693_v2 }
 0x971   :  { %17683 = vmatmul.mubr.f32.vlgmr.msra.gmra.mrb[18].mxu0 %v17217_v7 }
 0x972   :  { %17700 = vmatpush1.msra.mxu0 %v17699_v18  ;;  %17763 = vmatprep.mubr.f32.mxu0 %v20959_v36 }
 0x973   :  { %17773 = vmatprep.subr.mxu0 %v17690_v4 }
 0x979   :  { %17765 = vmatmul.mubr.f32.vlgmr.msra.gmra.mrb[18].mxu0 %v22570_v12 }
 0x97a   :  { %17776 = vmatpush1.msra.mxu0 %v17696_v35  ;;  %17839 = vmatprep.mubr.f32.mxu0 %v20959_v36 }
 0x97b   :  { %17849 = vmatprep.subr.mxu0 %v17611_v25 }
 0x981   :  { %17842 = vmatmul.mubr.f32.vlgmr.msra.gmra.mrb[18].mxu0 %v22573_v32  ;;  %v18094_v32 = vmul.f32 %v20926_v34, %v18088_v16 }
 0x982   :  { %17851 = vmatpush1.msra.mxu0 %v17613_v17  ;;  %17914 = vmatprep.mubr.f32.mxu0 %v20959_v36 }
 0x983   :  { %17927 = vmatprep.subr.mxu0 %v17691_v8  ;;  %v18107_v27 = vsel %vm1619_vm10, %v18094_v32, 0 }
 0x989   :  { %17918 = vmatmul.mubr.f32.vlgmr.msra.gmra.mrb[18].mxu0 %v22578_v22  ;;  %v18579_v22 = vand.u32 4294901760, %v18107_v27 }
 0x98a   :  { %17931 = vmatpush1.msra.mxu0 %v17697_v52  ;;  %17994 = vmatprep.mubr.f32.mxu0 %v20959_v36 }
 0x98b   :  { %18003 = vmatprep.subr.mxu0 %v17611_v25  ;;  %v18662_v29 = vsub.f32 %v18107_v27, %v18579_v22  ;;  %v19050_v25 = vpop.permute.xlu0 %19049 }
 0x98d   :  { %v18663_v55 = vand.u32 4294901760, %v18662_v29 }
 0x98f   :  { %v18664_v7 = vsub.f32 %v18662_v29, %v18663_v55 }
 0x991   :  { %17996 = vmatmul.mubr.f32.vlgmr.msra.gmra.mrb[18].mxu0 %v22570_v12  ;;  %v18665_v47 = vand.u32 4294901760, %v18664_v7 }
 0x992   :  { %18005 = vmatpush1.msra.mxu0 %v17613_v17  ;;  %18068 = vmatprep.mubr.f32.mxu0 %v20959_v36 }
 0x993   :  { %18113 = vmatprep.subr.mxu0 %v18112_v23 }
 0x999   :  { %18070 = vmatmul.mubr.f32.vlgmr.msra.gmra.mrb[18].mxu0 %v22570_v12  ;;  %v20925_v12 = vld [vmem:[%s22726_s2 + $0x38] ss:$0 sm:$0xff] }
 0x99a   :  { %18115 = vmatpush1.msra.mxu0 %v18114_v30  ;;  %18178 = vmatprep.mubr.f32.mxu0 %v20959_v36  ;;  %v18095_v3 = vmul.f32 %v20925_v12, %v18091_v48 }
 0x99b   :  { %18195 = vmatprep.subr.mxu0 %v18194_v49 }
 0x99c   :  { %v18110_v51 = vsel %vm1619_vm10, %v18095_v3, 0 }
 0x99d   :  { %18184 = vmatmul.mubr.f32.vlgmr.msra.gmra.mrb[16].mxu0 %v18183_v39  ;;  %v18577_v60 = vand.u32 4294901760, %v18110_v51 }
 0x99e   :  { %18201 = vmatpush1.msra.mxu0 %v18200_v50  ;;  %18264 = vmatprep.mubr.f32.mxu0 %v20959_v36 }
 0x99f   :  { %18274 = vmatprep.subr.mxu0 %v18191_v43  ;;  %v18656_v24 = vsub.f32 %v18110_v51, %v18577_v60 }
 0x9a1   :  { %v18657_v56 = vand.u32 4294901760, %v18656_v24 }
 0x9a3   :  { %v18658_v14 = vsub.f32 %v18656_v24, %v18657_v56 }
 0x9a5   :  { %18266 = vmatmul.mubr.f32.vlgmr.msra.gmra.mrb[16].mxu0 %v22623_v19  ;;  %v18659_v0 = vand.u32 4294901760, %v18658_v14 }
 0x9a6   :  { %18277 = vmatpush1.msra.mxu0 %v18197_v54  ;;  %18340 = vmatprep.mubr.f32.mxu0 %v20959_v36 }
 0x9a7   :  { %18350 = vmatprep.subr.mxu0 %v18112_v23 }
 0x9ad   :  { %18343 = vmatmul.mubr.f32.vlgmr.msra.gmra.mrb[16].mxu0 %v22626_v28 }
 0x9ae   :  { %18352 = vmatpush1.msra.mxu0 %v18114_v30  ;;  %18415 = vmatprep.mubr.f32.mxu0 %v20959_v36 }
 0x9af   :  { %18428 = vmatprep.subr.mxu0 %v18192_v26 }
 0x9b5   :  { %18419 = vmatmul.mubr.f32.vlgmr.msra.gmra.mrb[16].mxu0 %v22631_v38 }
 0x9b6   :  { %18432 = vmatpush1.msra.mxu0 %v18198_v62  ;;  %18495 = vmatprep.mubr.f32.mxu0 %v20959_v36 }
 0x9b7   :  { %18504 = vmatprep.subr.mxu0 %v18112_v23 }
 0x9bd   :  { %18497 = vmatmul.mubr.f32.vlgmr.msra.gmra.mrb[16].mxu0 %v22623_v19 }
 0x9be   :  { %18506 = vmatpush1.msra.mxu0 %v18114_v30  ;;  %18569 = vmatprep.mubr.f32.mxu0 %v20959_v36 }
 0x9bf   :  { %18578 = vmatprep.subr.mxu0 %v18577_v60 }
 0x9c2   :  { %v19065_v48 = vpop.permute.xlu1 %19064 }
 0x9c5   :  { %18571 = vmatmul.mubr.f32.vlgmr.msra.gmra.mrb[16].mxu0 %v22623_v19 }
 0x9c6   :  { %18580 = vmatpush1.msra.mxu0 %v18579_v22  ;;  %18643 = vmatprep.mubr.f32.mxu0 %v20959_v36 }
 0x9c7   :  { %18660 = vmatprep.subr.mxu0 %v18659_v0 }
 0x9c9   :  { %18649 = vmatmul.mubr.f32.vlgmr.msra.gmra.mrb[18].mxu0 %v18183_v39 }
 0x9ca   :  { %18666 = vmatpush1.msra.mxu0 %v18665_v47  ;;  %18729 = vmatprep.mubr.f32.mxu0 %v20959_v36 }
 0x9cb   :  { %18739 = vmatprep.subr.mxu0 %v18656_v24 }
 0x9d1   :  { %18731 = vmatmul.mubr.f32.vlgmr.msra.gmra.mrb[18].mxu0 %v22623_v19 }
 0x9d2   :  { %18742 = vmatpush1.msra.mxu0 %v18662_v29  ;;  %18805 = vmatprep.mubr.f32.mxu0 %v20959_v36 }
 0x9d3   :  { %18815 = vmatprep.subr.mxu0 %v18577_v60 }
 0x9d9   :  { %18808 = vmatmul.mubr.f32.vlgmr.msra.gmra.mrb[18].mxu0 %v22626_v28 }
 0x9da   :  { %18817 = vmatpush1.msra.mxu0 %v18579_v22  ;;  %18880 = vmatprep.mubr.f32.mxu0 %v20959_v36 }
 0x9db   :  { %18893 = vmatprep.subr.mxu0 %v18657_v56 }
 0x9e1   :  { %18884 = vmatmul.mubr.f32.vlgmr.msra.gmra.mrb[18].mxu0 %v22631_v38 }
 0x9e2   :  { %18897 = vmatpush1.msra.mxu0 %v18663_v55  ;;  %18960 = vmatprep.mubr.f32.mxu0 %v20959_v36 }
 0x9e3   :  { %18969 = vmatprep.subr.mxu0 %v18577_v60 }
 0x9e9   :  { %18962 = vmatmul.mubr.f32.vlgmr.msra.gmra.mrb[18].mxu0 %v22623_v19 }
 0x9ea   :  { %18971 = vmatpush1.msra.mxu0 %v18579_v22  ;;  %19034 = vmatprep.mubr.f32.mxu0 %v20959_v36 }
 0x9f1   :  { %19036 = vmatmul.mubr.f32.vlgmr.msra.gmra.mrb[18].mxu0 %v22623_v19 }
 0xa98   :  { %v18572_v17 = vpop.f32.mrb[16].mxu0 }
 0xa99   :  { %v19052_v4 = vadd.f32 %v19050_v25, %v18572_v17  ;;  %v18574_v35 = vpop.f32.mrb[17].mxu0 }
 0xa9a   :  { %v19053_v8 = vadd.f32 %v19050_v25, %v18574_v35 }
 0xa9b   :  { %v19056_v52 = vmax.f32 %v19052_v4, 0.0 }
 0xa9c   :  { %v19057_v42 = vmax.f32 %v19053_v8, 0.0 }
 0xa9d   :  { %v19071_v2 = vsel %vm1619_vm10, %v19056_v52, 0 }
 0xa9e   :  { %v19084_v18 = vand.u32 4294901760, %v19071_v2  ;;  %v19074_v45 = vsel %vm1619_vm10, %v19057_v42, 0 }
 0xa9f   :  { %v19082_v31 = vand.u32 4294901760, %v19074_v45 }
 0xaa0   :  { %v19167_v53 = vsub.f32 %v19071_v2, %v19084_v18 }
 0xaa1   :  { %v19161_v1 = vsub.f32 %v19074_v45, %v19082_v31  ;;  %19083 = vmatprep.subr.mxu1 %v19082_v31 }
 0xaa2   :  { %v19168_v20 = vand.u32 4294901760, %v19167_v53  ;;  %19085 = vmatpush1.msra.mxu1 %v19084_v18 }
 0xaa3   :  { %19154 = vmatmul.mubr.f32.vlgmr.msra.gmra.mrb[20].mxu1 %v19153_v63  ;;  %v19162_v15 = vand.u32 4294901760, %v19161_v1 }
 0xaa4   :  { %v19169_v5 = vsub.f32 %v19167_v53, %v19168_v20  ;;  %19234 = vmatprep.mubr.f32.mxu1 %v20959_v36 }
 0xaa5   :  { %v19163_v11 = vsub.f32 %v19161_v1, %v19162_v15 }
 0xaa6   :  { %v19170_v10 = vand.u32 4294901760, %v19169_v5 }
 0xaa7   :  { %v19164_v46 = vand.u32 4294901760, %v19163_v11 }
 0xaa9   :  { %19165 = vmatprep.subr.mxu1 %v19164_v46 }
 0xaaa   :  { %19171 = vmatpush1.msra.mxu1 %v19170_v10 }
 0xaab   :  { %19236 = vmatmul.mubr.f32.vlgmr.msra.gmra.mrb[20].mxu1 %v22677_v58  ;;  %19244 = vmatprep.subr.mxu1 %v19161_v1 }
 0xaac   :  { %19247 = vmatpush1.msra.mxu1 %v19167_v53  ;;  %19310 = vmatprep.mubr.f32.mxu1 %v20959_v36 }
 0xaad   :  { %19320 = vmatprep.subr.mxu1 %v19082_v31 }
 0xab3   :  { %19313 = vmatmul.mubr.f32.vlgmr.msra.gmra.mrb[20].mxu1 %v22680_v37 }
 0xab4   :  { %19322 = vmatpush1.msra.mxu1 %v19084_v18  ;;  %19385 = vmatprep.mubr.f32.mxu1 %v20959_v36 }
 0xab5   :  { %19398 = vmatprep.subr.mxu1 %v19162_v15 }
 0xabb   :  { %19389 = vmatmul.mubr.f32.vlgmr.msra.gmra.mrb[20].mxu1 %v22683_v13 }
 0xabc   :  { %19402 = vmatpush1.msra.mxu1 %v19168_v20  ;;  %19465 = vmatprep.mubr.f32.mxu1 %v20959_v36 }
 0xabd   :  { %19474 = vmatprep.subr.mxu1 %v19082_v31 }
 0xac3   :  { %19467 = vmatmul.mubr.f32.vlgmr.msra.gmra.mrb[20].mxu1 %v22677_v58 }
 0xac4   :  { %19476 = vmatpush1.msra.mxu1 %v19084_v18  ;;  %v19037_v9 = vpop.f32.mrb[18].mxu0  ;;  %19539 = vmatprep.mubr.f32.mxu1 %v20959_v36 }
 0xac5   :  { %v19054_v33 = vadd.f32 %v19050_v25, %v19037_v9  ;;  %v19039_v23 = vpop.f32.mrb[19].mxu0 }
 0xac6   :  { %v19055_v19 = vadd.f32 %v19050_v25, %v19039_v23 }
 0xac7   :  { %v19058_v30 = vmax.f32 %v19054_v33, 0.0 }
 0xac8   :  { %v19059_v43 = vmax.f32 %v19055_v19, 0.0 }
 0xac9   :  { %v19077_v28 = vsel %vm1619_vm10, %v19058_v30, 0 }
 0xaca   :  { %v19549_v54 = vand.u32 4294901760, %v19077_v28  ;;  %v19080_v26 = vsel %vm1619_vm10, %v19059_v43, 0 }
 0xacb   :  { %v19547_v38 = vand.u32 4294901760, %v19080_v26  ;;  %19541 = vmatmul.mubr.f32.vlgmr.msra.gmra.mrb[20].mxu1 %v22677_v58 }
 0xacc   :  { %v19632_v62 = vsub.f32 %v19077_v28, %v19549_v54  ;;  %19613 = vmatprep.mubr.f32.mxu1 %v20959_v36 }
 0xacd   :  { %v19626_v41 = vsub.f32 %v19080_v26, %v19547_v38  ;;  %19548 = vmatprep.subr.mxu1 %v19547_v38 }
 0xace   :  { %v19633_v57 = vand.u32 4294901760, %v19632_v62  ;;  %19550 = vmatpush1.msra.mxu1 %v19549_v54 }
 0xacf   :  { %19619 = vmatmul.mubr.f32.vlgmr.msra.gmra.mrb[22].mxu1 %v19153_v63  ;;  %v19627_v59 = vand.u32 4294901760, %v19626_v41 }
 0xad0   :  { %v19634_v49 = vsub.f32 %v19632_v62, %v19633_v57  ;;  %19699 = vmatprep.mubr.f32.mxu1 %v20959_v36 }
 0xad1   :  { %v19628_v39 = vsub.f32 %v19626_v41, %v19627_v59 }
 0xad2   :  { %v19635_v44 = vand.u32 4294901760, %v19634_v49 }
 0xad3   :  { %v19629_v50 = vand.u32 4294901760, %v19628_v39 }
 0xad5   :  { %19630 = vmatprep.subr.mxu1 %v19629_v50 }
 0xad6   :  { %19636 = vmatpush1.msra.mxu1 %v19635_v44 }
 0xad7   :  { %19701 = vmatmul.mubr.f32.vlgmr.msra.gmra.mrb[22].mxu1 %v22677_v58  ;;  %19709 = vmatprep.subr.mxu1 %v19626_v41 }
 0xad8   :  { %19712 = vmatpush1.msra.mxu1 %v19632_v62  ;;  %19775 = vmatprep.mubr.f32.mxu1 %v20959_v36 }
 0xad9   :  { %19785 = vmatprep.subr.mxu1 %v19547_v38 }
 0xadf   :  { %19778 = vmatmul.mubr.f32.vlgmr.msra.gmra.mrb[22].mxu1 %v22680_v37 }
 0xae0   :  { %19787 = vmatpush1.msra.mxu1 %v19549_v54  ;;  %19850 = vmatprep.mubr.f32.mxu1 %v20959_v36 }
 0xae1   :  { %19863 = vmatprep.subr.mxu1 %v19627_v59 }
 0xae7   :  { %19854 = vmatmul.mubr.f32.vlgmr.msra.gmra.mrb[22].mxu1 %v22683_v13 }
 0xae8   :  { %19867 = vmatpush1.msra.mxu1 %v19633_v57  ;;  %19930 = vmatprep.mubr.f32.mxu1 %v20959_v36 }
 0xae9   :  { %19939 = vmatprep.subr.mxu1 %v19547_v38 }
 0xaef   :  { %19932 = vmatmul.mubr.f32.vlgmr.msra.gmra.mrb[22].mxu1 %v22677_v58 }
 0xaf0   :  { %19941 = vmatpush1.msra.mxu1 %v19549_v54  ;;  %20004 = vmatprep.mubr.f32.mxu1 %v20959_v36 }
 0xaf7   :  { %20006 = vmatmul.mubr.f32.vlgmr.msra.gmra.mrb[22].mxu1 %v22677_v58 }
 0xb9e   :  { %v19542_v16 = vpop.f32.mrb[20].mxu1 }
 0xb9f   :  { %v20374_v12 = vadd.f32 %v19542_v16, %v19065_v48  ;;  %v19544_v3 = vpop.f32.mrb[21].mxu1 }
 0xba0   :  { %v20375_v34 = vadd.f32 %v19544_v3, %v19065_v48 }
 0xba1   :  { %v20012_v32 = vmul.f32 0.5, %v20374_v12 }
 0xba2   :  { %v20013_v51 = vmul.f32 0.5, %v20375_v34 }
 0xba3   :  { %20911 = vtanh.f32 %v20012_v32 }
 0xba4   :  { %20913 = vtanh.f32 %v20013_v51 }
 0xbad   :  { %v20912_v27 = vpop.eup %20911 }
 0xbae   :  { %v20914_v60 = vpop.eup %20913  ;;  %v20020_v22 = vmul.f32 0.5, %v20912_v27 }
 0xbaf   :  { %v20021_v24 = vmul.f32 0.5, %v20914_v60 }
 0xbb0   :  { %v20024_v29 = vadd.f32 0.5, %v20020_v22 }
 0xbb1   :  { %v20025_v56 = vadd.f32 0.5, %v20021_v24 }
 0xbb3   :  { %v20032_v55 = vcombine.low %v20024_v29, %v20025_v56 }
 0xbb5   :  { %20036 = vst [vmem:[#allocation4] sm:$0x77] %v20032_v55 }
 0xbca   :  { %v20007_v36 = vpop.f32.mrb[22].mxu1 }
 0xbcb   :  { %v20376_v14 = vadd.f32 %v20007_v36, %v19065_v48  ;;  %v20009_v7 = vpop.f32.mrb[23].mxu1 }
 0xbcc   :  { %v20377_v0 = vadd.f32 %v20009_v7, %v19065_v48 }
 0xbcd   :  { %v20014_v47 = vmul.f32 0.5, %v20376_v14 }
 0xbce   :  { %v20015_v40 = vmul.f32 0.5, %v20377_v0 }
 0xbcf   :  { %20915 = vtanh.f32 %v20014_v47 }
 0xbd0   :  { %20917 = vtanh.f32 %v20015_v40 }
 0xbd9   :  { %v20916_v21 = vpop.eup %20915 }
 0xbda   :  { %v20918_v61 = vpop.eup %20917  ;;  %v20022_v58 = vmul.f32 0.5, %v20916_v21 }
 0xbdb   :  { %v20023_v37 = vmul.f32 0.5, %v20918_v61 }
 0xbdc   :  { %v20026_v13 = vadd.f32 0.5, %v20022_v58 }
 0xbdd   :  { %v20027_v25 = vadd.f32 0.5, %v20023_v37 }
 0xbdf   :  { %v20033_v17 = vcombine.low %v20026_v13, %v20027_v25 }
 0xbe1   :  { %20037 = vst [vmem:[#allocation4 + $0x8] sm:$0x77] %v20033_v17 }
 0xbe2   :  { %20938 = shalt.err (!%p20935_p4)
}
 0xbe3   :  { %s20939_s16 = scalar_lea.hbm %s22733_s9, 256 }
 0xbe4   :  { %p20940_p5 = scmp.ne.s32.totalorder %s22733_s9, %s20939_s16  ;;  %p20943_p6 = scmp.lt.u32.totalorder %s20939_s16, %s22733_s9 }
 0xbe6   :  { %p20945_p7 = pnand %p20943_p6, %p20940_p5 }
 0xbe8   :  { %20948 = shalt.err (!%p20945_p7)
}
 0xbe9   :  { %20047 = dma.vmem_to_hbm [thread:$0]  %s20045_s8, 256, %s22733_s9, [#allocation5]  }
 0xbea   :  { %20949 = dma.done.wait [#allocation5], 256  }
 0xbeb   :  { %20950 = vsyncadd [#allocation5], 4294967040 }
 0xbec   :  { %20051 = vsyncpa [#allocation5], 1 }

</bundles_post_ra>
